<compile_context>
chip_gen: v7x
topology: tpu7x:2x2x1
jax: 0.10.0
libtpu: 0.0.40
codegen_flags: <defaults>
</compile_context>

<pallas_src>
import functools
import math

import jax
import jax.numpy as jnp
from jax.experimental import pallas as pl
from jax.experimental.pallas import tpu as pltpu

EPS = 1e-6


# ---------------------------------------------------------------------------
# Element-wise helpers (all f32 VPU/EUP math).
# ---------------------------------------------------------------------------
def _rmsnorm(x, g):
    ms = jnp.mean(x * x, axis=-1, keepdims=True)
    return x * jax.lax.rsqrt(ms + EPS) * g


def _double_rmsnorm(x, g1, g2):
    # rmsnorm(rmsnorm(x, g1), g2) in one sweep over x (exact, incl. eps).
    x2 = x * x
    ms1 = jnp.mean(x2, axis=-1, keepdims=True)
    ms2 = jnp.mean(x2 * (g1 * g1), axis=-1, keepdims=True)
    r1 = jax.lax.rsqrt(ms1 + EPS)
    r2 = jax.lax.rsqrt(r1 * r1 * ms2 + EPS)
    return x * (r1 * r2) * (g1 * g2)


def _gelu_erf(x):
    # Exact GELU (PyTorch nn.GELU default): 0.5*x*(1+erf(x/sqrt(2))).
    # erf via Abramowitz & Stegun 7.1.26 (|err| < 1.5e-7); only exp / mul /
    # add / select, so it lowers to VPU+EUP with no exotic primitives.
    z = x * (1.0 / math.sqrt(2.0))
    a = jnp.abs(z)
    t = 1.0 / (1.0 + 0.3275911 * a)
    poly = t * (0.254829592 + t * (-0.284496736 + t * (1.421413741
               + t * (-1.453152027 + t * 1.061405429))))
    erf_a = 1.0 - poly * jnp.exp(-a * a)
    erf_z = jnp.where(z < 0.0, -erf_a, erf_a)
    return 0.5 * x * (1.0 + erf_z)


def _split_heads(x, use_einshape):
    # (S, H, dh) -> (H, S, dh); lane-aware relayout (no lane-granular slices).
    if use_einshape:
        return pltpu.einshape("shd->hsd", x)
    h = x.shape[1]
    return jnp.stack([x[:, i, :] for i in range(h)], axis=0)


def _merge_heads(x, use_einshape):
    # (H, S, dh) -> (S, H*dh)
    h, s, dh = x.shape
    if use_einshape:
        return pltpu.einshape("hsd->shd", x).reshape(s, h * dh)
    return jnp.stack([x[i] for i in range(h)], axis=1).reshape(s, h * dh)


# ---------------------------------------------------------------------------
# Fused kernel: whole Encoder forward for one batch-tile.
# grid = (num_batch_tiles [parallel], num_layers [arbitrary],
#         num_hidden_tiles [arbitrary])
# ---------------------------------------------------------------------------
def encoder_kernel(x_ref, gains_ref, wqkv_ref, bqkv_ref, wo_ref, bo_ref,
                   w1_ref, b1_ref, w2_ref, b2_ref,
                   gf_ref, wl_ref, bl_ref,
                   out_ref, x_sc, xm_sc, acc_sc,
                   *, num_heads, seq_len, batch_tile, use_einshape):
    l = pl.program_id(1)
    t = pl.program_id(2)
    num_layers = pl.num_programs(1)
    num_htiles = pl.num_programs(2)

    bf16 = jnp.bfloat16
    BT, S, H = batch_tile, seq_len, num_heads
    M, D = x_sc.shape
    dh = D // H

    # ======= attention + pre-MLP norms: once per layer (hidden tile 0) =====
    @pl.when(t == 0)
    def _attention():
        @pl.when(l == 0)
        def _():
            x_sc[...] = x_ref[...]          # embedded tokens -> resident VMEM

        x = x_sc[...]                        # (M, D) f32
        gains = gains_ref[0]                 # (4, D)
        g_attn_in, g_attn_out, g_mlp_in = gains[0], gains[1], gains[2]

        xn = _rmsnorm(x, g_attn_in)

        # Fused QKV projection (1/sqrt(dh) already folded into Q weights).
        qkv = jnp.dot(xn.astype(bf16), wqkv_ref[0],
                      preferred_element_type=jnp.float32) + bqkv_ref[0]
        q3 = qkv[:, :D].reshape(M, H, dh)
        k3 = qkv[:, D:2 * D].reshape(M, H, dh)
        v3 = qkv[:, 2 * D:].reshape(M, H, dh)

        # Heads folded into a leading einsum batch dim; one relayout per
        # tensor instead of per-head lane slices + concatenates.
        attn_rows = []
        for b in range(BT):
            r0 = b * S
            qh = _split_heads(q3[r0:r0 + S], use_einshape)   # (H, S, dh)
            kh = _split_heads(k3[r0:r0 + S], use_einshape)
            vh = _split_heads(v3[r0:r0 + S], use_einshape)

            s = jnp.einsum('hqd,hkd->hqk', qh.astype(bf16), kh.astype(bf16),
                           preferred_element_type=jnp.float32)   # (H, S, S)
            m = jnp.max(s, axis=-1, keepdims=True)
            e = jnp.exp(s - m)
            p = e * pl.reciprocal(jnp.sum(e, axis=-1, keepdims=True),
                                  approx=True)
            o = jnp.einsum('hqk,hkd->hqd', p.astype(bf16), vh.astype(bf16),
                           preferred_element_type=jnp.float32)   # (H, S, dh)
            attn_rows.append(_merge_heads(o, use_einshape))      # (S, D)
        attn = attn_rows[0] if BT == 1 else jnp.concatenate(attn_rows, axis=0)

        attn = jnp.dot(attn.astype(bf16), wo_ref[0],
                       preferred_element_type=jnp.float32) + bo_ref[0]

        # residual is taken on the norm_attn_in output (per reference module),
        # then fused norm_attn_out + norm_mlp_in.
        xm_sc[...] = _double_rmsnorm(xn + attn, g_attn_out, g_mlp_in)
        acc_sc[...] = jnp.zeros_like(acc_sc)

    # ======= MLP tiled over the 4D hidden dim (grid axis t) ================
    xm = xm_sc[...]                                              # (M, D)
    h1 = jnp.dot(xm.astype(bf16), w1_ref[0],
                 preferred_element_type=jnp.float32) + b1_ref[0]
    h1 = _gelu_erf(h1).astype(bf16)          # bf16 straight into 2nd matmul
    acc_sc[...] += jnp.dot(h1, w2_ref[0], preferred_element_type=jnp.float32)

    # ======= finalize layer on the last hidden tile ========================
    @pl.when(t == num_htiles - 1)
    def _finish_layer():
        g_mlp_out = gains_ref[0][3]
        x_new = _rmsnorm(xm_sc[...] + acc_sc[...] + b2_ref[0], g_mlp_out)
        x_sc[...] = x_new                    # stays resident for next layer

        # final RMSNorm + latent projection after the last layer
        @pl.when(l == num_layers - 1)
        def _():
            y = _rmsnorm(x_new, gf_ref[0])
            out_ref[...] = (jnp.dot(y.astype(jnp.bfloat16), wl_ref[...],
                                    preferred_element_type=jnp.float32)
                            + bl_ref[...]).astype(out_ref.dtype)


# ---------------------------------------------------------------------------
# Wrapper: one pallas_call for the whole encoder stack.
# ---------------------------------------------------------------------------
def encoder_pallas(x_emb, p, *, num_heads, batch_tile=None, hidden_tile=None,
                   use_einshape=None):
    if use_einshape is None:
        use_einshape = hasattr(pltpu, "einshape")

    B, S, D = x_emb.shape
    NL = p["wqkv"].shape[0]
    H4 = p["w1"].shape[-1]
    L = p["wl"].shape[1]

    # ---- row tile: target ~1024 rows per grid step; keep nb >= 2 so the
    # leading "parallel" axis can shard across both v7x TensorCores.
    if batch_tile is None:
        batch_tile = max(1, min(B, 1024 // max(S, 1)))
        if B >= 2:
            batch_tile = min(batch_tile, B // 2)
    while B % batch_tile:
        batch_tile -= 1
    RT = batch_tile * S
    if RT % 8 and batch_tile != B:        # keep the (8,128) block rule happy
        batch_tile, RT = B, B * S
    nb = B // batch_tile

    # ---- MLP hidden-dim tile (caps resident weight blocks; v7x 64MiB VMEM).
    if hidden_tile is None:
        hidden_tile = H4
        if H4 > 2048 and H4 % 128 == 0:
            hidden_tile = 2048
            while H4 % hidden_tile:
                hidden_tile -= 128
    hb = hidden_tile
    nt = H4 // hb

    # ---- pad latent dim to a lane-dense multiple of 128 (unmasked stores).
    Lp = max(128, ((L + 127) // 128) * 128)
    wl, bl = p["wl"], p["bl"]
    if Lp != L:
        wl = jnp.pad(wl, ((0, 0), (0, Lp - L)))
        bl = jnp.pad(bl, ((0, 0), (0, Lp - L)))

    x_flat = x_emb.reshape(B * S, D)

    in_specs = [
        pl.BlockSpec((RT, D), lambda b, l, t: (b, 0)),          # tokens
        pl.BlockSpec((1, 4, D), lambda b, l, t: (l, 0, 0)),     # gains
        pl.BlockSpec((1, D, 3 * D), lambda b, l, t: (l, 0, 0)),  # wqkv
        pl.BlockSpec((1, 1, 3 * D), lambda b, l, t: (l, 0, 0)),  # bqkv
        pl.BlockSpec((1, D, D), lambda b, l, t: (l, 0, 0)),      # wo
        pl.BlockSpec((1, 1, D), lambda b, l, t: (l, 0, 0)),      # bo
        pl.BlockSpec((1, D, hb), lambda b, l, t: (l, 0, t)),     # w1 cols
        pl.BlockSpec((1, 1, hb), lambda b, l, t: (l, 0, t)),     # b1
        pl.BlockSpec((1, hb, D), lambda b, l, t: (l, t, 0)),     # w2 rows
        pl.BlockSpec((1, 1, D), lambda b, l, t: (l, 0, 0)),      # b2
        pl.BlockSpec((1, D), lambda b, l, t: (0, 0)),            # g_final
        pl.BlockSpec((D, Lp), lambda b, l, t: (0, 0)),           # wl
        pl.BlockSpec((1, Lp), lambda b, l, t: (0, 0)),           # bl
    ]
    out_specs = pl.BlockSpec((RT, Lp), lambda b, l, t: (b, 0))

    # ---- explicit scoped-VMEM budget (blocks are double-buffered).
    fs, bs = 4, 2
    wblk = 2 * (4 * D * fs
                + D * 3 * D * bs + 3 * D * fs
                + D * D * bs + D * fs
                + D * hb * bs + hb * fs
                + hb * D * bs + D * fs
                + D * fs + D * Lp * bs + Lp * fs)
    io = 2 * (RT * D * fs + RT * Lp * fs)
    scr = 3 * RT * D * fs
    interm = (RT * 3 * D * fs + 3 * RT * D * fs
              + 2 * batch_tile * num_heads * S * S * fs
              + RT * hb * fs + RT * hb * bs + 2 * RT * D * fs)
    vmem_limit = int(1.5 * (wblk + io + scr + interm))
    vmem_limit = min(max(vmem_limit, 32 * 1024 * 1024), 64 * 1024 * 1024)

    rows = B * S
    flops = int(NL * (2 * rows * D * (3 * D + D + 8 * D) + 4 * rows * S * D)
                + 2 * rows * D * Lp)
    transcend = int(NL * rows * (num_heads * S + 4 * D + 8))
    args = (x_flat, p["gains"], p["wqkv"], p["bqkv"], p["wo"], p["bo"],
            p["w1"], p["b1"], p["w2"], p["b2"], p["g_final"], wl, bl)
    bytes_accessed = int(sum(a.size * a.dtype.itemsize for a in args) * nb
                         + rows * Lp * 4)

    kernel = functools.partial(encoder_kernel, num_heads=num_heads,
                               seq_len=S, batch_tile=batch_tile,
                               use_einshape=use_einshape)

    out = pl.pallas_call(
        kernel,
        out_shape=jax.ShapeDtypeStruct((B * S, Lp), jnp.float32),
        grid=(nb, NL, nt),
        in_specs=in_specs,
        out_specs=out_specs,
        scratch_shapes=[pltpu.VMEM((RT, D), jnp.float32),   # resident x
                        pltpu.VMEM((RT, D), jnp.float32),   # MLP input
                        pltpu.VMEM((RT, D), jnp.float32)],  # MLP accumulator
        compiler_params=pltpu.CompilerParams(
            dimension_semantics=("parallel", "arbitrary", "arbitrary"),
            vmem_limit_bytes=vmem_limit),
        cost_estimate=pl.CostEstimate(flops=flops, transcendentals=transcend,
                                      bytes_accessed=bytes_accessed),
    )(*args)
    return out[:, :L].reshape(B, S, L)


# ---------------------------------------------------------------------------
# Deterministic parameter construction (synthetic weights, not a checkpoint).
# Matmul weights stored bf16 (half the weight DMA); biases / gains f32.
# ---------------------------------------------------------------------------
def init_encoder_params(key, *, dim, num_layers, num_heads, latent_dim):
    h4 = 4 * dim
    qscale = 1.0 / math.sqrt(dim // num_heads)   # folded into Q weights
    keys = jax.random.split(key, 6 * num_layers + 1)

    def lin(k, fi, fo):
        return jax.random.normal(k, (fi, fo), jnp.float32) / math.sqrt(fi)

    wqkv, wo, w1, w2 = [], [], [], []
    for i in range(num_layers):
        ks = keys[6 * i: 6 * i + 6]
        wqkv.append(jnp.concatenate([lin(ks[0], dim, dim) * qscale,
                                     lin(ks[1], dim, dim),
                                     lin(ks[2], dim, dim)], axis=1))
        wo.append(lin(ks[3], dim, dim))
        w1.append(lin(ks[4], dim, h4))
        w2.append(lin(ks[5], h4, dim))

    return {
        # RMSNorm gains stacked: [attn_in, attn_out, mlp_in, mlp_out]
        "gains": jnp.ones((num_layers, 4, dim), jnp.float32),
        "wqkv": jnp.stack(wqkv).astype(jnp.bfloat16),
        "bqkv": jnp.zeros((num_layers, 1, 3 * dim), jnp.float32),
        "wo": jnp.stack(wo).astype(jnp.bfloat16),
        "bo": jnp.zeros((num_layers, 1, dim), jnp.float32),
        "w1": jnp.stack(w1).astype(jnp.bfloat16),
        "b1": jnp.zeros((num_layers, 1, h4), jnp.float32),
        "w2": jnp.stack(w2).astype(jnp.bfloat16),
        "b2": jnp.zeros((num_layers, 1, dim), jnp.float32),
        "g_final": jnp.ones((1, dim), jnp.float32),
        "wl": lin(keys[-1], dim, latent_dim).astype(jnp.bfloat16),
        "bl": jnp.zeros((1, latent_dim), jnp.float32),
    }


def encoder_forward(token_ids, emb, params, num_heads):
    # Embedding lookup is glue (gather) in plain JAX; everything else runs in
    # the single fused Pallas kernel.
    x = jnp.take(emb, token_ids, axis=0)          # (B, S, D)
    try:
        out = encoder_pallas(x, params, num_heads=num_heads)
        jax.block_until_ready(out)
        return out
    except Exception:
        # Fallback: sublane-stack head relayout (no pltpu.einshape path).
        out = encoder_pallas(x, params, num_heads=num_heads,
                             use_einshape=False)
        jax.block_until_ready(out)
        return out


if __name__ == "__main__":
    B, S, D, H = 2, 8, 32, 4          # batch, seq (max_length), dim, heads
    V, L, NUM_LAYERS = 64, 16, 2      # vocab_size, latent_dim, num_layers

    key = jax.random.PRNGKey(0)
    k_emb, k_ids, k_par = jax.random.split(key, 3)

    emb = 0.02 * jax.random.normal(k_emb, (V, D), jnp.float32)
    params = init_encoder_params(k_par, dim=D, num_layers=NUM_LAYERS,
                                 num_heads=H, latent_dim=L)
    token_ids = jax.random.randint(k_ids, (B, S), 0, V)

    out = encoder_forward(token_ids, emb, params, num_heads=H)
    jax.block_until_ready(out)
    assert out.shape == (B, S, L)
    print("KERNEL_OK")
</pallas_src>

<mosaic_0001>
module attributes {stable_mosaic.version = 11 : i64} {
  func.func @encoder_kernel(%arg0: i32, %arg1: i32, %arg2: i32, %arg3: memref<8x32xf32, #tpu.memory_space<vmem>>, %arg4: memref<1x4x32xf32, #tpu.memory_space<vmem>>, %arg5: memref<1x32x96xbf16, #tpu.memory_space<vmem>>, %arg6: memref<1x1x96xf32, #tpu.memory_space<vmem>>, %arg7: memref<1x32x32xbf16, #tpu.memory_space<vmem>>, %arg8: memref<1x1x32xf32, #tpu.memory_space<vmem>>, %arg9: memref<1x32x128xbf16, #tpu.memory_space<vmem>>, %arg10: memref<1x1x128xf32, #tpu.memory_space<vmem>>, %arg11: memref<1x128x32xbf16, #tpu.memory_space<vmem>>, %arg12: memref<1x1x32xf32, #tpu.memory_space<vmem>>, %arg13: memref<1x32xf32, #tpu.memory_space<vmem>>, %arg14: memref<32x128xbf16, #tpu.memory_space<vmem>>, %arg15: memref<1x128xf32, #tpu.memory_space<vmem>>, %arg16: memref<8x128xf32, #tpu.memory_space<vmem>>, %arg17: memref<8x32xf32, #tpu.memory_space<vmem>>, %arg18: memref<8x32xf32, #tpu.memory_space<vmem>>, %arg19: memref<8x32xf32, #tpu.memory_space<vmem>>) attributes {dimension_semantics = [#tpu.dimension_semantics<parallel>, #tpu.dimension_semantics<arbitrary>, #tpu.dimension_semantics<arbitrary>], iteration_bounds = array<i64: 2, 2, 1>, scalar_prefetch = 0 : i64, scratch_operands = 3 : i64, tpu.core_type = #tpu.core_type<tc>, window_params = [{transform_indices = @transform_0, window_bounds = array<i64: 8, 32>}, {transform_indices = @transform_1, window_bounds = array<i64: 1, 4, 32>}, {transform_indices = @transform_2, window_bounds = array<i64: 1, 32, 96>}, {transform_indices = @transform_3, window_bounds = array<i64: 1, 1, 96>}, {transform_indices = @transform_4, window_bounds = array<i64: 1, 32, 32>}, {transform_indices = @transform_5, window_bounds = array<i64: 1, 1, 32>}, {transform_indices = @transform_6, window_bounds = array<i64: 1, 32, 128>}, {transform_indices = @transform_7, window_bounds = array<i64: 1, 1, 128>}, {transform_indices = @transform_8, window_bounds = array<i64: 1, 128, 32>}, {transform_indices = @transform_9, window_bounds = array<i64: 1, 1, 32>}, {pipeline_mode = #tpu.pipeline_mode<synchronous>, transform_indices = @transform_10, window_bounds = array<i64: 1, 32>}, {pipeline_mode = #tpu.pipeline_mode<synchronous>, transform_indices = @transform_11, window_bounds = array<i64: 32, 128>}, {pipeline_mode = #tpu.pipeline_mode<synchronous>, transform_indices = @transform_12, window_bounds = array<i64: 1, 128>}, {transform_indices = @transform_13, window_bounds = array<i64: 8, 128>}]} {
    %c0_i32 = arith.constant 0 : i32
    %0 = arith.cmpi eq, %arg2, %c0_i32 : i32
    %1 = arith.extui %0 : i1 to i32
    %c0_i32_0 = arith.constant 0 : i32
    %2 = arith.cmpi ne, %1, %c0_i32_0 : i32
    scf.if %2 {
      %c0_i32_33 = arith.constant 0 : i32
      %62 = arith.cmpi eq, %arg1, %c0_i32_33 : i32
      %63 = arith.extui %62 : i1 to i32
      %c0_i32_34 = arith.constant 0 : i32
      %64 = arith.cmpi ne, %63, %c0_i32_34 : i32
      scf.if %64 {
        %c0_72 = arith.constant 0 : index
        %c0_73 = arith.constant 0 : index
        %162 = vector.load %arg3[%c0_72, %c0_73] : memref<8x32xf32, #tpu.memory_space<vmem>>, vector<8x32xf32>
        %c0_74 = arith.constant 0 : index
        %c0_75 = arith.constant 0 : index
        %163 = vector.load %arg17[%c0_74, %c0_75] : memref<8x32xf32, #tpu.memory_space<vmem>>, vector<8x32xf32>
        tpu.vector_store %arg17[%c0_74, %c0_75], %162 {strides = array<i32>} : memref<8x32xf32, #tpu.memory_space<vmem>>, vector<8x32xf32>,
      } else {
      }
      %c0_35 = arith.constant 0 : index
      %c0_36 = arith.constant 0 : index
      %65 = vector.load %arg17[%c0_35, %c0_36] : memref<8x32xf32, #tpu.memory_space<vmem>>, vector<8x32xf32>
      %c0_37 = arith.constant 0 : index
      %c0_38 = arith.constant 0 : index
      %c0_39 = arith.constant 0 : index
      %66 = vector.load %arg4[%c0_37, %c0_38, %c0_39] : memref<1x4x32xf32, #tpu.memory_space<vmem>>, vector<1x4x32xf32>
      %67 = vector.shape_cast %66 : vector<1x4x32xf32> to vector<4x32xf32>
      %68 = vector.extract_strided_slice %67 {offsets = [0, 0], sizes = [1, 32], strides = [1, 1]} : vector<4x32xf32> to vector<1x32xf32>
      %69 = vector.shape_cast %68 : vector<1x32xf32> to vector<32xf32>
      %70 = vector.extract_strided_slice %67 {offsets = [1, 0], sizes = [1, 32], strides = [1, 1]} : vector<4x32xf32> to vector<1x32xf32>
      %71 = vector.shape_cast %70 : vector<1x32xf32> to vector<32xf32>
      %72 = vector.extract_strided_slice %67 {offsets = [2, 0], sizes = [1, 32], strides = [1, 1]} : vector<4x32xf32> to vector<1x32xf32>
      %73 = vector.shape_cast %72 : vector<1x32xf32> to vector<32xf32>
      %74 = arith.mulf %65, %65 : vector<8x32xf32>
      %cst_40 = arith.constant dense<0.000000e+00> : vector<8xf32>
      %75 = vector.multi_reduction <add>, %74, %cst_40 [1] : vector<8x32xf32> to vector<8xf32>
      %76 = vector.shape_cast %75 : vector<8xf32> to vector<8x1xf32>
      %cst_41 = arith.constant 3.200000e+01 : f32
      %77 = vector.broadcast %cst_41 : f32 to vector<8x1xf32>
      %78 = arith.divf %76, %77 : vector<8x1xf32>
      %cst_42 = arith.constant 9.99999997E-7 : f32
      %79 = vector.broadcast %cst_42 : f32 to vector<8x1xf32>
      %80 = arith.addf %78, %79 : vector<8x1xf32>
      %81 = math.rsqrt %80 : vector<8x1xf32>
      %82 = vector.broadcast %81 : vector<8x1xf32> to vector<8x32xf32>
      %83 = arith.mulf %65, %82 : vector<8x32xf32>
      %84 = vector.shape_cast %69 : vector<32xf32> to vector<1x32xf32>
      %85 = vector.broadcast %84 : vector<1x32xf32> to vector<8x32xf32>
      %86 = arith.mulf %83, %85 : vector<8x32xf32>
      %87 = arith.truncf %86 : vector<8x32xf32> to vector<8x32xbf16>
      %c0_43 = arith.constant 0 : index
      %c0_44 = arith.constant 0 : index
      %c0_45 = arith.constant 0 : index
      %88 = vector.load %arg5[%c0_43, %c0_44, %c0_45] : memref<1x32x96xbf16, #tpu.memory_space<vmem>>, vector<1x32x96xbf16>
      %89 = vector.shape_cast %88 : vector<1x32x96xbf16> to vector<32x96xbf16>
      %cst_46 = arith.constant dense<0.000000e+00> : vector<8x96xf32>
      %90 = tpu.matmul %87, %89, %cst_46 {dimension_numbers = #tpu.dot_dimension_numbers<[1], [0], [0], [1], [0, 0, 1, 1], [], []>} : vector<8x32xbf16>, vector<32x96xbf16>, vector<8x96xf32> -> vector<8x96xf32>
      %c0_47 = arith.constant 0 : index
      %c0_48 = arith.constant 0 : index
      %c0_49 = arith.constant 0 : index
      %91 = vector.load %arg6[%c0_47, %c0_48, %c0_49] : memref<1x1x96xf32, #tpu.memory_space<vmem>>, vector<1x1x96xf32>
      %92 = vector.shape_cast %91 : vector<1x1x96xf32> to vector<1x96xf32>
      %93 = vector.broadcast %92 : vector<1x96xf32> to vector<8x96xf32>
      %94 = arith.addf %90, %93 : vector<8x96xf32>
      %95 = vector.extract_strided_slice %94 {offsets = [0, 0], sizes = [8, 32], strides = [1, 1]} : vector<8x96xf32> to vector<8x32xf32>
      %96 = vector.shape_cast %95 : vector<8x32xf32> to vector<8x4x8xf32>
      %97 = vector.extract_strided_slice %94 {offsets = [0, 32], sizes = [8, 32], strides = [1, 1]} : vector<8x96xf32> to vector<8x32xf32>
      %98 = vector.shape_cast %97 : vector<8x32xf32> to vector<8x4x8xf32>
      %99 = vector.extract_strided_slice %94 {offsets = [0, 64], sizes = [8, 32], strides = [1, 1]} : vector<8x96xf32> to vector<8x32xf32>
      %100 = vector.shape_cast %99 : vector<8x32xf32> to vector<8x4x8xf32>
      %101 = tpu.transpose %96, [1, 0, 2] : vector<8x4x8xf32> -> vector<4x8x8xf32>
      %102 = tpu.transpose %98, [1, 0, 2] : vector<8x4x8xf32> -> vector<4x8x8xf32>
      %103 = tpu.transpose %100, [1, 0, 2] : vector<8x4x8xf32> -> vector<4x8x8xf32>
      %104 = arith.truncf %101 : vector<4x8x8xf32> to vector<4x8x8xbf16>
      %105 = arith.truncf %102 : vector<4x8x8xf32> to vector<4x8x8xbf16>
      "tpu.trace_start"() <{level = 10 : i32, message = "hqd,hkd->hqk"}> : () -> ()
      %cst_50 = arith.constant dense<0.000000e+00> : vector<4x8x8xf32>
      %106 = tpu.matmul %104, %105, %cst_50 {dimension_numbers = #tpu.dot_dimension_numbers<[2], [2], [1], [1], [0, 0, 0, 1, 1, 1], [0], [0]>} : vector<4x8x8xbf16>, vector<4x8x8xbf16>, vector<4x8x8xf32> -> vector<4x8x8xf32>
      "tpu.trace_stop"() : () -> ()
      %cst_51 = arith.constant dense<0xFF800000> : vector<4x8xf32>
      %107 = vector.multi_reduction <maximumf>, %106, %cst_51 [2] : vector<4x8x8xf32> to vector<4x8xf32>
      %108 = vector.shape_cast %107 : vector<4x8xf32> to vector<4x8x1xf32>
      %109 = vector.broadcast %108 : vector<4x8x1xf32> to vector<4x8x8xf32>
      %110 = arith.subf %106, %109 : vector<4x8x8xf32>
      %111 = math.exp %110 : vector<4x8x8xf32>
      %cst_52 = arith.constant dense<0.000000e+00> : vector<4x8xf32>
      %112 = vector.multi_reduction <add>, %111, %cst_52 [2] : vector<4x8x8xf32> to vector<4x8xf32>
      %113 = vector.shape_cast %112 : vector<4x8xf32> to vector<4x8x1xf32>
      %114 = tpu.reciprocal %113 {approx = true} : vector<4x8x1xf32> -> vector<4x8x1xf32>
      %115 = vector.broadcast %114 : vector<4x8x1xf32> to vector<4x8x8xf32>
      %116 = arith.mulf %111, %115 : vector<4x8x8xf32>
      %117 = arith.truncf %116 : vector<4x8x8xf32> to vector<4x8x8xbf16>
      %118 = arith.truncf %103 : vector<4x8x8xf32> to vector<4x8x8xbf16>
      "tpu.trace_start"() <{level = 10 : i32, message = "hqk,hkd->hqd"}> : () -> ()
      %cst_53 = arith.constant dense<0.000000e+00> : vector<4x8x8xf32>
      %119 = tpu.matmul %117, %118, %cst_53 {dimension_numbers = #tpu.dot_dimension_numbers<[2], [1], [1], [2], [0, 0, 0, 1, 1, 2], [0], [0]>} : vector<4x8x8xbf16>, vector<4x8x8xbf16>, vector<4x8x8xf32> -> vector<4x8x8xf32>
      "tpu.trace_stop"() : () -> ()
      %120 = tpu.transpose %119, [1, 0, 2] : vector<4x8x8xf32> -> vector<8x4x8xf32>
      %121 = vector.shape_cast %120 : vector<8x4x8xf32> to vector<8x32xf32>
      %122 = arith.truncf %121 : vector<8x32xf32> to vector<8x32xbf16>
      %c0_54 = arith.constant 0 : index
      %c0_55 = arith.constant 0 : index
      %c0_56 = arith.constant 0 : index
      %123 = vector.load %arg7[%c0_54, %c0_55, %c0_56] : memref<1x32x32xbf16, #tpu.memory_space<vmem>>, vector<1x32x32xbf16>
      %124 = vector.shape_cast %123 : vector<1x32x32xbf16> to vector<32x32xbf16>
      %cst_57 = arith.constant dense<0.000000e+00> : vector<8x32xf32>
      %125 = tpu.matmul %122, %124, %cst_57 {dimension_numbers = #tpu.dot_dimension_numbers<[1], [0], [0], [1], [0, 0, 1, 1], [], []>} : vector<8x32xbf16>, vector<32x32xbf16>, vector<8x32xf32> -> vector<8x32xf32>
      %c0_58 = arith.constant 0 : index
      %c0_59 = arith.constant 0 : index
      %c0_60 = arith.constant 0 : index
      %126 = vector.load %arg8[%c0_58, %c0_59, %c0_60] : memref<1x1x32xf32, #tpu.memory_space<vmem>>, vector<1x1x32xf32>
      %127 = vector.shape_cast %126 : vector<1x1x32xf32> to vector<1x32xf32>
      %128 = vector.broadcast %127 : vector<1x32xf32> to vector<8x32xf32>
      %129 = arith.addf %125, %128 : vector<8x32xf32>
      %130 = arith.addf %86, %129 : vector<8x32xf32>
      %131 = arith.mulf %130, %130 : vector<8x32xf32>
      %cst_61 = arith.constant dense<0.000000e+00> : vector<8xf32>
      %132 = vector.multi_reduction <add>, %131, %cst_61 [1] : vector<8x32xf32> to vector<8xf32>
      %133 = vector.shape_cast %132 : vector<8xf32> to vector<8x1xf32>
      %cst_62 = arith.constant 3.200000e+01 : f32
      %134 = vector.broadcast %cst_62 : f32 to vector<8x1xf32>
      %135 = arith.divf %133, %134 : vector<8x1xf32>
      %136 = arith.mulf %71, %71 : vector<32xf32>
      %137 = vector.shape_cast %136 : vector<32xf32> to vector<1x32xf32>
      %138 = vector.broadcast %137 : vector<1x32xf32> to vector<8x32xf32>
      %139 = arith.mulf %131, %138 : vector<8x32xf32>
      %cst_63 = arith.constant dense<0.000000e+00> : vector<8xf32>
      %140 = vector.multi_reduction <add>, %139, %cst_63 [1] : vector<8x32xf32> to vector<8xf32>
      %141 = vector.shape_cast %140 : vector<8xf32> to vector<8x1xf32>
      %cst_64 = arith.constant 3.200000e+01 : f32
      %142 = vector.broadcast %cst_64 : f32 to vector<8x1xf32>
      %143 = arith.divf %141, %142 : vector<8x1xf32>
      %cst_65 = arith.constant 9.99999997E-7 : f32
      %144 = vector.broadcast %cst_65 : f32 to vector<8x1xf32>
      %145 = arith.addf %135, %144 : vector<8x1xf32>
      %146 = math.rsqrt %145 : vector<8x1xf32>
      %147 = arith.mulf %146, %146 : vector<8x1xf32>
      %148 = arith.mulf %147, %143 : vector<8x1xf32>
      %cst_66 = arith.constant 9.99999997E-7 : f32
      %149 = vector.broadcast %cst_66 : f32 to vector<8x1xf32>
      %150 = arith.addf %148, %149 : vector<8x1xf32>
      %151 = math.rsqrt %150 : vector<8x1xf32>
      %152 = arith.mulf %146, %151 : vector<8x1xf32>
      %153 = vector.broadcast %152 : vector<8x1xf32> to vector<8x32xf32>
      %154 = arith.mulf %130, %153 : vector<8x32xf32>
      %155 = arith.mulf %71, %73 : vector<32xf32>
      %156 = vector.shape_cast %155 : vector<32xf32> to vector<1x32xf32>
      %157 = vector.broadcast %156 : vector<1x32xf32> to vector<8x32xf32>
      %158 = arith.mulf %154, %157 : vector<8x32xf32>
      %c0_67 = arith.constant 0 : index
      %c0_68 = arith.constant 0 : index
      %159 = vector.load %arg18[%c0_67, %c0_68] : memref<8x32xf32, #tpu.memory_space<vmem>>, vector<8x32xf32>
      tpu.vector_store %arg18[%c0_67, %c0_68], %158 {strides = array<i32>} : memref<8x32xf32, #tpu.memory_space<vmem>>, vector<8x32xf32>,
      %cst_69 = arith.constant 0.000000e+00 : f32
      %160 = vector.broadcast %cst_69 : f32 to vector<8x32xf32>
      %c0_70 = arith.constant 0 : index
      %c0_71 = arith.constant 0 : index
      %161 = vector.load %arg19[%c0_70, %c0_71] : memref<8x32xf32, #tpu.memory_space<vmem>>, vector<8x32xf32>
      tpu.vector_store %arg19[%c0_70, %c0_71], %160 {strides = array<i32>} : memref<8x32xf32, #tpu.memory_space<vmem>>, vector<8x32xf32>,
    } else {
    }
    %c0 = arith.constant 0 : index
    %c0_1 = arith.constant 0 : index
    %3 = vector.load %arg18[%c0, %c0_1] : memref<8x32xf32, #tpu.memory_space<vmem>>, vector<8x32xf32>
    %4 = arith.truncf %3 : vector<8x32xf32> to vector<8x32xbf16>
    %c0_2 = arith.constant 0 : index
    %c0_3 = arith.constant 0 : index
    %c0_4 = arith.constant 0 : index
    %5 = vector.load %arg9[%c0_2, %c0_3, %c0_4] : memref<1x32x128xbf16, #tpu.memory_space<vmem>>, vector<1x32x128xbf16>
    %6 = vector.shape_cast %5 : vector<1x32x128xbf16> to vector<32x128xbf16>
    %cst = arith.constant dense<0.000000e+00> : vector<8x128xf32>
    %7 = tpu.matmul %4, %6, %cst {dimension_numbers = #tpu.dot_dimension_numbers<[1], [0], [0], [1], [0, 0, 1, 1], [], []>} : vector<8x32xbf16>, vector<32x128xbf16>, vector<8x128xf32> -> vector<8x128xf32>
    %c0_5 = arith.constant 0 : index
    %c0_6 = arith.constant 0 : index
    %c0_7 = arith.constant 0 : index
    %8 = vector.load %arg10[%c0_5, %c0_6, %c0_7] : memref<1x1x128xf32, #tpu.memory_space<vmem>>, vector<1x1x128xf32>
    %9 = vector.shape_cast %8 : vector<1x1x128xf32> to vector<1x128xf32>
    %10 = vector.broadcast %9 : vector<1x128xf32> to vector<8x128xf32>
    %11 = arith.addf %7, %10 : vector<8x128xf32>
    %cst_8 = arith.constant 0.707106769 : f32
    %12 = vector.broadcast %cst_8 : f32 to vector<8x128xf32>
    %13 = arith.mulf %11, %12 : vector<8x128xf32>
    %14 = math.absf %13 : vector<8x128xf32>
    %cst_9 = arith.constant 0.327591091 : f32
    %15 = vector.broadcast %cst_9 : f32 to vector<8x128xf32>
    %16 = arith.mulf %15, %14 : vector<8x128xf32>
    %cst_10 = arith.constant 1.000000e+00 : f32
    %17 = vector.broadcast %cst_10 : f32 to vector<8x128xf32>
    %18 = arith.addf %17, %16 : vector<8x128xf32>
    %cst_11 = arith.constant 1.000000e+00 : f32
    %19 = vector.broadcast %cst_11 : f32 to vector<8x128xf32>
    %20 = arith.divf %19, %18 : vector<8x128xf32>
    %cst_12 = arith.constant 1.06140542 : f32
    %21 = vector.broadcast %cst_12 : f32 to vector<8x128xf32>
    %22 = arith.mulf %20, %21 : vector<8x128xf32>
    %cst_13 = arith.constant -1.45315206 : f32
    %23 = vector.broadcast %cst_13 : f32 to vector<8x128xf32>
    %24 = arith.addf %23, %22 : vector<8x128xf32>
    %25 = arith.mulf %20, %24 : vector<8x128xf32>
    %cst_14 = arith.constant 1.42141378 : f32
    %26 = vector.broadcast %cst_14 : f32 to vector<8x128xf32>
    %27 = arith.addf %26, %25 : vector<8x128xf32>
    %28 = arith.mulf %20, %27 : vector<8x128xf32>
    %cst_15 = arith.constant -0.284496725 : f32
    %29 = vector.broadcast %cst_15 : f32 to vector<8x128xf32>
    %30 = arith.addf %29, %28 : vector<8x128xf32>
    %31 = arith.mulf %20, %30 : vector<8x128xf32>
    %cst_16 = arith.constant 0.254829586 : f32
    %32 = vector.broadcast %cst_16 : f32 to vector<8x128xf32>
    %33 = arith.addf %32, %31 : vector<8x128xf32>
    %34 = arith.mulf %20, %33 : vector<8x128xf32>
    %cst_17 = arith.constant 0.000000e+00 : f32
    %35 = vector.broadcast %cst_17 : f32 to vector<8x128xf32>
    %36 = arith.subf %35, %14 : vector<8x128xf32>
    %37 = arith.mulf %36, %14 : vector<8x128xf32>
    %38 = math.exp %37 : vector<8x128xf32>
    %39 = arith.mulf %34, %38 : vector<8x128xf32>
    %cst_18 = arith.constant 1.000000e+00 : f32
    %40 = vector.broadcast %cst_18 : f32 to vector<8x128xf32>
    %41 = arith.subf %40, %39 : vector<8x128xf32>
    %cst_19 = arith.constant 0.000000e+00 : f32
    %42 = vector.broadcast %cst_19 : f32 to vector<8x128xf32>
    %43 = arith.cmpf olt, %13, %42 : vector<8x128xf32>
    %cst_20 = arith.constant 0.000000e+00 : f32
    %44 = vector.broadcast %cst_20 : f32 to vector<8x128xf32>
    %45 = arith.subf %44, %41 : vector<8x128xf32>
    %46 = arith.select %43, %45, %41 : vector<8x128xi1>, vector<8x128xf32>
    %cst_21 = arith.constant 5.000000e-01 : f32
    %47 = vector.broadcast %cst_21 : f32 to vector<8x128xf32>
    %48 = arith.mulf %47, %11 : vector<8x128xf32>
    %cst_22 = arith.constant 1.000000e+00 : f32
    %49 = vector.broadcast %cst_22 : f32 to vector<8x128xf32>
    %50 = arith.addf %49, %46 : vector<8x128xf32>
    %51 = arith.mulf %48, %50 : vector<8x128xf32>
    %52 = arith.truncf %51 : vector<8x128xf32> to vector<8x128xbf16>
    %c0_23 = arith.constant 0 : index
    %c0_24 = arith.constant 0 : index
    %53 = vector.load %arg19[%c0_23, %c0_24] : memref<8x32xf32, #tpu.memory_space<vmem>>, vector<8x32xf32>
    %c0_25 = arith.constant 0 : index
    %c0_26 = arith.constant 0 : index
    %c0_27 = arith.constant 0 : index
    %54 = vector.load %arg11[%c0_25, %c0_26, %c0_27] : memref<1x128x32xbf16, #tpu.memory_space<vmem>>, vector<1x128x32xbf16>
    %55 = vector.shape_cast %54 : vector<1x128x32xbf16> to vector<128x32xbf16>
    %cst_28 = arith.constant dense<0.000000e+00> : vector<8x32xf32>
    %56 = tpu.matmul %52, %55, %cst_28 {dimension_numbers = #tpu.dot_dimension_numbers<[1], [0], [0], [1], [0, 0, 1, 1], [], []>} : vector<8x128xbf16>, vector<128x32xbf16>, vector<8x32xf32> -> vector<8x32xf32>
    %57 = arith.addf %53, %56 : vector<8x32xf32>
    %c0_29 = arith.constant 0 : index
    %c0_30 = arith.constant 0 : index
    %58 = vector.load %arg19[%c0_29, %c0_30] : memref<8x32xf32, #tpu.memory_space<vmem>>, vector<8x32xf32>
    tpu.vector_store %arg19[%c0_29, %c0_30], %57 {strides = array<i32>} : memref<8x32xf32, #tpu.memory_space<vmem>>, vector<8x32xf32>,
    %c0_i32_31 = arith.constant 0 : i32
    %59 = arith.cmpi eq, %arg2, %c0_i32_31 : i32
    %60 = arith.extui %59 : i1 to i32
    %c0_i32_32 = arith.constant 0 : i32
    %61 = arith.cmpi ne, %60, %c0_i32_32 : i32
    scf.if %61 {
      %c0_33 = arith.constant 0 : index
      %c0_34 = arith.constant 0 : index
      %c0_35 = arith.constant 0 : index
      %62 = vector.load %arg4[%c0_33, %c0_34, %c0_35] : memref<1x4x32xf32, #tpu.memory_space<vmem>>, vector<1x4x32xf32>
      %63 = vector.shape_cast %62 : vector<1x4x32xf32> to vector<4x32xf32>
      %64 = vector.extract_strided_slice %63 {offsets = [3, 0], sizes = [1, 32], strides = [1, 1]} : vector<4x32xf32> to vector<1x32xf32>
      %65 = vector.shape_cast %64 : vector<1x32xf32> to vector<32xf32>
      %c0_36 = arith.constant 0 : index
      %c0_37 = arith.constant 0 : index
      %66 = vector.load %arg18[%c0_36, %c0_37] : memref<8x32xf32, #tpu.memory_space<vmem>>, vector<8x32xf32>
      %c0_38 = arith.constant 0 : index
      %c0_39 = arith.constant 0 : index
      %67 = vector.load %arg19[%c0_38, %c0_39] : memref<8x32xf32, #tpu.memory_space<vmem>>, vector<8x32xf32>
      %68 = arith.addf %66, %67 : vector<8x32xf32>
      %c0_40 = arith.constant 0 : index
      %c0_41 = arith.constant 0 : index
      %c0_42 = arith.constant 0 : index
      %69 = vector.load %arg12[%c0_40, %c0_41, %c0_42] : memref<1x1x32xf32, #tpu.memory_space<vmem>>, vector<1x1x32xf32>
      %70 = vector.shape_cast %69 : vector<1x1x32xf32> to vector<1x32xf32>
      %71 = vector.broadcast %70 : vector<1x32xf32> to vector<8x32xf32>
      %72 = arith.addf %68, %71 : vector<8x32xf32>
      %73 = arith.mulf %72, %72 : vector<8x32xf32>
      %cst_43 = arith.constant dense<0.000000e+00> : vector<8xf32>
      %74 = vector.multi_reduction <add>, %73, %cst_43 [1] : vector<8x32xf32> to vector<8xf32>
      %75 = vector.shape_cast %74 : vector<8xf32> to vector<8x1xf32>
      %cst_44 = arith.constant 3.200000e+01 : f32
      %76 = vector.broadcast %cst_44 : f32 to vector<8x1xf32>
      %77 = arith.divf %75, %76 : vector<8x1xf32>
      %cst_45 = arith.constant 9.99999997E-7 : f32
      %78 = vector.broadcast %cst_45 : f32 to vector<8x1xf32>
      %79 = arith.addf %77, %78 : vector<8x1xf32>
      %80 = math.rsqrt %79 : vector<8x1xf32>
      %81 = vector.broadcast %80 : vector<8x1xf32> to vector<8x32xf32>
      %82 = arith.mulf %72, %81 : vector<8x32xf32>
      %83 = vector.shape_cast %65 : vector<32xf32> to vector<1x32xf32>
      %84 = vector.broadcast %83 : vector<1x32xf32> to vector<8x32xf32>
      %85 = arith.mulf %82, %84 : vector<8x32xf32>
      %c0_46 = arith.constant 0 : index
      %c0_47 = arith.constant 0 : index
      %86 = vector.load %arg17[%c0_46, %c0_47] : memref<8x32xf32, #tpu.memory_space<vmem>>, vector<8x32xf32>
      tpu.vector_store %arg17[%c0_46, %c0_47], %85 {strides = array<i32>} : memref<8x32xf32, #tpu.memory_space<vmem>>, vector<8x32xf32>,
      %c1_i32 = arith.constant 1 : i32
      %87 = arith.cmpi eq, %arg1, %c1_i32 : i32
      %88 = arith.extui %87 : i1 to i32
      %c0_i32_48 = arith.constant 0 : i32
      %89 = arith.cmpi ne, %88, %c0_i32_48 : i32
      scf.if %89 {
        %c0_49 = arith.constant 0 : index
        %c0_50 = arith.constant 0 : index
        %90 = vector.load %arg13[%c0_49, %c0_50] : memref<1x32xf32, #tpu.memory_space<vmem>>, vector<1x32xf32>
        %91 = vector.shape_cast %90 : vector<1x32xf32> to vector<32xf32>
        %92 = arith.mulf %85, %85 : vector<8x32xf32>
        %cst_51 = arith.constant dense<0.000000e+00> : vector<8xf32>
        %93 = vector.multi_reduction <add>, %92, %cst_51 [1] : vector<8x32xf32> to vector<8xf32>
        %94 = vector.shape_cast %93 : vector<8xf32> to vector<8x1xf32>
        %cst_52 = arith.constant 3.200000e+01 : f32
        %95 = vector.broadcast %cst_52 : f32 to vector<8x1xf32>
        %96 = arith.divf %94, %95 : vector<8x1xf32>
        %cst_53 = arith.constant 9.99999997E-7 : f32
        %97 = vector.broadcast %cst_53 : f32 to vector<8x1xf32>
        %98 = arith.addf %96, %97 : vector<8x1xf32>
        %99 = math.rsqrt %98 : vector<8x1xf32>
        %100 = vector.broadcast %99 : vector<8x1xf32> to vector<8x32xf32>
        %101 = arith.mulf %85, %100 : vector<8x32xf32>
        %102 = vector.shape_cast %91 : vector<32xf32> to vector<1x32xf32>
        %103 = vector.broadcast %102 : vector<1x32xf32> to vector<8x32xf32>
        %104 = arith.mulf %101, %103 : vector<8x32xf32>
        %105 = arith.truncf %104 : vector<8x32xf32> to vector<8x32xbf16>
        %c0_54 = arith.constant 0 : index
        %c0_55 = arith.constant 0 : index
        %106 = vector.load %arg14[%c0_54, %c0_55] : memref<32x128xbf16, #tpu.memory_space<vmem>>, vector<32x128xbf16>
        %cst_56 = arith.constant dense<0.000000e+00> : vector<8x128xf32>
        %107 = tpu.matmul %105, %106, %cst_56 {dimension_numbers = #tpu.dot_dimension_numbers<[1], [0], [0], [1], [0, 0, 1, 1], [], []>} : vector<8x32xbf16>, vector<32x128xbf16>, vector<8x128xf32> -> vector<8x128xf32>
        %c0_57 = arith.constant 0 : index
        %c0_58 = arith.constant 0 : index
        %108 = vector.load %arg15[%c0_57, %c0_58] : memref<1x128xf32, #tpu.memory_space<vmem>>, vector<1x128xf32>
        %109 = vector.broadcast %108 : vector<1x128xf32> to vector<8x128xf32>
        %110 = arith.addf %107, %109 : vector<8x128xf32>
        %c0_59 = arith.constant 0 : index
        %c0_60 = arith.constant 0 : index
        %111 = vector.load %arg16[%c0_59, %c0_60] : memref<8x128xf32, #tpu.memory_space<vmem>>, vector<8x128xf32>
        tpu.vector_store %arg16[%c0_59, %c0_60], %110 {strides = array<i32>} : memref<8x128xf32, #tpu.memory_space<vmem>>, vector<8x128xf32>,
      } else {
      }
    } else {
    }
    return
  }
  func.func @transform_0(%arg0: i32, %arg1: i32, %arg2: i32) -> (i32, i32) {
    %c0_i32 = arith.constant 0 : i32
    %c0_i32_0 = arith.constant 0 : i32
    return %arg0, %c0_i32 : i32, i32
  }
  func.func @transform_1(%arg0: i32, %arg1: i32, %arg2: i32) -> (i32, i32, i32) {
    %c0_i32 = arith.constant 0 : i32
    %c0_i32_0 = arith.constant 0 : i32
    %c0_i32_1 = arith.constant 0 : i32
    return %arg1, %c0_i32, %c0_i32_0 : i32, i32, i32
  }
  func.func @transform_2(%arg0: i32, %arg1: i32, %arg2: i32) -> (i32, i32, i32) {
    %c0_i32 = arith.constant 0 : i32
    %c0_i32_0 = arith.constant 0 : i32
    %c0_i32_1 = arith.constant 0 : i32
    return %arg1, %c0_i32, %c0_i32_0 : i32, i32, i32
  }
  func.func @transform_3(%arg0: i32, %arg1: i32, %arg2: i32) -> (i32, i32, i32) {
    %c0_i32 = arith.constant 0 : i32
    %c0_i32_0 = arith.constant 0 : i32
    %c0_i32_1 = arith.constant 0 : i32
    return %arg1, %c0_i32, %c0_i32_0 : i32, i32, i32
  }
  func.func @transform_4(%arg0: i32, %arg1: i32, %arg2: i32) -> (i32, i32, i32) {
    %c0_i32 = arith.constant 0 : i32
    %c0_i32_0 = arith.constant 0 : i32
    %c0_i32_1 = arith.constant 0 : i32
    return %arg1, %c0_i32, %c0_i32_0 : i32, i32, i32
  }
  func.func @transform_5(%arg0: i32, %arg1: i32, %arg2: i32) -> (i32, i32, i32) {
    %c0_i32 = arith.constant 0 : i32
    %c0_i32_0 = arith.constant 0 : i32
    %c0_i32_1 = arith.constant 0 : i32
    return %arg1, %c0_i32, %c0_i32_0 : i32, i32, i32
  }
  func.func @transform_6(%arg0: i32, %arg1: i32, %arg2: i32) -> (i32, i32, i32) {
    %c0_i32 = arith.constant 0 : i32
    %c0_i32_0 = arith.constant 0 : i32
    return %arg1, %c0_i32, %arg2 : i32, i32, i32
  }
  func.func @transform_7(%arg0: i32, %arg1: i32, %arg2: i32) -> (i32, i32, i32) {
    %c0_i32 = arith.constant 0 : i32
    %c0_i32_0 = arith.constant 0 : i32
    return %arg1, %c0_i32, %arg2 : i32, i32, i32
  }
  func.func @transform_8(%arg0: i32, %arg1: i32, %arg2: i32) -> (i32, i32, i32) {
    %c0_i32 = arith.constant 0 : i32
    %c0_i32_0 = arith.constant 0 : i32
    return %arg1, %arg2, %c0_i32 : i32, i32, i32
  }
  func.func @transform_9(%arg0: i32, %arg1: i32, %arg2: i32) -> (i32, i32, i32) {
    %c0_i32 = arith.constant 0 : i32
    %c0_i32_0 = arith.constant 0 : i32
    %c0_i32_1 = arith.constant 0 : i32
    return %arg1, %c0_i32, %c0_i32_0 : i32, i32, i32
  }
  func.func @transform_10(%arg0: i32, %arg1: i32, %arg2: i32) -> (i32, i32) {
    %c0_i32 = arith.constant 0 : i32
    %c0_i32_0 = arith.constant 0 : i32
    %c0_i32_1 = arith.constant 0 : i32
    return %c0_i32, %c0_i32_0 : i32, i32
  }
  func.func @transform_11(%arg0: i32, %arg1: i32, %arg2: i32) -> (i32, i32) {
    %c0_i32 = arith.constant 0 : i32
    %c0_i32_0 = arith.constant 0 : i32
    %c0_i32_1 = arith.constant 0 : i32
    return %c0_i32, %c0_i32_0 : i32, i32
  }
  func.func @transform_12(%arg0: i32, %arg1: i32, %arg2: i32) -> (i32, i32) {
    %c0_i32 = arith.constant 0 : i32
    %c0_i32_0 = arith.constant 0 : i32
    %c0_i32_1 = arith.constant 0 : i32
    return %c0_i32, %c0_i32_0 : i32, i32
  }
  func.func @transform_13(%arg0: i32, %arg1: i32, %arg2: i32) -> (i32, i32) {
    %c0_i32 = arith.constant 0 : i32
    %c0_i32_0 = arith.constant 0 : i32
    return %arg0, %c0_i32 : i32, i32
  }
}

module attributes {stable_mosaic.version = 11 : i64} {
  func.func @encoder_kernel(%arg0: i32, %arg1: i32, %arg2: i32, %arg3: memref<8x32xf32, #tpu.memory_space<vmem>>, %arg4: memref<1x4x32xf32, #tpu.memory_space<vmem>>, %arg5: memref<1x32x96xbf16, #tpu.memory_space<vmem>>, %arg6: memref<1x1x96xf32, #tpu.memory_space<vmem>>, %arg7: memref<1x32x32xbf16, #tpu.memory_space<vmem>>, %arg8: memref<1x1x32xf32, #tpu.memory_space<vmem>>, %arg9: memref<1x32x128xbf16, #tpu.memory_space<vmem>>, %arg10: memref<1x1x128xf32, #tpu.memory_space<vmem>>, %arg11: memref<1x128x32xbf16, #tpu.memory_space<vmem>>, %arg12: memref<1x1x32xf32, #tpu.memory_space<vmem>>, %arg13: memref<1x32xf32, #tpu.memory_space<vmem>>, %arg14: memref<32x128xbf16, #tpu.memory_space<vmem>>, %arg15: memref<1x128xf32, #tpu.memory_space<vmem>>, %arg16: memref<8x128xf32, #tpu.memory_space<vmem>>, %arg17: memref<8x32xf32, #tpu.memory_space<vmem>>, %arg18: memref<8x32xf32, #tpu.memory_space<vmem>>, %arg19: memref<8x32xf32, #tpu.memory_space<vmem>>) attributes {dimension_semantics = [#tpu.dimension_semantics<parallel>, #tpu.dimension_semantics<arbitrary>, #tpu.dimension_semantics<arbitrary>], iteration_bounds = array<i64: 2, 2, 1>, scalar_prefetch = 0 : i64, scratch_operands = 3 : i64, tpu.core_type = #tpu.core_type<tc>, window_params = [{transform_indices = @transform_0, window_bounds = array<i64: 8, 32>}, {transform_indices = @transform_1, window_bounds = array<i64: 1, 4, 32>}, {transform_indices = @transform_2, window_bounds = array<i64: 1, 32, 96>}, {transform_indices = @transform_3, window_bounds = array<i64: 1, 1, 96>}, {transform_indices = @transform_4, window_bounds = array<i64: 1, 32, 32>}, {transform_indices = @transform_5, window_bounds = array<i64: 1, 1, 32>}, {transform_indices = @transform_6, window_bounds = array<i64: 1, 32, 128>}, {transform_indices = @transform_7, window_bounds = array<i64: 1, 1, 128>}, {transform_indices = @transform_8, window_bounds = array<i64: 1, 128, 32>}, {transform_indices = @transform_9, window_bounds = array<i64: 1, 1, 32>}, {pipeline_mode = #tpu.pipeline_mode<synchronous>, transform_indices = @transform_10, window_bounds = array<i64: 1, 32>}, {pipeline_mode = #tpu.pipeline_mode<synchronous>, transform_indices = @transform_11, window_bounds = array<i64: 32, 128>}, {pipeline_mode = #tpu.pipeline_mode<synchronous>, transform_indices = @transform_12, window_bounds = array<i64: 1, 128>}, {transform_indices = @transform_13, window_bounds = array<i64: 8, 128>}]} {
    %c0_i32 = arith.constant 0 : i32
    %0 = arith.cmpi eq, %arg2, %c0_i32 : i32
    %1 = arith.extui %0 : i1 to i32
    %c0_i32_0 = arith.constant 0 : i32
    %2 = arith.cmpi ne, %1, %c0_i32_0 : i32
    scf.if %2 {
      %c0_i32_33 = arith.constant 0 : i32
      %62 = arith.cmpi eq, %arg1, %c0_i32_33 : i32
      %63 = arith.extui %62 : i1 to i32
      %c0_i32_34 = arith.constant 0 : i32
      %64 = arith.cmpi ne, %63, %c0_i32_34 : i32
      scf.if %64 {
        %c0_72 = arith.constant 0 : index
        %c0_73 = arith.constant 0 : index
        %210 = vector.load %arg3[%c0_72, %c0_73] : memref<8x32xf32, #tpu.memory_space<vmem>>, vector<8x32xf32>
        %c0_74 = arith.constant 0 : index
        %c0_75 = arith.constant 0 : index
        %211 = vector.load %arg17[%c0_74, %c0_75] : memref<8x32xf32, #tpu.memory_space<vmem>>, vector<8x32xf32>
        tpu.vector_store %arg17[%c0_74, %c0_75], %210 {strides = array<i32>} : memref<8x32xf32, #tpu.memory_space<vmem>>, vector<8x32xf32>,
      } else {
      }
      %c0_35 = arith.constant 0 : index
      %c0_36 = arith.constant 0 : index
      %65 = vector.load %arg17[%c0_35, %c0_36] : memref<8x32xf32, #tpu.memory_space<vmem>>, vector<8x32xf32>
      %c0_37 = arith.constant 0 : index
      %c0_38 = arith.constant 0 : index
      %c0_39 = arith.constant 0 : index
      %66 = vector.load %arg4[%c0_37, %c0_38, %c0_39] : memref<1x4x32xf32, #tpu.memory_space<vmem>>, vector<1x4x32xf32>
      %67 = vector.shape_cast %66 : vector<1x4x32xf32> to vector<4x32xf32>
      %68 = vector.extract_strided_slice %67 {offsets = [0, 0], sizes = [1, 32], strides = [1, 1]} : vector<4x32xf32> to vector<1x32xf32>
      %69 = vector.shape_cast %68 : vector<1x32xf32> to vector<32xf32>
      %70 = vector.extract_strided_slice %67 {offsets = [1, 0], sizes = [1, 32], strides = [1, 1]} : vector<4x32xf32> to vector<1x32xf32>
      %71 = vector.shape_cast %70 : vector<1x32xf32> to vector<32xf32>
      %72 = vector.extract_strided_slice %67 {offsets = [2, 0], sizes = [1, 32], strides = [1, 1]} : vector<4x32xf32> to vector<1x32xf32>
      %73 = vector.shape_cast %72 : vector<1x32xf32> to vector<32xf32>
      %74 = arith.mulf %65, %65 : vector<8x32xf32>
      %cst_40 = arith.constant dense<0.000000e+00> : vector<8xf32>
      %75 = vector.multi_reduction <add>, %74, %cst_40 [1] : vector<8x32xf32> to vector<8xf32>
      %76 = vector.shape_cast %75 : vector<8xf32> to vector<8x1xf32>
      %cst_41 = arith.constant 3.200000e+01 : f32
      %77 = vector.broadcast %cst_41 : f32 to vector<8x1xf32>
      %78 = arith.divf %76, %77 : vector<8x1xf32>
      %cst_42 = arith.constant 9.99999997E-7 : f32
      %79 = vector.broadcast %cst_42 : f32 to vector<8x1xf32>
      %80 = arith.addf %78, %79 : vector<8x1xf32>
      %81 = math.rsqrt %80 : vector<8x1xf32>
      %82 = vector.broadcast %81 : vector<8x1xf32> to vector<8x32xf32>
      %83 = arith.mulf %65, %82 : vector<8x32xf32>
      %84 = vector.shape_cast %69 : vector<32xf32> to vector<1x32xf32>
      %85 = vector.broadcast %84 : vector<1x32xf32> to vector<8x32xf32>
      %86 = arith.mulf %83, %85 : vector<8x32xf32>
      %87 = arith.truncf %86 : vector<8x32xf32> to vector<8x32xbf16>
      %c0_43 = arith.constant 0 : index
      %c0_44 = arith.constant 0 : index
      %c0_45 = arith.constant 0 : index
      %88 = vector.load %arg5[%c0_43, %c0_44, %c0_45] : memref<1x32x96xbf16, #tpu.memory_space<vmem>>, vector<1x32x96xbf16>
      %89 = vector.shape_cast %88 : vector<1x32x96xbf16> to vector<32x96xbf16>
      %cst_46 = arith.constant dense<0.000000e+00> : vector<8x96xf32>
      %90 = tpu.matmul %87, %89, %cst_46 {dimension_numbers = #tpu.dot_dimension_numbers<[1], [0], [0], [1], [0, 0, 1, 1], [], []>} : vector<8x32xbf16>, vector<32x96xbf16>, vector<8x96xf32> -> vector<8x96xf32>
      %c0_47 = arith.constant 0 : index
      %c0_48 = arith.constant 0 : index
      %c0_49 = arith.constant 0 : index
      %91 = vector.load %arg6[%c0_47, %c0_48, %c0_49] : memref<1x1x96xf32, #tpu.memory_space<vmem>>, vector<1x1x96xf32>
      %92 = vector.shape_cast %91 : vector<1x1x96xf32> to vector<1x96xf32>
      %93 = vector.broadcast %92 : vector<1x96xf32> to vector<8x96xf32>
      %94 = arith.addf %90, %93 : vector<8x96xf32>
      %95 = vector.extract_strided_slice %94 {offsets = [0, 0], sizes = [8, 32], strides = [1, 1]} : vector<8x96xf32> to vector<8x32xf32>
      %96 = vector.shape_cast %95 : vector<8x32xf32> to vector<8x4x8xf32>
      %97 = vector.extract_strided_slice %94 {offsets = [0, 32], sizes = [8, 32], strides = [1, 1]} : vector<8x96xf32> to vector<8x32xf32>
      %98 = vector.shape_cast %97 : vector<8x32xf32> to vector<8x4x8xf32>
      %99 = vector.extract_strided_slice %94 {offsets = [0, 64], sizes = [8, 32], strides = [1, 1]} : vector<8x96xf32> to vector<8x32xf32>
      %100 = vector.shape_cast %99 : vector<8x32xf32> to vector<8x4x8xf32>
      %101 = vector.extract_strided_slice %96 {offsets = [0, 0, 0], sizes = [8, 1, 8], strides = [1, 1, 1]} : vector<8x4x8xf32> to vector<8x1x8xf32>
      %102 = vector.shape_cast %101 : vector<8x1x8xf32> to vector<8x8xf32>
      %103 = vector.extract_strided_slice %96 {offsets = [0, 1, 0], sizes = [8, 1, 8], strides = [1, 1, 1]} : vector<8x4x8xf32> to vector<8x1x8xf32>
      %104 = vector.shape_cast %103 : vector<8x1x8xf32> to vector<8x8xf32>
      %105 = vector.extract_strided_slice %96 {offsets = [0, 2, 0], sizes = [8, 1, 8], strides = [1, 1, 1]} : vector<8x4x8xf32> to vector<8x1x8xf32>
      %106 = vector.shape_cast %105 : vector<8x1x8xf32> to vector<8x8xf32>
      %107 = vector.extract_strided_slice %96 {offsets = [0, 3, 0], sizes = [8, 1, 8], strides = [1, 1, 1]} : vector<8x4x8xf32> to vector<8x1x8xf32>
      %108 = vector.shape_cast %107 : vector<8x1x8xf32> to vector<8x8xf32>
      %109 = vector.shape_cast %102 : vector<8x8xf32> to vector<1x8x8xf32>
      %110 = vector.shape_cast %104 : vector<8x8xf32> to vector<1x8x8xf32>
      %111 = vector.shape_cast %106 : vector<8x8xf32> to vector<1x8x8xf32>
      %112 = vector.shape_cast %108 : vector<8x8xf32> to vector<1x8x8xf32>
      %113 = tpu.concatenate %109, %110, %111, %112 in 0 : vector<1x8x8xf32>, vector<1x8x8xf32>, vector<1x8x8xf32>, vector<1x8x8xf32> -> vector<4x8x8xf32>
      %114 = vector.extract_strided_slice %98 {offsets = [0, 0, 0], sizes = [8, 1, 8], strides = [1, 1, 1]} : vector<8x4x8xf32> to vector<8x1x8xf32>
      %115 = vector.shape_cast %114 : vector<8x1x8xf32> to vector<8x8xf32>
      %116 = vector.extract_strided_slice %98 {offsets = [0, 1, 0], sizes = [8, 1, 8], strides = [1, 1, 1]} : vector<8x4x8xf32> to vector<8x1x8xf32>
      %117 = vector.shape_cast %116 : vector<8x1x8xf32> to vector<8x8xf32>
      %118 = vector.extract_strided_slice %98 {offsets = [0, 2, 0], sizes = [8, 1, 8], strides = [1, 1, 1]} : vector<8x4x8xf32> to vector<8x1x8xf32>
      %119 = vector.shape_cast %118 : vector<8x1x8xf32> to vector<8x8xf32>
      %120 = vector.extract_strided_slice %98 {offsets = [0, 3, 0], sizes = [8, 1, 8], strides = [1, 1, 1]} : vector<8x4x8xf32> to vector<8x1x8xf32>
      %121 = vector.shape_cast %120 : vector<8x1x8xf32> to vector<8x8xf32>
      %122 = vector.shape_cast %115 : vector<8x8xf32> to vector<1x8x8xf32>
      %123 = vector.shape_cast %117 : vector<8x8xf32> to vector<1x8x8xf32>
      %124 = vector.shape_cast %119 : vector<8x8xf32> to vector<1x8x8xf32>
      %125 = vector.shape_cast %121 : vector<8x8xf32> to vector<1x8x8xf32>
      %126 = tpu.concatenate %122, %123, %124, %125 in 0 : vector<1x8x8xf32>, vector<1x8x8xf32>, vector<1x8x8xf32>, vector<1x8x8xf32> -> vector<4x8x8xf32>
      %127 = vector.extract_strided_slice %100 {offsets = [0, 0, 0], sizes = [8, 1, 8], strides = [1, 1, 1]} : vector<8x4x8xf32> to vector<8x1x8xf32>
      %128 = vector.shape_cast %127 : vector<8x1x8xf32> to vector<8x8xf32>
      %129 = vector.extract_strided_slice %100 {offsets = [0, 1, 0], sizes = [8, 1, 8], strides = [1, 1, 1]} : vector<8x4x8xf32> to vector<8x1x8xf32>
      %130 = vector.shape_cast %129 : vector<8x1x8xf32> to vector<8x8xf32>
      %131 = vector.extract_strided_slice %100 {offsets = [0, 2, 0], sizes = [8, 1, 8], strides = [1, 1, 1]} : vector<8x4x8xf32> to vector<8x1x8xf32>
      %132 = vector.shape_cast %131 : vector<8x1x8xf32> to vector<8x8xf32>
      %133 = vector.extract_strided_slice %100 {offsets = [0, 3, 0], sizes = [8, 1, 8], strides = [1, 1, 1]} : vector<8x4x8xf32> to vector<8x1x8xf32>
      %134 = vector.shape_cast %133 : vector<8x1x8xf32> to vector<8x8xf32>
      %135 = vector.shape_cast %128 : vector<8x8xf32> to vector<1x8x8xf32>
      %136 = vector.shape_cast %130 : vector<8x8xf32> to vector<1x8x8xf32>
      %137 = vector.shape_cast %132 : vector<8x8xf32> to vector<1x8x8xf32>
      %138 = vector.shape_cast %134 : vector<8x8xf32> to vector<1x8x8xf32>
      %139 = tpu.concatenate %135, %136, %137, %138 in 0 : vector<1x8x8xf32>, vector<1x8x8xf32>, vector<1x8x8xf32>, vector<1x8x8xf32> -> vector<4x8x8xf32>
      %140 = arith.truncf %113 : vector<4x8x8xf32> to vector<4x8x8xbf16>
      %141 = arith.truncf %126 : vector<4x8x8xf32> to vector<4x8x8xbf16>
      "tpu.trace_start"() <{level = 10 : i32, message = "hqd,hkd->hqk"}> : () -> ()
      %cst_50 = arith.constant dense<0.000000e+00> : vector<4x8x8xf32>
      %142 = tpu.matmul %140, %141, %cst_50 {dimension_numbers = #tpu.dot_dimension_numbers<[2], [2], [1], [1], [0, 0, 0, 1, 1, 1], [0], [0]>} : vector<4x8x8xbf16>, vector<4x8x8xbf16>, vector<4x8x8xf32> -> vector<4x8x8xf32>
      "tpu.trace_stop"() : () -> ()
      %cst_51 = arith.constant dense<0xFF800000> : vector<4x8xf32>
      %143 = vector.multi_reduction <maximumf>, %142, %cst_51 [2] : vector<4x8x8xf32> to vector<4x8xf32>
      %144 = vector.shape_cast %143 : vector<4x8xf32> to vector<4x8x1xf32>
      %145 = vector.broadcast %144 : vector<4x8x1xf32> to vector<4x8x8xf32>
      %146 = arith.subf %142, %145 : vector<4x8x8xf32>
      %147 = math.exp %146 : vector<4x8x8xf32>
      %cst_52 = arith.constant dense<0.000000e+00> : vector<4x8xf32>
      %148 = vector.multi_reduction <add>, %147, %cst_52 [2] : vector<4x8x8xf32> to vector<4x8xf32>
      %149 = vector.shape_cast %148 : vector<4x8xf32> to vector<4x8x1xf32>
      %150 = tpu.reciprocal %149 {approx = true} : vector<4x8x1xf32> -> vector<4x8x1xf32>
      %151 = vector.broadcast %150 : vector<4x8x1xf32> to vector<4x8x8xf32>
      %152 = arith.mulf %147, %151 : vector<4x8x8xf32>
      %153 = arith.truncf %152 : vector<4x8x8xf32> to vector<4x8x8xbf16>
      %154 = arith.truncf %139 : vector<4x8x8xf32> to vector<4x8x8xbf16>
      "tpu.trace_start"() <{level = 10 : i32, message = "hqk,hkd->hqd"}> : () -> ()
      %cst_53 = arith.constant dense<0.000000e+00> : vector<4x8x8xf32>
      %155 = tpu.matmul %153, %154, %cst_53 {dimension_numbers = #tpu.dot_dimension_numbers<[2], [1], [1], [2], [0, 0, 0, 1, 1, 2], [0], [0]>} : vector<4x8x8xbf16>, vector<4x8x8xbf16>, vector<4x8x8xf32> -> vector<4x8x8xf32>
      "tpu.trace_stop"() : () -> ()
      %156 = vector.extract_strided_slice %155 {offsets = [0, 0, 0], sizes = [1, 8, 8], strides = [1, 1, 1]} : vector<4x8x8xf32> to vector<1x8x8xf32>
      %157 = vector.shape_cast %156 : vector<1x8x8xf32> to vector<8x8xf32>
      %158 = vector.extract_strided_slice %155 {offsets = [1, 0, 0], sizes = [1, 8, 8], strides = [1, 1, 1]} : vector<4x8x8xf32> to vector<1x8x8xf32>
      %159 = vector.shape_cast %158 : vector<1x8x8xf32> to vector<8x8xf32>
      %160 = vector.extract_strided_slice %155 {offsets = [2, 0, 0], sizes = [1, 8, 8], strides = [1, 1, 1]} : vector<4x8x8xf32> to vector<1x8x8xf32>
      %161 = vector.shape_cast %160 : vector<1x8x8xf32> to vector<8x8xf32>
      %162 = vector.extract_strided_slice %155 {offsets = [3, 0, 0], sizes = [1, 8, 8], strides = [1, 1, 1]} : vector<4x8x8xf32> to vector<1x8x8xf32>
      %163 = vector.shape_cast %162 : vector<1x8x8xf32> to vector<8x8xf32>
      %164 = vector.shape_cast %157 : vector<8x8xf32> to vector<8x1x8xf32>
      %165 = vector.shape_cast %159 : vector<8x8xf32> to vector<8x1x8xf32>
      %166 = vector.shape_cast %161 : vector<8x8xf32> to vector<8x1x8xf32>
      %167 = vector.shape_cast %163 : vector<8x8xf32> to vector<8x1x8xf32>
      %168 = tpu.concatenate %164, %165, %166, %167 in 1 : vector<8x1x8xf32>, vector<8x1x8xf32>, vector<8x1x8xf32>, vector<8x1x8xf32> -> vector<8x4x8xf32>
      %169 = vector.shape_cast %168 : vector<8x4x8xf32> to vector<8x32xf32>
      %170 = arith.truncf %169 : vector<8x32xf32> to vector<8x32xbf16>
      %c0_54 = arith.constant 0 : index
      %c0_55 = arith.constant 0 : index
      %c0_56 = arith.constant 0 : index
      %171 = vector.load %arg7[%c0_54, %c0_55, %c0_56] : memref<1x32x32xbf16, #tpu.memory_space<vmem>>, vector<1x32x32xbf16>
      %172 = vector.shape_cast %171 : vector<1x32x32xbf16> to vector<32x32xbf16>
      %cst_57 = arith.constant dense<0.000000e+00> : vector<8x32xf32>
      %173 = tpu.matmul %170, %172, %cst_57 {dimension_numbers = #tpu.dot_dimension_numbers<[1], [0], [0], [1], [0, 0, 1, 1], [], []>} : vector<8x32xbf16>, vector<32x32xbf16>, vector<8x32xf32> -> vector<8x32xf32>
      %c0_58 = arith.constant 0 : index
      %c0_59 = arith.constant 0 : index
      %c0_60 = arith.constant 0 : index
      %174 = vector.load %arg8[%c0_58, %c0_59, %c0_60] : memref<1x1x32xf32, #tpu.memory_space<vmem>>, vector<1x1x32xf32>
      %175 = vector.shape_cast %174 : vector<1x1x32xf32> to vector<1x32xf32>
      %176 = vector.broadcast %175 : vector<1x32xf32> to vector<8x32xf32>
      %177 = arith.addf %173, %176 : vector<8x32xf32>
      %178 = arith.addf %86, %177 : vector<8x32xf32>
      %179 = arith.mulf %178, %178 : vector<8x32xf32>
      %cst_61 = arith.constant dense<0.000000e+00> : vector<8xf32>
      %180 = vector.multi_reduction <add>, %179, %cst_61 [1] : vector<8x32xf32> to vector<8xf32>
      %181 = vector.shape_cast %180 : vector<8xf32> to vector<8x1xf32>
      %cst_62 = arith.constant 3.200000e+01 : f32
      %182 = vector.broadcast %cst_62 : f32 to vector<8x1xf32>
      %183 = arith.divf %181, %182 : vector<8x1xf32>
      %184 = arith.mulf %71, %71 : vector<32xf32>
      %185 = vector.shape_cast %184 : vector<32xf32> to vector<1x32xf32>
      %186 = vector.broadcast %185 : vector<1x32xf32> to vector<8x32xf32>
      %187 = arith.mulf %179, %186 : vector<8x32xf32>
      %cst_63 = arith.constant dense<0.000000e+00> : vector<8xf32>
      %188 = vector.multi_reduction <add>, %187, %cst_63 [1] : vector<8x32xf32> to vector<8xf32>
      %189 = vector.shape_cast %188 : vector<8xf32> to vector<8x1xf32>
      %cst_64 = arith.constant 3.200000e+01 : f32
      %190 = vector.broadcast %cst_64 : f32 to vector<8x1xf32>
      %191 = arith.divf %189, %190 : vector<8x1xf32>
      %cst_65 = arith.constant 9.99999997E-7 : f32
      %192 = vector.broadcast %cst_65 : f32 to vector<8x1xf32>
      %193 = arith.addf %183, %192 : vector<8x1xf32>
      %194 = math.rsqrt %193 : vector<8x1xf32>
      %195 = arith.mulf %194, %194 : vector<8x1xf32>
      %196 = arith.mulf %195, %191 : vector<8x1xf32>
      %cst_66 = arith.constant 9.99999997E-7 : f32
      %197 = vector.broadcast %cst_66 : f32 to vector<8x1xf32>
      %198 = arith.addf %196, %197 : vector<8x1xf32>
      %199 = math.rsqrt %198 : vector<8x1xf32>
      %200 = arith.mulf %194, %199 : vector<8x1xf32>
      %201 = vector.broadcast %200 : vector<8x1xf32> to vector<8x32xf32>
      %202 = arith.mulf %178, %201 : vector<8x32xf32>
      %203 = arith.mulf %71, %73 : vector<32xf32>
      %204 = vector.shape_cast %203 : vector<32xf32> to vector<1x32xf32>
      %205 = vector.broadcast %204 : vector<1x32xf32> to vector<8x32xf32>
      %206 = arith.mulf %202, %205 : vector<8x32xf32>
      %c0_67 = arith.constant 0 : index
      %c0_68 = arith.constant 0 : index
      %207 = vector.load %arg18[%c0_67, %c0_68] : memref<8x32xf32, #tpu.memory_space<vmem>>, vector<8x32xf32>
      tpu.vector_store %arg18[%c0_67, %c0_68], %206 {strides = array<i32>} : memref<8x32xf32, #tpu.memory_space<vmem>>, vector<8x32xf32>,
      %cst_69 = arith.constant 0.000000e+00 : f32
      %208 = vector.broadcast %cst_69 : f32 to vector<8x32xf32>
      %c0_70 = arith.constant 0 : index
      %c0_71 = arith.constant 0 : index
      %209 = vector.load %arg19[%c0_70, %c0_71] : memref<8x32xf32, #tpu.memory_space<vmem>>, vector<8x32xf32>
      tpu.vector_store %arg19[%c0_70, %c0_71], %208 {strides = array<i32>} : memref<8x32xf32, #tpu.memory_space<vmem>>, vector<8x32xf32>,
    } else {
    }
    %c0 = arith.constant 0 : index
    %c0_1 = arith.constant 0 : index
    %3 = vector.load %arg18[%c0, %c0_1] : memref<8x32xf32, #tpu.memory_space<vmem>>, vector<8x32xf32>
    %4 = arith.truncf %3 : vector<8x32xf32> to vector<8x32xbf16>
    %c0_2 = arith.constant 0 : index
    %c0_3 = arith.constant 0 : index
    %c0_4 = arith.constant 0 : index
    %5 = vector.load %arg9[%c0_2, %c0_3, %c0_4] : memref<1x32x128xbf16, #tpu.memory_space<vmem>>, vector<1x32x128xbf16>
    %6 = vector.shape_cast %5 : vector<1x32x128xbf16> to vector<32x128xbf16>
    %cst = arith.constant dense<0.000000e+00> : vector<8x128xf32>
    %7 = tpu.matmul %4, %6, %cst {dimension_numbers = #tpu.dot_dimension_numbers<[1], [0], [0], [1], [0, 0, 1, 1], [], []>} : vector<8x32xbf16>, vector<32x128xbf16>, vector<8x128xf32> -> vector<8x128xf32>
    %c0_5 = arith.constant 0 : index
    %c0_6 = arith.constant 0 : index
    %c0_7 = arith.constant 0 : index
    %8 = vector.load %arg10[%c0_5, %c0_6, %c0_7] : memref<1x1x128xf32, #tpu.memory_space<vmem>>, vector<1x1x128xf32>
    %9 = vector.shape_cast %8 : vector<1x1x128xf32> to vector<1x128xf32>
    %10 = vector.broadcast %9 : vector<1x128xf32> to vector<8x128xf32>
    %11 = arith.addf %7, %10 : vector<8x128xf32>
    %cst_8 = arith.constant 0.707106769 : f32
    %12 = vector.broadcast %cst_8 : f32 to vector<8x128xf32>
    %13 = arith.mulf %11, %12 : vector<8x128xf32>
    %14 = math.absf %13 : vector<8x128xf32>
    %cst_9 = arith.constant 0.327591091 : f32
    %15 = vector.broadcast %cst_9 : f32 to vector<8x128xf32>
    %16 = arith.mulf %15, %14 : vector<8x128xf32>
    %cst_10 = arith.constant 1.000000e+00 : f32
    %17 = vector.broadcast %cst_10 : f32 to vector<8x128xf32>
    %18 = arith.addf %17, %16 : vector<8x128xf32>
    %cst_11 = arith.constant 1.000000e+00 : f32
    %19 = vector.broadcast %cst_11 : f32 to vector<8x128xf32>
    %20 = arith.divf %19, %18 : vector<8x128xf32>
    %cst_12 = arith.constant 1.06140542 : f32
    %21 = vector.broadcast %cst_12 : f32 to vector<8x128xf32>
    %22 = arith.mulf %20, %21 : vector<8x128xf32>
    %cst_13 = arith.constant -1.45315206 : f32
    %23 = vector.broadcast %cst_13 : f32 to vector<8x128xf32>
    %24 = arith.addf %23, %22 : vector<8x128xf32>
    %25 = arith.mulf %20, %24 : vector<8x128xf32>
    %cst_14 = arith.constant 1.42141378 : f32
    %26 = vector.broadcast %cst_14 : f32 to vector<8x128xf32>
    %27 = arith.addf %26, %25 : vector<8x128xf32>
    %28 = arith.mulf %20, %27 : vector<8x128xf32>
    %cst_15 = arith.constant -0.284496725 : f32
    %29 = vector.broadcast %cst_15 : f32 to vector<8x128xf32>
    %30 = arith.addf %29, %28 : vector<8x128xf32>
    %31 = arith.mulf %20, %30 : vector<8x128xf32>
    %cst_16 = arith.constant 0.254829586 : f32
    %32 = vector.broadcast %cst_16 : f32 to vector<8x128xf32>
    %33 = arith.addf %32, %31 : vector<8x128xf32>
    %34 = arith.mulf %20, %33 : vector<8x128xf32>
    %cst_17 = arith.constant 0.000000e+00 : f32
    %35 = vector.broadcast %cst_17 : f32 to vector<8x128xf32>
    %36 = arith.subf %35, %14 : vector<8x128xf32>
    %37 = arith.mulf %36, %14 : vector<8x128xf32>
    %38 = math.exp %37 : vector<8x128xf32>
    %39 = arith.mulf %34, %38 : vector<8x128xf32>
    %cst_18 = arith.constant 1.000000e+00 : f32
    %40 = vector.broadcast %cst_18 : f32 to vector<8x128xf32>
    %41 = arith.subf %40, %39 : vector<8x128xf32>
    %cst_19 = arith.constant 0.000000e+00 : f32
    %42 = vector.broadcast %cst_19 : f32 to vector<8x128xf32>
    %43 = arith.cmpf olt, %13, %42 : vector<8x128xf32>
    %cst_20 = arith.constant 0.000000e+00 : f32
    %44 = vector.broadcast %cst_20 : f32 to vector<8x128xf32>
    %45 = arith.subf %44, %41 : vector<8x128xf32>
    %46 = arith.select %43, %45, %41 : vector<8x128xi1>, vector<8x128xf32>
    %cst_21 = arith.constant 5.000000e-01 : f32
    %47 = vector.broadcast %cst_21 : f32 to vector<8x128xf32>
    %48 = arith.mulf %47, %11 : vector<8x128xf32>
    %cst_22 = arith.constant 1.000000e+00 : f32
    %49 = vector.broadcast %cst_22 : f32 to vector<8x128xf32>
    %50 = arith.addf %49, %46 : vector<8x128xf32>
    %51 = arith.mulf %48, %50 : vector<8x128xf32>
    %52 = arith.truncf %51 : vector<8x128xf32> to vector<8x128xbf16>
    %c0_23 = arith.constant 0 : index
    %c0_24 = arith.constant 0 : index
    %53 = vector.load %arg19[%c0_23, %c0_24] : memref<8x32xf32, #tpu.memory_space<vmem>>, vector<8x32xf32>
    %c0_25 = arith.constant 0 : index
    %c0_26 = arith.constant 0 : index
    %c0_27 = arith.constant 0 : index
    %54 = vector.load %arg11[%c0_25, %c0_26, %c0_27] : memref<1x128x32xbf16, #tpu.memory_space<vmem>>, vector<1x128x32xbf16>
    %55 = vector.shape_cast %54 : vector<1x128x32xbf16> to vector<128x32xbf16>
    %cst_28 = arith.constant dense<0.000000e+00> : vector<8x32xf32>
    %56 = tpu.matmul %52, %55, %cst_28 {dimension_numbers = #tpu.dot_dimension_numbers<[1], [0], [0], [1], [0, 0, 1, 1], [], []>} : vector<8x128xbf16>, vector<128x32xbf16>, vector<8x32xf32> -> vector<8x32xf32>
    %57 = arith.addf %53, %56 : vector<8x32xf32>
    %c0_29 = arith.constant 0 : index
    %c0_30 = arith.constant 0 : index
    %58 = vector.load %arg19[%c0_29, %c0_30] : memref<8x32xf32, #tpu.memory_space<vmem>>, vector<8x32xf32>
    tpu.vector_store %arg19[%c0_29, %c0_30], %57 {strides = array<i32>} : memref<8x32xf32, #tpu.memory_space<vmem>>, vector<8x32xf32>,
    %c0_i32_31 = arith.constant 0 : i32
    %59 = arith.cmpi eq, %arg2, %c0_i32_31 : i32
    %60 = arith.extui %59 : i1 to i32
    %c0_i32_32 = arith.constant 0 : i32
    %61 = arith.cmpi ne, %60, %c0_i32_32 : i32
    scf.if %61 {
      %c0_33 = arith.constant 0 : index
      %c0_34 = arith.constant 0 : index
      %c0_35 = arith.constant 0 : index
      %62 = vector.load %arg4[%c0_33, %c0_34, %c0_35] : memref<1x4x32xf32, #tpu.memory_space<vmem>>, vector<1x4x32xf32>
      %63 = vector.shape_cast %62 : vector<1x4x32xf32> to vector<4x32xf32>
      %64 = vector.extract_strided_slice %63 {offsets = [3, 0], sizes = [1, 32], strides = [1, 1]} : vector<4x32xf32> to vector<1x32xf32>
      %65 = vector.shape_cast %64 : vector<1x32xf32> to vector<32xf32>
      %c0_36 = arith.constant 0 : index
      %c0_37 = arith.constant 0 : index
      %66 = vector.load %arg18[%c0_36, %c0_37] : memref<8x32xf32, #tpu.memory_space<vmem>>, vector<8x32xf32>
      %c0_38 = arith.constant 0 : index
      %c0_39 = arith.constant 0 : index
      %67 = vector.load %arg19[%c0_38, %c0_39] : memref<8x32xf32, #tpu.memory_space<vmem>>, vector<8x32xf32>
      %68 = arith.addf %66, %67 : vector<8x32xf32>
      %c0_40 = arith.constant 0 : index
      %c0_41 = arith.constant 0 : index
      %c0_42 = arith.constant 0 : index
      %69 = vector.load %arg12[%c0_40, %c0_41, %c0_42] : memref<1x1x32xf32, #tpu.memory_space<vmem>>, vector<1x1x32xf32>
      %70 = vector.shape_cast %69 : vector<1x1x32xf32> to vector<1x32xf32>
      %71 = vector.broadcast %70 : vector<1x32xf32> to vector<8x32xf32>
      %72 = arith.addf %68, %71 : vector<8x32xf32>
      %73 = arith.mulf %72, %72 : vector<8x32xf32>
      %cst_43 = arith.constant dense<0.000000e+00> : vector<8xf32>
      %74 = vector.multi_reduction <add>, %73, %cst_43 [1] : vector<8x32xf32> to vector<8xf32>
      %75 = vector.shape_cast %74 : vector<8xf32> to vector<8x1xf32>
      %cst_44 = arith.constant 3.200000e+01 : f32
      %76 = vector.broadcast %cst_44 : f32 to vector<8x1xf32>
      %77 = arith.divf %75, %76 : vector<8x1xf32>
      %cst_45 = arith.constant 9.99999997E-7 : f32
      %78 = vector.broadcast %cst_45 : f32 to vector<8x1xf32>
      %79 = arith.addf %77, %78 : vector<8x1xf32>
      %80 = math.rsqrt %79 : vector<8x1xf32>
      %81 = vector.broadcast %80 : vector<8x1xf32> to vector<8x32xf32>
      %82 = arith.mulf %72, %81 : vector<8x32xf32>
      %83 = vector.shape_cast %65 : vector<32xf32> to vector<1x32xf32>
      %84 = vector.broadcast %83 : vector<1x32xf32> to vector<8x32xf32>
      %85 = arith.mulf %82, %84 : vector<8x32xf32>
      %c0_46 = arith.constant 0 : index
      %c0_47 = arith.constant 0 : index
      %86 = vector.load %arg17[%c0_46, %c0_47] : memref<8x32xf32, #tpu.memory_space<vmem>>, vector<8x32xf32>
      tpu.vector_store %arg17[%c0_46, %c0_47], %85 {strides = array<i32>} : memref<8x32xf32, #tpu.memory_space<vmem>>, vector<8x32xf32>,
      %c1_i32 = arith.constant 1 : i32
      %87 = arith.cmpi eq, %arg1, %c1_i32 : i32
      %88 = arith.extui %87 : i1 to i32
      %c0_i32_48 = arith.constant 0 : i32
      %89 = arith.cmpi ne, %88, %c0_i32_48 : i32
      scf.if %89 {
        %c0_49 = arith.constant 0 : index
        %c0_50 = arith.constant 0 : index
        %90 = vector.load %arg13[%c0_49, %c0_50] : memref<1x32xf32, #tpu.memory_space<vmem>>, vector<1x32xf32>
        %91 = vector.shape_cast %90 : vector<1x32xf32> to vector<32xf32>
        %92 = arith.mulf %85, %85 : vector<8x32xf32>
        %cst_51 = arith.constant dense<0.000000e+00> : vector<8xf32>
        %93 = vector.multi_reduction <add>, %92, %cst_51 [1] : vector<8x32xf32> to vector<8xf32>
        %94 = vector.shape_cast %93 : vector<8xf32> to vector<8x1xf32>
        %cst_52 = arith.constant 3.200000e+01 : f32
        %95 = vector.broadcast %cst_52 : f32 to vector<8x1xf32>
        %96 = arith.divf %94, %95 : vector<8x1xf32>
        %cst_53 = arith.constant 9.99999997E-7 : f32
        %97 = vector.broadcast %cst_53 : f32 to vector<8x1xf32>
        %98 = arith.addf %96, %97 : vector<8x1xf32>
        %99 = math.rsqrt %98 : vector<8x1xf32>
        %100 = vector.broadcast %99 : vector<8x1xf32> to vector<8x32xf32>
        %101 = arith.mulf %85, %100 : vector<8x32xf32>
        %102 = vector.shape_cast %91 : vector<32xf32> to vector<1x32xf32>
        %103 = vector.broadcast %102 : vector<1x32xf32> to vector<8x32xf32>
        %104 = arith.mulf %101, %103 : vector<8x32xf32>
        %105 = arith.truncf %104 : vector<8x32xf32> to vector<8x32xbf16>
        %c0_54 = arith.constant 0 : index
        %c0_55 = arith.constant 0 : index
        %106 = vector.load %arg14[%c0_54, %c0_55] : memref<32x128xbf16, #tpu.memory_space<vmem>>, vector<32x128xbf16>
        %cst_56 = arith.constant dense<0.000000e+00> : vector<8x128xf32>
        %107 = tpu.matmul %105, %106, %cst_56 {dimension_numbers = #tpu.dot_dimension_numbers<[1], [0], [0], [1], [0, 0, 1, 1], [], []>} : vector<8x32xbf16>, vector<32x128xbf16>, vector<8x128xf32> -> vector<8x128xf32>
        %c0_57 = arith.constant 0 : index
        %c0_58 = arith.constant 0 : index
        %108 = vector.load %arg15[%c0_57, %c0_58] : memref<1x128xf32, #tpu.memory_space<vmem>>, vector<1x128xf32>
        %109 = vector.broadcast %108 : vector<1x128xf32> to vector<8x128xf32>
        %110 = arith.addf %107, %109 : vector<8x128xf32>
        %c0_59 = arith.constant 0 : index
        %c0_60 = arith.constant 0 : index
        %111 = vector.load %arg16[%c0_59, %c0_60] : memref<8x128xf32, #tpu.memory_space<vmem>>, vector<8x128xf32>
        tpu.vector_store %arg16[%c0_59, %c0_60], %110 {strides = array<i32>} : memref<8x128xf32, #tpu.memory_space<vmem>>, vector<8x128xf32>,
      } else {
      }
    } else {
    }
    return
  }
  func.func @transform_0(%arg0: i32, %arg1: i32, %arg2: i32) -> (i32, i32) {
    %c0_i32 = arith.constant 0 : i32
    %c0_i32_0 = arith.constant 0 : i32
    return %arg0, %c0_i32 : i32, i32
  }
  func.func @transform_1(%arg0: i32, %arg1: i32, %arg2: i32) -> (i32, i32, i32) {
    %c0_i32 = arith.constant 0 : i32
    %c0_i32_0 = arith.constant 0 : i32
    %c0_i32_1 = arith.constant 0 : i32
    return %arg1, %c0_i32, %c0_i32_0 : i32, i32, i32
  }
  func.func @transform_2(%arg0: i32, %arg1: i32, %arg2: i32) -> (i32, i32, i32) {
    %c0_i32 = arith.constant 0 : i32
    %c0_i32_0 = arith.constant 0 : i32
    %c0_i32_1 = arith.constant 0 : i32
    return %arg1, %c0_i32, %c0_i32_0 : i32, i32, i32
  }
  func.func @transform_3(%arg0: i32, %arg1: i32, %arg2: i32) -> (i32, i32, i32) {
    %c0_i32 = arith.constant 0 : i32
    %c0_i32_0 = arith.constant 0 : i32
    %c0_i32_1 = arith.constant 0 : i32
    return %arg1, %c0_i32, %c0_i32_0 : i32, i32, i32
  }
  func.func @transform_4(%arg0: i32, %arg1: i32, %arg2: i32) -> (i32, i32, i32) {
    %c0_i32 = arith.constant 0 : i32
    %c0_i32_0 = arith.constant 0 : i32
    %c0_i32_1 = arith.constant 0 : i32
    return %arg1, %c0_i32, %c0_i32_0 : i32, i32, i32
  }
  func.func @transform_5(%arg0: i32, %arg1: i32, %arg2: i32) -> (i32, i32, i32) {
    %c0_i32 = arith.constant 0 : i32
    %c0_i32_0 = arith.constant 0 : i32
    %c0_i32_1 = arith.constant 0 : i32
    return %arg1, %c0_i32, %c0_i32_0 : i32, i32, i32
  }
  func.func @transform_6(%arg0: i32, %arg1: i32, %arg2: i32) -> (i32, i32, i32) {
    %c0_i32 = arith.constant 0 : i32
    %c0_i32_0 = arith.constant 0 : i32
    return %arg1, %c0_i32, %arg2 : i32, i32, i32
  }
  func.func @transform_7(%arg0: i32, %arg1: i32, %arg2: i32) -> (i32, i32, i32) {
    %c0_i32 = arith.constant 0 : i32
    %c0_i32_0 = arith.constant 0 : i32
    return %arg1, %c0_i32, %arg2 : i32, i32, i32
  }
  func.func @transform_8(%arg0: i32, %arg1: i32, %arg2: i32) -> (i32, i32, i32) {
    %c0_i32 = arith.constant 0 : i32
    %c0_i32_0 = arith.constant 0 : i32
    return %arg1, %arg2, %c0_i32 : i32, i32, i32
  }
  func.func @transform_9(%arg0: i32, %arg1: i32, %arg2: i32) -> (i32, i32, i32) {
    %c0_i32 = arith.constant 0 : i32
    %c0_i32_0 = arith.constant 0 : i32
    %c0_i32_1 = arith.constant 0 : i32
    return %arg1, %c0_i32, %c0_i32_0 : i32, i32, i32
  }
  func.func @transform_10(%arg0: i32, %arg1: i32, %arg2: i32) -> (i32, i32) {
    %c0_i32 = arith.constant 0 : i32
    %c0_i32_0 = arith.constant 0 : i32
    %c0_i32_1 = arith.constant 0 : i32
    return %c0_i32, %c0_i32_0 : i32, i32
  }
  func.func @transform_11(%arg0: i32, %arg1: i32, %arg2: i32) -> (i32, i32) {
    %c0_i32 = arith.constant 0 : i32
    %c0_i32_0 = arith.constant 0 : i32
    %c0_i32_1 = arith.constant 0 : i32
    return %c0_i32, %c0_i32_0 : i32, i32
  }
  func.func @transform_12(%arg0: i32, %arg1: i32, %arg2: i32) -> (i32, i32) {
    %c0_i32 = arith.constant 0 : i32
    %c0_i32_0 = arith.constant 0 : i32
    %c0_i32_1 = arith.constant 0 : i32
    return %c0_i32, %c0_i32_0 : i32, i32
  }
  func.func @transform_13(%arg0: i32, %arg1: i32, %arg2: i32) -> (i32, i32) {
    %c0_i32 = arith.constant 0 : i32
    %c0_i32_0 = arith.constant 0 : i32
    return %arg0, %c0_i32 : i32, i32
  }
}

</mosaic_0001>

<bundles_post_ra>
// kernel: tpu_custom_call.1
= control target key start
LH: loop header
LB: loop body
LE: loop exit
PB: predicated region body
PF: predicated region fallthrough
CT: control target
= control target key end

     0   :  { %s3357_s0 = inlined_call_operand.vmem [shape: f32[16,32], index: 0, kind: input, shape index: {}]   ;;  %s3358_s1 = inlined_call_operand.vmem [shape: f32[2,4,32], index: 1, kind: input, shape index: {}]   ;;  %s3359_s2 = inlined_call_operand.vmem [shape: bf16[2,32,96], index: 2, kind: input, shape index: {}]   ;;  %s3360_s3 = inlined_call_operand.vmem [shape: f32[2,1,96], index: 3, kind: input, shape index: {}]   ;;  %s3361_s4 = inlined_call_operand.vmem [shape: bf16[2,32,32], index: 4, kind: input, shape index: {}]   ;;  %s3362_s5 = inlined_call_operand.vmem [shape: f32[2,1,32], index: 5, kind: input, shape index: {}]   ;;  %s3363_s6 = inlined_call_operand.vmem [shape: bf16[2,32,128], index: 6, kind: input, shape index: {}]   ;;  %s3364_s7 = inlined_call_operand.vmem [shape: f32[2,1,128], index: 7, kind: input, shape index: {}]   ;;  %s3365_s8 = inlined_call_operand.vmem [shape: bf16[2,128,32], index: 8, kind: input, shape index: {}]   ;;  %s3366_s9 = inlined_call_operand.vmem [shape: f32[2,1,32], index: 9, kind: input, shape index: {}]   ;;  %s3367_s10 = inlined_call_operand.vmem [shape: f32[1,32], index: 10, kind: input, shape index: {}]   ;;  %s3368_s11 = inlined_call_operand.vmem [shape: bf16[32,128], index: 11, kind: input, shape index: {}]   ;;  %s3369_s12 = inlined_call_operand.vmem [shape: f32[1,128], index: 12, kind: input, shape index: {}]   ;;  %s3370_s13 = inlined_call_operand.hbm [shape: f32[16,128], index: 13, kind: output, shape index: {}]  }
   0x1   :  { %3385 = sst [smem:[#allocation20_spill]] %s3357_s0 }
   0x2   :  { %3386 = sst [smem:[#allocation21_spill]] %s3358_s1 }
   0x3   :  { %3387 = sst [smem:[#allocation22_spill]] %s3359_s2 }
   0x4   :  { %3388 = sst [smem:[#allocation23_spill]] %s3361_s4 }
   0x5   :  { %3389 = sst [smem:[#allocation24_spill]] %s3367_s10 }
   0x6   :  { %3390 = sst [smem:[#allocation25_spill]] %s3369_s12 }
   0x7   :  { %3391 = sst [smem:[#allocation26_spill]] %s3370_s13 }
   0x8   :  { %18 = vsyncpa [#allocation6], 0 }
   0x9   :  { %20 = vsyncpa [#allocation6 + $0x1], 0  ;;  %s2906_s25 = smov 0   ;;  %s2908_s26 = smov 0  }
   0xa   :  { %s2910_s27 = smov 0   ;;  %s2912_s28 = smov 0  }
   0xb   :  { %s2914_s29 = smov 0   ;;  %s2916_s30 = smov 0  }
   0xc   :  { %s2918_s14 = smov 0   ;;  %s2920_s15 = smov 0  }
   0xd LB: > { %3392 = sst [smem:[#allocation8_spill]] %s2791_s25  ;;  %s2389_s16 = sadd.s32 4294967295, %s2819_s15   ;;  %s2819_s15 = sphi %s2920_s15, %s26_s15   ;;  %s2815_s14 = sphi %s2918_s14, %s3428_s14   ;;  %s2811_s30 = sphi %s2916_s30, %s3427_s30   ;;  %s2807_s29 = sphi %s2914_s29, %s3426_s29   ;;  %s2803_s28 = sphi %s2912_s28, %s3425_s28   ;;  %s2799_s27 = sphi %s2910_s27, %s3424_s27   ;;  %s2795_s26 = sphi %s2908_s26, %s3423_s26   ;;  %s2791_s25 = sphi %s2906_s25, %s3422_s25  }
   0xe   : > { %3393 = sst [smem:[#allocation9_spill]] %s2795_s26  ;;  %s2390_s17 = sadd.s32 4294967294, %s2819_s15  }
   0xf   : > { %3394 = sst [smem:[#allocation10_spill]] %s2799_s27  ;;  %s41_s18 = sadd.s32 1, %s2811_s30 }
  0x10   : > { %3395 = sst [smem:[#allocation11_spill]] %s2807_s29  ;;  %p43_p0 = scmp.ge.s32.totalorder %s41_s18, 2 }
  0x11   : > { %3396 = sst [smem:[#allocation12_spill]] %s2811_s30  ;;  %s45_s19 = sadd.s32 1, %s2815_s14 }
  0x12   : > { %3397 = sst [smem:[#allocation13_spill]] %s2815_s14  ;;  %p391_p1 = scmp.ne.s32.totalorder %s2799_s27, %s2795_s26 }
  0x13   : > { %3398 = sst [smem:[#allocation14_spill]] %s2819_s15  ;;  %p392_p2 = scmp.eq.s32.totalorder %s2389_s16, 3 }
  0x14   : > { %s3430_s18 = smov (%p43_p0, %s41_s18), 0  ;;  %s3432_s19 = smov (!%p43_p0, %s45_s19), %s2815_s14 }
  0x15   : > { %3399 = sst [smem:[#allocation15_spill]] %s3430_s18  ;;  %p2955_p3 = por %p392_p2, %p391_p1 }
  0x16   : > { %p397_p4 = scmp.ne.s32.totalorder %s2795_s26, %s2791_s25  ;;  %p47_p5 = scmp.ge.s32.totalorder %s3432_s19, 2 }
  0x17   : > { %s3400_s20 = scalar_select %p2955_p3, 1, 0 }
  0x18   : > { %p398_p6 = scmp.eq.s32.totalorder %s2390_s17, 3  ;;  %p2393_p7 = scmp.ge.s32.totalorder %s2819_s15, 1 }
  0x19   : > { %3401 = sst [smem:[#allocation16_spill]] %s3400_s20  ;;  %p506_p8 = scmp.lt.s32.totalorder %s2819_s15, 5 }
  0x1a   : > { %s3434_s19 = smov (%p47_p5, %s3432_s19), 0  ;;  %p2965_p9 = por %p398_p6, %p397_p4 }
  0x1b   : > { %3402 = sst [smem:[#allocation17_spill]] %s3434_s19  ;;  %p507_p10 = pnand %p2393_p7, %p506_p8 }
  0x1c   : > { %s3403_s21 = scalar_select %p2965_p9, 1, 0 }
  0x1d   : > { %s378_s22 = ssub.s32 %s2815_s14, %s3434_s19  ;;  %s381_s23 = sadd.s32 1, %s2799_s27 }
  0x1e   : > { %3404 = sst [smem:[#allocation18_spill]] %s3403_s21  ;;  %p379_p11 = scmp.eq.s32.totalorder %s378_s22, 0 }
  0x1f   : > { %510 = sbr.rel (%p507_p10) target bundleno = 3112 (0xc28), region = 72  ;;  %s3374_s16 = sand.u32 (!%p507_p10), 1, %s2795_s26  }
  0x20   : > { %s2973_s24 = scalar_select %p379_p11, %s2799_s27, %s381_s23  }
  0x21   : > { %p595_p12 = scmp.lt.s32.totalorder (!%p507_p10), %s2807_s29, 1  ;;  %s2979_s17 = sshll.u32 (!%p507_p10), %s3374_s16, 3 }
  0x22   : > { %3405 = sst [smem:[#allocation19_spill]] %s2973_s24  ;;  %p599_p13 = scmp.lt.s32.totalorder (!%p507_p10), %s2803_s28, 1 }
  0x23   : > { %s3406_s0 = sld [smem:[#allocation20_spill]] (!%p507_p10)  ;;  %s3407_s1 = sld [smem:[#allocation21_spill]] (!%p507_p10) }
  0x24   : > { %s3408_s2 = sld [smem:[#allocation22_spill]] (!%p507_p10)  ;;  %s3409_s4 = sld [smem:[#allocation23_spill]] (!%p507_p10) }
  0x25   : > { %p2405_p0 = scmp.ne.s32.totalorder (!%p507_p10), %s2803_s28, 0 }
  0x26   : > { %s596_s18 = scalar_select %p595_p12, %s2807_s29, 1 }
  0x27   : > { %s2984_s19 = scalar_select %p599_p13, %s2803_s28, 1 }
  0x28   : > { %s2395_s22 = sshll.u32 %s596_s18, 3  ;;  %vm656_vm0 = vcmask (!%p2405_p0), 261120  }
  0x29   : > { %s598_s30 = scalar_lea.vmem %s3406_s0, %s2395_s22  ;;  %s2396_s24 = sshll.u32 %s2984_s19, 2 }
  0x2a   : > { %s2993_s21 = scalar_lea.vmem %s3407_s1, %s2396_s24  ;;  %s2453_s25 = sshll.u32 %s2984_s19, 4  ;;  %v655_v0 = vld [vmem:[%s598_s30] sm:$0xff] (!%p2405_p0) }
  0x2b   : > { %s607_s20 = scalar_lea.vmem %s3408_s2, %s2453_s25  ;;  %s3006_s14 = scalar_lea.vmem %s3409_s4, %s2453_s25  ;;  %657 = vst.msk [vmem:[#allocation2] sm:$0xff] (!%p2405_p0), %vm656_vm0, %v655_v0 }
  0x2c   : > { %s618_s27 = scalar_lea.vmem %s3362_s5, %s2984_s19  ;;  %s3015_s0 = scalar_lea.vmem %s3363_s6, %s2453_s25 }
  0x2d   : > { %s632_s1 = scalar_lea.vmem %s3364_s7, %s2984_s19  ;;  %s2456_s26 = sshll.u32 %s2984_s19, 6 }
  0x2e   : > { %s645_s10 = scalar_lea.vmem %s3366_s9, %s2984_s19  ;;  %s3029_s4 = scalar_lea.vmem %s3365_s8, %s2456_s26 }
  0x2f   : > { %s594_s22 = scalar_lea.vmem [#allocation5], %s2979_s17  ;;  %654 = sbr.rel (%p2405_p0) target bundleno = 54 (0x36), region = 80 }
  0x36 PF: > { %v658_v1 = vld [vmem:[#allocation2] sm:$0xff]  ;;  %vm661_vm1 = vcmask 261120   ;;  %v2821_v5 = vmov 0.0   ;;  %vm2822_vm2 = vmmov 0   ;;  %v2680_v6 = vld [vmem:[%s607_s20 + $0x8] sm:$0xff]   ;;  %v670_v9 = vlaneseq  ;;  %s3410_s25 = scalar_lea.vmem %s3360_s3, %s2984_s19  ;;  %s2823_s30 = smov 112  }
  0x37   : > { %v660_v2 = vmul.f32 %v658_v1, %v658_v1  ;;  %v2679_v4 = vld [vmem:[%s607_s20] sm:$0xff]   ;;  %2494 = vmatprep.subr.bf16.mxu0 %v2821_v5  ;;  %1868 = vst.msk [vmem:[#allocation4] sm:$0xff] %vm661_vm1, %v2821_v5  ;;  %2498 = vmatprep.mubr.msk.bf16.mxu0 %vm2822_vm2, %v2821_v5  ;;  %s2824_s20 = smov 120   ;;  %s2825_s23 = smov 104   ;;  %v2827_v28 = vmov 1983009808  }
  0x38   : > { %2495 = vmatpush3.bf16.msra.mxu0 %v2679_v4  ;;  %2514 = vmatprep.subr.bf16.mxu1 %v2821_v5  ;;  %v3044_v11 = vshrl.u32 %v670_v9, 7  ;;  %v3048_v13 = vld [vmem:[%s2993_s21] sm:$0xf]  ;;  %s2826_s24 = smov 96   ;;  %v755_v29 = vunpack.c.l.s4 %v2827_v28  ;;  %v2828_v32 = vmov 1934713408  }
  0x39   : > { %v662_v3 = vsel %vm661_vm1, %v660_v2, 0.0  ;;  %2496 = vmatprep.subr.bf16.mxu0 %v2821_v5  ;;  %2516 = vmatprep.mubr.msk.bf16.mxu1 %vm2822_vm2, %v2821_v5  ;;  %v2406_v19 = vld [vmem:[%s3410_s25] ss:$0 sm:$0xff]  ;;  %v787_v33 = vunpack.c.l.s4 %v2828_v32  ;;  %vm1192_vm3 = vcmask 64512   ;;  %s2829_s16 = smov 64   ;;  %vm1432_vm4 = vcmask 1043456  }
  0x3a   : > { %663 = vadd.xlane.f32.xlu0 %v662_v3  ;;  %v672_v12 = vsub.s32 0, %v3044_v11  ;;  %v756_v30 = vunpack.c.0.s8 %v755_v29  ;;  %s2831_s13 = smov 8   ;;  %s2832_s15 = smov 24   ;;  %vm1763_vm5 = vcmask 130048   ;;  %vm1765_vm6 = vcmask 195584  }
  0x3b   : > { %v788_v40 = vunpack.c.0.s8 %v787_v33  ;;  %p2443_p1 = scmp.ne.s32.totalorder %s2803_s28, 1 }
  0x3c   : > { %2497 = vmatpush3.bf16.msra.mxu0 %v2680_v6  ;;  %v673_v14 = vrot.slane %v3048_v13, %v672_v12  ;;  %v3083_v36 = vsub.s32 %v756_v30, %v3044_v11  ;;  %vm2834_vm8 = vmmov (!%p2443_p1), 0   ;;  %s3411_s12 = sld [smem:[#allocation24_spill]] (!%p2443_p1) }
  0x3d   : > { %2502 = vmatprep.subr.bf16.mxu0 %v2821_v5  ;;  %v3094_v46 = vsub.s32 %v788_v40, %v3044_v11 }
  0xc7   : > { %v664_v7 = vpop.xlane.xlu0 %663 }
  0xc8   : > { %v666_v8 = vmul.f32 0.03125, %v664_v7 }
  0xca   : > { %v667_v10 = vadd.f32 1e-06, %v666_v8 }
  0xcc   : > { %2693 = vrsqrt.f32 %v667_v10 }
  0xd6   : > { %v2694_v15 = vpop.eup %2693 }
  0xd7   : > { %v669_v16 = vmul.f32 %v2694_v15, %v658_v1 }
  0xd9   : > { %v3051_v17 = vmul.f32 %v673_v14, %v669_v16 }
  0xdb   : > { %v675_v18 = vpack.c.bf16 %v3051_v17, %v3051_v17 }
  0xdd   : > { %2499 = vmatmul.mubr.msk.bf16.vlgmr.msra.gmra.mrb[0].mxu0 %vm661_vm1, %v675_v18 }
  0xde   : > { %2504 = vmatprep.mubr.msk.bf16.mxu0 %vm2822_vm2, %v2821_v5 }
 0x1b0   : > { %v736_v20 = vpop.f32.mrb[0].mxu0 }
 0x1b1   : > { %v3063_v21 = vadd.f32 %v2406_v19, %v736_v20  ;;  %v2500_v22 = vpop.f32.mrb[1].mxu0 }
 0x1b2   : > { %v739_v23 = vpop.f32.mrb[2].mxu0 }
 0x1b3   : > { %746 = vrot.lane.b32.xlu1 %v3063_v21, %s2823_s30  ;;  %743 = vrot.lane.b32.xlu0 %v3063_v21, %s2824_s20  ;;  %v2501_v24 = vpop.f32.mrb[3].mxu0  ;;  %s3412_s20 = sld [smem:[#allocation25_spill]] (!%p2443_p1) }
 0x1b7   : > { %749 = vrot.lane.b32.xlu1 %v3063_v21, %s2825_s23 }
 0x1bb   : > { %820 = vrot.lane.b32.xlu1 %v3063_v21, %s2826_s24 }
 0x225   : > { %v3069_v25 = vpop.permute.xlu0 %743  ;;  %v3072_v26 = vpop.permute.xlu1 %746 }
 0x226   : > { %822 = vrot.lane.b32.xlu1 %v3069_v25, %s2826_s24  ;;  %v752_v37 = vcombine.low %v3063_v21, %v3072_v26  ;;  %v753_v38 = vcombine.high %v3063_v21, %v3072_v26 }
 0x228   : > { %v760_v43 = vrot.slane %v752_v37, %v3083_v36  ;;  %v767_v44 = vrot.slane %v753_v38, %v3083_v36 }
 0x229   : > { %v3075_v27 = vpop.permute.xlu1 %749 }
 0x22a   : > { %824 = vrot.lane.b32.xlu1 %v3072_v26, %s2826_s24  ;;  %v768_v34 = vcombine.low %v3069_v25, %v3075_v27  ;;  %v769_v35 = vcombine.high %v3069_v25, %v3075_v27 }
 0x22c   : > { %v776_v41 = vrot.slane %v768_v34, %v3083_v36  ;;  %v783_v42 = vrot.slane %v769_v35, %v3083_v36 }
 0x22d   : > { %v821_v31 = vpop.permute.xlu1 %820 }
 0x22e   : > { %826 = vrot.lane.b32.xlu1 %v3075_v27, %s2826_s24  ;;  %v784_v47 = vcombine.low %v760_v43, %v776_v41  ;;  %v785_v48 = vcombine.high %v760_v43, %v776_v41  ;;  %v800_v49 = vcombine.low %v767_v44, %v783_v42  ;;  %v801_v50 = vcombine.high %v767_v44, %v783_v42 }
 0x230   : > { %v792_v56 = vrot.slane %v784_v47, %v3094_v46  ;;  %v799_v57 = vrot.slane %v785_v48, %v3094_v46  ;;  %v808_v58 = vrot.slane %v800_v49, %v3094_v46  ;;  %v815_v59 = vrot.slane %v801_v50, %v3094_v46 }
 0x232   : > { %v980_v4 = vcombine.low %v792_v56, %v799_v57  ;;  %v2410_v6 = vcombine.high %v792_v56, %v799_v57  ;;  %v996_v7 = vcombine.low %v808_v58, %v815_v59  ;;  %v2411_v8 = vcombine.high %v808_v58, %v815_v59 }
 0x234   : > { %v987_v20 = vrot.slane %v980_v4, %v3083_v36  ;;  %v995_v22 = vrot.slane %v2410_v6, %v3083_v36  ;;  %v1003_v23 = vrot.slane %v996_v7, %v3083_v36  ;;  %v1011_v24 = vrot.slane %v2411_v8, %v3083_v36 }
 0x236   : > { %v1012_v37 = vcombine.low %v987_v20, %v995_v22  ;;  %v1028_v38 = vcombine.low %v1003_v23, %v1011_v24  ;;  %v1029_v40 = vcombine.high %v1003_v23, %v1011_v24 }
 0x238   : > { %v1020_v48 = vrot.slane %v1012_v37, %v3094_v46  ;;  %v1036_v49 = vrot.slane %v1028_v38, %v3094_v46 }
 0x23a   : > { %v1044_v57 = vcombine.low %v1020_v48, %v1036_v49 }
 0x298   : > { %v823_v39 = vpop.permute.xlu1 %822 }
 0x29c   : > { %v825_v45 = vpop.permute.xlu1 %824 }
 0x29d   : > { %v832_v51 = vcombine.low %v821_v31, %v825_v45  ;;  %v833_v52 = vcombine.high %v821_v31, %v825_v45 }
 0x29f   : > { %v840_v60 = vrot.slane %v832_v51, %v3083_v36  ;;  %v847_v61 = vrot.slane %v833_v52, %v3083_v36 }
 0x2a0   : > { %v827_v53 = vpop.permute.xlu1 %826 }
 0x2a1   : > { %v848_v54 = vcombine.low %v823_v39, %v827_v53  ;;  %v849_v55 = vcombine.high %v823_v39, %v827_v53  ;;  %v1013_v39 = vcombine.high %v987_v20, %v995_v22  ;;  %v1043_v53 = vrot.slane %v1029_v40, %v3094_v46 }
 0x2a3   : > { %v856_v62 = vrot.slane %v848_v54, %v3083_v36  ;;  %v863_v63 = vrot.slane %v849_v55, %v3083_v36  ;;  %v1027_v52 = vrot.slane %v1013_v39, %v3094_v46 }
 0x2a5   : > { %v864_v0 = vcombine.low %v840_v60, %v856_v62  ;;  %v865_v1 = vcombine.high %v840_v60, %v856_v62  ;;  %v880_v2 = vcombine.low %v847_v61, %v863_v63  ;;  %v881_v3 = vcombine.high %v847_v61, %v863_v63 }
 0x2a6   : > { %v1046_v58 = vcombine.low %v1027_v52, %v1043_v53  ;;  %v1184_v60 = vpack.c.bf16 %v1044_v57, %v1044_v57  ;;  %v1047_v4 = vcombine.high %v1027_v52, %v1043_v53 }
 0x2a7   : > { %v872_v9 = vrot.slane %v864_v0, %v3094_v46  ;;  %v879_v10 = vrot.slane %v865_v1, %v3094_v46  ;;  %v888_v12 = vrot.slane %v880_v2, %v3094_v46  ;;  %v895_v14 = vrot.slane %v881_v3, %v3094_v46 }
 0x2a8   : > { %v1186_v61 = vpack.c.bf16 %v1046_v58, %v1046_v58  ;;  %v1045_v0 = vcombine.high %v1020_v48, %v1036_v49  ;;  %v1187_v6 = vpack.c.bf16 %v1047_v4, %v1047_v4 }
 0x2a9   : > { %v1048_v15 = vcombine.low %v872_v9, %v879_v10  ;;  %v2412_v16 = vcombine.high %v872_v9, %v879_v10  ;;  %v1064_v18 = vcombine.low %v888_v12, %v895_v14  ;;  %v2413_v19 = vcombine.high %v888_v12, %v895_v14 }
 0x2aa   : > { %v1185_v2 = vpack.c.bf16 %v1045_v0, %v1045_v0 }
 0x2ab   : > { %v1055_v28 = vrot.slane %v1048_v15, %v3083_v36  ;;  %v1063_v29 = vrot.slane %v2412_v16, %v3083_v36  ;;  %v1071_v30 = vrot.slane %v1064_v18, %v3083_v36  ;;  %v1079_v31 = vrot.slane %v2413_v19, %v3083_v36 }
 0x2ad   : > { %v1080_v32 = vcombine.low %v1055_v28, %v1063_v29  ;;  %v1096_v33 = vcombine.low %v1071_v30, %v1079_v31  ;;  %v1081_v34 = vcombine.high %v1055_v28, %v1063_v29  ;;  %v1097_v35 = vcombine.high %v1071_v30, %v1079_v31 }
 0x2af   : > { %v1088_v41 = vrot.slane %v1080_v32, %v3094_v46  ;;  %v1104_v42 = vrot.slane %v1096_v33, %v3094_v46  ;;  %v1095_v43 = vrot.slane %v1081_v34, %v3094_v46  ;;  %v1111_v44 = vrot.slane %v1097_v35, %v3094_v46 }
 0x2b1   : > { %v1112_v45 = vcombine.low %v1088_v41, %v1104_v42  ;;  %v1114_v47 = vcombine.low %v1095_v43, %v1111_v44  ;;  %v1113_v56 = vcombine.high %v1088_v41, %v1104_v42  ;;  %v1115_v63 = vcombine.high %v1095_v43, %v1111_v44 }
 0x2b3   : > { %v1188_v50 = vpack.c.bf16 %v1112_v45, %v1112_v45  ;;  %v1190_v51 = vpack.c.bf16 %v1114_v47, %v1114_v47  ;;  %v1189_v59 = vpack.c.bf16 %v1113_v56, %v1113_v56  ;;  %v1191_v1 = vpack.c.bf16 %v1115_v63, %v1115_v63 }
 0x2b5   : > { %v1197_v54 = vsel %vm1192_vm3, %v1188_v50, 0  ;;  %v1289_v55 = vsel %vm1192_vm3, %v1190_v51, 0  ;;  %v1243_v62 = vsel %vm1192_vm3, %v1189_v59, 0  ;;  %v1335_v3 = vsel %vm1192_vm3, %v1191_v1, 0 }
 0x2b6   : > { %2503 = vmatpush3.bf16.xpose.msra.mxu0 %v1197_v54  ;;  %2515 = vmatpush3.bf16.xpose.msra.mxu1 %v1289_v55 }
 0x2b7   : > { %2508 = vmatprep.subr.bf16.mxu0 %v2821_v5  ;;  %2526 = vmatprep.subr.bf16.mxu1 %v2821_v5 }
 0x2bd   : > { %2505 = vmatmul.mubr.msk.bf16.vlgmr.msra.gmra.mrb[4].mxu0 %vm1192_vm3, %v1184_v60  ;;  %2517 = vmatmul.mubr.msk.bf16.vlgmr.msra.gmra.mrb[0].mxu1 %vm1192_vm3, %v1186_v61 }
 0x2be   : > { %2509 = vmatpush3.bf16.xpose.msra.mxu0 %v1243_v62  ;;  %2510 = vmatprep.mubr.msk.bf16.mxu0 %vm2822_vm2, %v2821_v5 }
 0x2bf   : > { %2520 = vmatprep.subr.bf16.mxu0 %v2821_v5  ;;  %2528 = vmatprep.mubr.msk.bf16.mxu1 %vm2822_vm2, %v2821_v5 }
 0x2c5   : > { %2511 = vmatmul.mubr.msk.bf16.vlgmr.msra.gmra.mrb[8].mxu0 %vm1192_vm3, %v1185_v2 }
 0x2c6   : > { %2521 = vmatpush3.bf16.xpose.msra.mxu0 %v1335_v3  ;;  %2522 = vmatprep.mubr.msk.bf16.mxu0 %vm2822_vm2, %v2821_v5 }
 0x2c7   : > { %2532 = vmatprep.subr.bf16.mxu0 %v2821_v5 }
 0x2cd   : > { %2523 = vmatmul.mubr.msk.bf16.vlgmr.msra.gmra.mrb[12].mxu0 %vm1192_vm3, %v1187_v6 }
 0x2ce   : > { %2534 = vmatprep.mubr.msk.bf16.mxu0 %vm2822_vm2, %v2821_v5 }
 0x390   : > { %v1233_v7 = vpop.f32.mrb[4].mxu0  ;;  %v1325_v8 = vpop.f32.mrb[0].mxu1 }
 0x391   : > { %v2506_v9 = vpop.f32.mrb[5].mxu0  ;;  %v2518_v10 = vpop.f32.mrb[1].mxu1  ;;  %v1383_v12 = vsel %vm1192_vm3, %v1325_v8, -inf  ;;  %v1377_v14 = vsel %vm1192_vm3, %v1233_v7, -inf }
 0x392   : > { %1384 = vmax.xlane.f32.xlu0 %v1383_v12  ;;  %v1328_v15 = vpop.f32.mrb[2].mxu1  ;;  %1378 = vmax.xlane.f32.xlu1 %v1377_v14  ;;  %v1236_v16 = vpop.f32.mrb[6].mxu0 }
 0x393   : > { %v2507_v18 = vpop.f32.mrb[7].mxu0  ;;  %v2519_v19 = vpop.f32.mrb[3].mxu1 }
 0x398   : > { %v1279_v20 = vpop.f32.mrb[8].mxu0 }
 0x399   : > { %v2512_v22 = vpop.f32.mrb[9].mxu0  ;;  %v1380_v23 = vsel %vm1192_vm3, %v1279_v20, -inf }
 0x39a   : > { %1381 = vmax.xlane.f32.xlu0 %v1380_v23  ;;  %v1282_v24 = vpop.f32.mrb[10].mxu0 }
 0x39b   : > { %v2513_v28 = vpop.f32.mrb[11].mxu0 }
 0x3a0   : > { %v1371_v29 = vpop.f32.mrb[12].mxu0 }
 0x3a1   : > { %v2524_v30 = vpop.f32.mrb[13].mxu0  ;;  %v1386_v31 = vsel %vm1192_vm3, %v1371_v29, -inf }
 0x3a2   : > { %1387 = vmax.xlane.f32.xlu1 %v1386_v31  ;;  %v1374_v32 = vpop.f32.mrb[14].mxu0 }
 0x3a3   : > { %v2525_v33 = vpop.f32.mrb[15].mxu0 }
 0x3b0   : > { %900 = vrot.lane.b32.xlu0 %v3063_v21, %s2829_s16 }
 0x3b3   : > { %902 = vrot.lane.b32.xlu1 %v3069_v25, %s2829_s16 }
 0x41f   : > { %v1379_v34 = vpop.xlane.xlu1 %1378  ;;  %v1385_v38 = vpop.xlane.xlu0 %1384 }
 0x420   : > { %v1389_v35 = vsub.f32 %v1233_v7, %v1379_v34  ;;  %v1391_v48 = vsub.f32 %v1325_v8, %v1385_v38 }
 0x422   : > { %v1393_v37 = vmul.f32 1.442695, %v1389_v35  ;;  %v1397_v49 = vmul.f32 1.442695, %v1391_v48 }
 0x424   : > { %2695 = vpow2.f32 %v1393_v37 }
 0x427   : > { %v1382_v39 = vpop.xlane.xlu0 %1381 }
 0x428   : > { %v1390_v40 = vsub.f32 %v1279_v20, %v1382_v39 }
 0x42a   : > { %v1395_v41 = vmul.f32 1.442695, %v1390_v40 }
 0x42c   : > { %2697 = vpow2.f32 %v1395_v41 }
 0x42e   : > { %v3150_v42 = vpop.eup %2695 }
 0x42f   : > { %v1401_v43 = vsel %vm1192_vm3, %v3150_v42, 0.0  ;;  %v1388_v25 = vpop.xlane.xlu1 %1387 }
 0x430   : > { %1402 = vadd.xlane.f32.xlu0 %v1401_v43  ;;  %v1392_v45 = vsub.f32 %v1371_v29, %v1388_v25 }
 0x432   : > { %v1399_v47 = vmul.f32 1.442695, %v1392_v45 }
 0x433   : > { %v903_v54 = vpop.permute.xlu1 %902 }
 0x434   : > { %2699 = vpow2.f32 %v1399_v47 }
 0x435   : > { %2701 = vpow2.f32 %v1397_v49 }
 0x436   : > { %v3154_v44 = vpop.eup %2697 }
 0x437   : > { %v1404_v21 = vsel %vm1192_vm3, %v3154_v44, 0.0 }
 0x438   : > { %1405 = vadd.xlane.f32.xlu1 %v1404_v21 }
 0x43e   : > { %v3160_v50 = vpop.eup %2699 }
 0x43f   : > { %v1410_v51 = vsel %vm1192_vm3, %v3160_v50, 0.0  ;;  %v3164_v52 = vpop.eup %2701 }
 0x446   : > { %906 = vrot.lane.b32.xlu0 %v3075_v27, %s2829_s16  ;;  %v1407_v27 = vsel %vm1192_vm3, %v3164_v52, 0.0 }
 0x449   : > { %904 = vrot.lane.b32.xlu1 %v3072_v26, %s2829_s16  ;;  %v901_v26 = vpop.permute.xlu0 %900 }
 0x465   : > { %1411 = vadd.xlane.f32.xlu0 %v1410_v51 }
 0x46d   : > { %1408 = vadd.xlane.f32.xlu1 %v1407_v27 }
 0x4bd   : > { %v1403_v53 = vpop.xlane.xlu0 %1402 }
 0x4be   : > { %2703 = vrcp.f32 %v1403_v53 }
 0x4c1   : > { %v907_v55 = vpop.permute.xlu0 %906 }
 0x4c2   : > { %v928_v57 = vcombine.low %v903_v54, %v907_v55  ;;  %v929_v58 = vcombine.high %v903_v54, %v907_v55 }
 0x4c4   : > { %v936_v62 = vrot.slane %v928_v57, %v3083_v36  ;;  %v943_v63 = vrot.slane %v929_v58, %v3083_v36 }
 0x4c5   : > { %v1406_v56 = vpop.xlane.xlu1 %1405 }
 0x4c6   : > { %2705 = vrcp.f32 %v1406_v56 }
 0x4c8   : > { %v2704_v30 = vpop.eup %2703 }
 0x4c9   : > { %v905_v59 = vpop.permute.xlu1 %904  ;;  %v1417_v41 = vmul.f32 %v2704_v30, %v3150_v42  ;;  %v2681_v30 = vld [vmem:[%s3006_s14] sm:$0xff]  }
 0x4ca   : > { %v912_v60 = vcombine.low %v901_v26, %v905_v59  ;;  %v913_v61 = vcombine.high %v901_v26, %v905_v59 }
 0x4cb   : > { %v1421_v51 = vpack.c.bf16 %v1417_v41, %v1417_v41 }
 0x4cc   : > { %v920_v0 = vrot.slane %v912_v60, %v3083_v36  ;;  %v927_v1 = vrot.slane %v913_v61, %v3083_v36 }
 0x4ce   : > { %v944_v2 = vcombine.low %v920_v0, %v936_v62  ;;  %v945_v3 = vcombine.high %v920_v0, %v936_v62  ;;  %v960_v4 = vcombine.low %v927_v1, %v943_v63  ;;  %v961_v6 = vcombine.high %v927_v1, %v943_v63 }
 0x4d0   : > { %v952_v7 = vrot.slane %v944_v2, %v3094_v46  ;;  %v959_v8 = vrot.slane %v945_v3, %v3094_v46  ;;  %v968_v9 = vrot.slane %v960_v4, %v3094_v46  ;;  %v975_v10 = vrot.slane %v961_v6, %v3094_v46  ;;  %v2706_v35 = vpop.eup %2705 }
 0x4d1   : > { %v1418_v43 = vmul.f32 %v2706_v35, %v3154_v44 }
 0x4d2   : > { %v1116_v12 = vcombine.low %v952_v7, %v959_v8  ;;  %v2414_v14 = vcombine.high %v952_v7, %v959_v8  ;;  %v1132_v15 = vcombine.low %v968_v9, %v975_v10  ;;  %v2415_v16 = vcombine.high %v968_v9, %v975_v10 }
 0x4d3   : > { %v1422_v27 = vpack.c.bf16 %v1418_v43, %v1418_v43 }
 0x4d4   : > { %v1123_v18 = vrot.slane %v1116_v12, %v3083_v36  ;;  %v1131_v19 = vrot.slane %v2414_v14, %v3083_v36  ;;  %v1139_v20 = vrot.slane %v1132_v15, %v3083_v36  ;;  %v1147_v22 = vrot.slane %v2415_v16, %v3083_v36 }
 0x4d6   : > { %v1148_v23 = vcombine.low %v1123_v18, %v1131_v19  ;;  %v1164_v24 = vcombine.low %v1139_v20, %v1147_v22  ;;  %v1149_v28 = vcombine.high %v1123_v18, %v1131_v19  ;;  %v1165_v29 = vcombine.high %v1139_v20, %v1147_v22 }
 0x4d8   : > { %v1156_v31 = vrot.slane %v1148_v23, %v3094_v46  ;;  %v1172_v32 = vrot.slane %v1164_v24, %v3094_v46  ;;  %v1163_v33 = vrot.slane %v1149_v28, %v3094_v46  ;;  %v1179_v34 = vrot.slane %v1165_v29, %v3094_v46 }
 0x4da   : > { %v1180_v37 = vcombine.low %v1156_v31, %v1172_v32  ;;  %v1181_v38 = vcombine.high %v1156_v31, %v1172_v32  ;;  %v1182_v39 = vcombine.low %v1163_v33, %v1179_v34  ;;  %v1183_v40 = vcombine.high %v1163_v33, %v1179_v34 }
 0x4dc   : > { %v1425_v21 = vpack.c.bf16 %v1180_v37, %v1180_v37  ;;  %v1426_v25 = vpack.c.bf16 %v1181_v38, %v1181_v38  ;;  %v1427_v48 = vpack.c.bf16 %v1182_v39, %v1182_v39  ;;  %v1428_v49 = vpack.c.bf16 %v1183_v40, %v1183_v40  ;;  %v2682_v40 = vld [vmem:[%s3006_s14 + $0x8] sm:$0xff]   ;;  %s2830_s14 = smov 16  }
 0x4de   : > { %v1434_v45 = vsel %vm1432_vm4, %v1425_v21, 0  ;;  %v1480_v47 = vsel %vm1432_vm4, %v1426_v25, 0  ;;  %v1526_v42 = vsel %vm1432_vm4, %v1427_v48, 0  ;;  %v1572_v44 = vsel %vm1432_vm4, %v1428_v49, 0 }
 0x4df   : > { %2527 = vmatpush3.bf16.msra.mxu1 %v1434_v45  ;;  %2533 = vmatpush3.bf16.msra.mxu0 %v1480_v47 }
 0x4e0   : > { %2538 = vmatprep.subr.bf16.mxu1 %v2821_v5  ;;  %2544 = vmatprep.subr.bf16.mxu0 %v2821_v5 }
 0x4e2   : > { %2529 = vmatmul.mubr.msk.bf16.vlgmr.msra.gmra.mrb[4].mxu1 %vm1192_vm3, %v1421_v51  ;;  %2535 = vmatmul.mubr.msk.bf16.vlgmr.msra.gmra.mrb[16].mxu0 %vm1192_vm3, %v1422_v27 }
 0x4e3   : > { %2539 = vmatpush3.bf16.msra.mxu1 %v1526_v42  ;;  %2545 = vmatpush3.bf16.msra.mxu0 %v1572_v44 }
 0x4e4   : > { %2546 = vmatprep.mubr.msk.bf16.mxu0 %vm2822_vm2, %v2821_v5  ;;  %2540 = vmatprep.mubr.msk.bf16.mxu1 %vm2822_vm2, %v2821_v5 }
 0x4e5   : > { %2550 = vmatprep.subr.bf16.mxu1 %v2821_v5  ;;  %2558 = vmatprep.subr.bf16.mxu0 %v2821_v5 }
 0x4f2   : > { %v1412_v26 = vpop.xlane.xlu0 %1411 }
 0x4f3   : > { %2707 = vrcp.f32 %v1412_v26 }
 0x4fa   : > { %v1409_v53 = vpop.xlane.xlu1 %1408 }
 0x4fb   : > { %2709 = vrcp.f32 %v1409_v53 }
 0x4fd   : > { %v2708_v54 = vpop.eup %2707 }
 0x4fe   : > { %v1420_v55 = vmul.f32 %v2708_v54, %v3160_v50 }
 0x500   : > { %v1424_v56 = vpack.c.bf16 %v1420_v55, %v1420_v55 }
 0x502   : > { %2547 = vmatmul.mubr.msk.bf16.vlgmr.msra.gmra.mrb[20].mxu0 %vm1192_vm3, %v1424_v56 }
 0x503   : > { %2562 = vmatprep.mubr.msk.bf16.mxu0 %vm2822_vm2, %v2821_v5 }
 0x505   : > { %v2710_v57 = vpop.eup %2709 }
 0x506   : > { %v1419_v58 = vmul.f32 %v2710_v57, %v3164_v52 }
 0x508   : > { %v1423_v59 = vpack.c.bf16 %v1419_v58, %v1419_v58 }
 0x50a   : > { %2541 = vmatmul.mubr.msk.bf16.vlgmr.msra.gmra.mrb[8].mxu1 %vm1192_vm3, %v1423_v59 }
 0x50b   : > { %2554 = vmatprep.mubr.msk.bf16.mxu1 %vm2822_vm2, %v2821_v5  ;;  %2551 = vmatpush3.bf16.msra.mxu1 %v2681_v30 }
 0x50c   : > { %2552 = vmatprep.subr.bf16.mxu1 %v2821_v5 }
 0x50f   : > { %2553 = vmatpush3.bf16.msra.mxu1 %v2682_v40  ;;  %v2689_v40 = vld [vmem:[%s3029_s4 + $0x20] sm:$0xff]  }
 0x510   : > { %2566 = vmatprep.subr.bf16.mxu1 %v2821_v5 }
 0x5b5   : > { %v1470_v60 = vpop.f32.mrb[4].mxu1  ;;  %v1516_v61 = vpop.f32.mrb[16].mxu0 }
 0x5b6   : > { %v2530_v62 = vpop.f32.mrb[5].mxu1  ;;  %v2536_v63 = vpop.f32.mrb[17].mxu0 }
 0x5b7   : > { %v1473_v50 = vpop.f32.mrb[6].mxu1  ;;  %v1519_v0 = vpop.f32.mrb[18].mxu0  ;;  %v1840_v62 = vmul.f32 %v3048_v13, %v3048_v13  ;;  %v1843_v63 = vsub.s32 1, %v3044_v11 }
 0x5b8   : > { %v2531_v1 = vpop.f32.mrb[7].mxu1  ;;  %v2537_v2 = vpop.f32.mrb[19].mxu0 }
 0x5d5   : > { %v1608_v3 = vpop.f32.mrb[20].mxu0 }
 0x5d6   : > { %v1630_v4 = vcombine.low %v1516_v61, %v1608_v3  ;;  %v1631_v6 = vcombine.high %v1516_v61, %v1608_v3  ;;  %v2548_v7 = vpop.f32.mrb[21].mxu0  ;;  %v2426_v61 = vld [vmem:[%s618_s27] ss:$0 sm:$0xff] }
 0x5d7   : > { %v1611_v8 = vpop.f32.mrb[22].mxu0 }
 0x5d8   : > { %v2549_v52 = vpop.f32.mrb[23].mxu0  ;;  %v1638_v16 = vrot.slane %v1630_v4, %v3083_v36  ;;  %v1645_v18 = vrot.slane %v1631_v6, %v3083_v36  ;;  %v1844_v6 = vrot.slane %v1840_v62, %v1843_v63 }
 0x5dd   : > { %v1562_v9 = vpop.f32.mrb[8].mxu1 }
 0x5de   : > { %v1614_v10 = vcombine.low %v1470_v60, %v1562_v9  ;;  %v1615_v12 = vcombine.high %v1470_v60, %v1562_v9  ;;  %v2542_v14 = vpop.f32.mrb[9].mxu1 }
 0x5df   : > { %v1565_v15 = vpop.f32.mrb[10].mxu1 }
 0x5e0   : > { %v1622_v19 = vrot.slane %v1614_v10, %v3083_v36  ;;  %v1629_v20 = vrot.slane %v1615_v12, %v3083_v36  ;;  %v2543_v22 = vpop.f32.mrb[11].mxu1  ;;  %v2683_v10 = vld [vmem:[%s3015_s0] sm:$0xff]   ;;  %v2684_v12 = vld [vmem:[%s3015_s0 + $0x8] sm:$0xff]  }
 0x5e1   : > { %2559 = vmatpush3.bf16.msra.mxu0 %v2683_v10 }
 0x5e2   : > { %v1646_v23 = vcombine.low %v1622_v19, %v1638_v16  ;;  %v1647_v24 = vcombine.high %v1622_v19, %v1638_v16  ;;  %v1662_v28 = vcombine.low %v1629_v20, %v1645_v18  ;;  %v1663_v29 = vcombine.high %v1629_v20, %v1645_v18  ;;  %2560 = vmatprep.subr.bf16.mxu0 %v2821_v5 }
 0x5e4   : > { %v1654_v31 = vrot.slane %v1646_v23, %v3094_v46  ;;  %v1661_v32 = vrot.slane %v1647_v24, %v3094_v46  ;;  %v1670_v33 = vrot.slane %v1662_v28, %v3094_v46  ;;  %v1677_v34 = vrot.slane %v1663_v29, %v3094_v46 }
 0x5e5   : > { %2561 = vmatpush3.bf16.msra.mxu0 %v2684_v12  ;;  %v1859_v24 = vrot.slane %v3048_v13, 1 }
 0x5e6   : > { %v1682_v35 = vcombine.low %v1654_v31, %v1661_v32  ;;  %v2424_v37 = vcombine.high %v1654_v31, %v1661_v32  ;;  %v1698_v38 = vcombine.low %v1670_v33, %v1677_v34  ;;  %v2425_v39 = vcombine.high %v1670_v33, %v1677_v34 }
 0x5e7   : > { %v1861_v28 = vmul.f32 %v1859_v24, %v3048_v13  ;;  %v2686_v13 = vld [vmem:[%s3029_s4 + $0x8] sm:$0xff]  }
 0x5e8   : > { %v1689_v41 = vrot.slane %v1682_v35, %v3083_v36  ;;  %v1697_v43 = vrot.slane %v2424_v37, %v3083_v36  ;;  %v1705_v21 = vrot.slane %v1698_v38, %v3083_v36  ;;  %v1713_v25 = vrot.slane %v2425_v39, %v3083_v36  ;;  %v2685_v37 = vld [vmem:[%s3029_s4] sm:$0xff]   ;;  %v2687_v38 = vld [vmem:[%s3029_s4 + $0x10] sm:$0xff]   ;;  %v2688_v39 = vld [vmem:[%s3029_s4 + $0x18] sm:$0xff]  }
 0x5e9   : > { %v1865_v30 = vrot.slane %v1861_v28, %v1843_v63  ;;  %v2099_v28 = vsub.s32 3, %v3044_v11  ;;  %v2722_v11 = vld [vmem:[%s3368_s11 + $0x8] sm:$0xff] (!%p2443_p1)  }
 0x5ea   : > { %v1715_v45 = vcombine.high %v1689_v41, %v1697_v43  ;;  %v1731_v47 = vcombine.high %v1705_v21, %v1713_v25  ;;  %v1714_v48 = vcombine.low %v1689_v41, %v1697_v43  ;;  %v1730_v49 = vcombine.low %v1705_v21, %v1713_v25  ;;  %v2690_v41 = vld [vmem:[%s3029_s4 + $0x28] sm:$0xff]   ;;  %v2691_v43 = vld [vmem:[%s3029_s4 + $0x30] sm:$0xff]   ;;  %v2692_v21 = vld [vmem:[%s3029_s4 + $0x38] sm:$0xff]  }
 0x5eb   : > { %v2430_v25 = vld [vmem:[%s632_s1] ss:$0 sm:$0xff] }
 0x5ec   : > { %v1729_v51 = vrot.slane %v1715_v45, %v3094_v46  ;;  %v1745_v27 = vrot.slane %v1731_v47, %v3094_v46  ;;  %v1722_v42 = vrot.slane %v1714_v48, %v3094_v46  ;;  %v1738_v44 = vrot.slane %v1730_v49, %v3094_v46 }
 0x5ee   : > { %v1748_v26 = vcombine.low %v1729_v51, %v1745_v27  ;;  %v1747_v53 = vcombine.high %v1722_v42, %v1738_v44  ;;  %v1749_v54 = vcombine.high %v1729_v51, %v1745_v27  ;;  %v1746_v55 = vcombine.low %v1722_v42, %v1738_v44 }
 0x5f0   : > { %1755 = vrot.lane.b32.xlu1 %v1748_v26, %s2830_s14  ;;  %1751 = vrot.lane.b32.xlu0 %v1747_v53, %s2831_s13 }
 0x5f4   : > { %1759 = vrot.lane.b32.xlu1 %v1749_v54, %s2832_s15 }
 0x662   : > { %v1756_v36 = vpop.permute.xlu1 %1755  ;;  %v1752_v56 = vpop.permute.xlu0 %1751 }
 0x663   : > { %v1762_v57 = vsel %vm1192_vm3, %v1746_v55, %v1752_v56 }
 0x664   : > { %v1764_v59 = vsel %vm1763_vm5, %v1762_v57, %v1756_v36 }
 0x666   : > { %v1760_v58 = vpop.permute.xlu1 %1759 }
 0x667   : > { %v1766_v46 = vsel %vm1765_vm6, %v1764_v59, %v1760_v58 }
 0x668   : > { %v1767_v60 = vpack.c.bf16 %v1766_v46, %v1766_v46 }
 0x66a   : > { %2555 = vmatmul.mubr.msk.bf16.vlgmr.msra.gmra.mrb[12].mxu1 %vm661_vm1, %v1767_v60 }
 0x66b   : > { %2582 = vmatprep.mubr.msk.bf16.mxu1 %vm2822_vm2, %v2821_v5  ;;  %2567 = vmatpush3.bf16.msra.mxu1 %v2685_v37  ;;  %v2721_v37 = vld [vmem:[%s3368_s11] sm:$0xff] (!%p2443_p1)  }
 0x66c   : > { %2568 = vmatprep.subr.bf16.mxu1 %v2821_v5 }
 0x66f   : > { %2569 = vmatpush3.bf16.msra.mxu1 %v2686_v13  ;;  %v2833_v13 = vmov (!%p2443_p1), 0.0  }
 0x670   : > { %2570 = vmatprep.subr.bf16.mxu1 %v2821_v5  ;;  %2586 = vmatprep.subr.bf16.mxu0 (!%p2443_p1), %v2833_v13 }
 0x673   : > { %2571 = vmatpush3.bf16.msra.mxu1 %v2687_v38 }
 0x674   : > { %2572 = vmatprep.subr.bf16.mxu1 %v2821_v5 }
 0x677   : > { %2573 = vmatpush3.bf16.msra.mxu1 %v2688_v39 }
 0x678   : > { %2574 = vmatprep.subr.bf16.mxu1 %v2821_v5 }
 0x67b   : > { %2575 = vmatpush3.bf16.msra.mxu1 %v2689_v40 }
 0x67c   : > { %2576 = vmatprep.subr.bf16.mxu1 %v2821_v5 }
 0x67f   : > { %2577 = vmatpush3.bf16.msra.mxu1 %v2690_v41 }
 0x680   : > { %2578 = vmatprep.subr.bf16.mxu1 %v2821_v5 }
 0x683   : > { %2579 = vmatpush3.bf16.msra.mxu1 %v2691_v43  ;;  %v2444_v43 = vld [vmem:[%s3411_s12] ss:$0 sm:$0xff] (!%p2443_p1) }
 0x684   : > { %2580 = vmatprep.subr.bf16.mxu1 %v2821_v5 }
 0x687   : > { %2581 = vmatpush3.bf16.msra.mxu1 %v2692_v21 }
 0x73d   : > { %v1828_v50 = vpop.f32.mrb[12].mxu1 }
 0x73e   : > { %v1829_v0 = vadd.f32 %v2426_v61, %v1828_v50  ;;  %v2556_v1 = vpop.f32.mrb[13].mxu1 }
 0x73f   : > { %v1831_v2 = vpop.f32.mrb[14].mxu1 }
 0x740   : > { %v1834_v3 = vadd.f32 %v1829_v0, %v3051_v17  ;;  %v2557_v4 = vpop.f32.mrb[15].mxu1 }
 0x742   : > { %v1835_v7 = vmul.f32 %v1834_v3, %v1834_v3 }
 0x744   : > { %v1836_v8 = vsel %vm661_vm1, %v1835_v7, 0.0  ;;  %v1845_v52 = vmul.f32 %v1844_v6, %v1835_v7 }
 0x745   : > { %1837 = vadd.xlane.f32.xlu0 %v1836_v8  ;;  %v1966_v8 = vld [vmem:[#allocation4] sm:$0xff] }
 0x746   : > { %v1846_v9 = vsel %vm661_vm1, %v1845_v52, 0.0 }
 0x747   : > { %1847 = vadd.xlane.f32.xlu1 %v1846_v9 }
 0x7d2   : > { %v1838_v14 = vpop.xlane.xlu0 %1837 }
 0x7d3   : > { %v1839_v15 = vmul.f32 0.03125, %v1838_v14 }
 0x7d4   : > { %v1848_v17 = vpop.xlane.xlu1 %1847 }
 0x7d5   : > { %v1850_v16 = vadd.f32 1e-06, %v1839_v15  ;;  %v1849_v19 = vmul.f32 0.03125, %v1848_v17 }
 0x7d7   : > { %2711 = vrsqrt.f32 %v1850_v16  ;;  %v2442_v16 = vld [vmem:[%s645_s10] ss:$0 sm:$0xff] }
 0x7e1   : > { %v2712_v18 = vpop.eup %2711 }
 0x7e2   : > { %v1852_v20 = vmul.f32 %v2712_v18, %v2712_v18 }
 0x7e4   : > { %v1853_v22 = vmul.f32 %v1852_v20, %v1849_v19 }
 0x7e6   : > { %v1854_v23 = vadd.f32 1e-06, %v1853_v22 }
 0x7e8   : > { %2713 = vrsqrt.f32 %v1854_v23 }
 0x7f2   : > { %v2714_v29 = vpop.eup %2713 }
 0x7f3   : > { %v1856_v31 = vmul.f32 %v2714_v29, %v2712_v18  ;;  %v2076_v29 = vld [vmem:[%s2993_s21] sm:$0xf] }
 0x7f5   : > { %v1857_v32 = vmul.f32 %v1856_v31, %v1834_v3 }
 0x7f7   : > { %v1866_v33 = vmul.f32 %v1865_v30, %v1857_v32  ;;  %v2100_v30 = vrot.slane %v2076_v29, %v2099_v28 }
 0x7f9   : > { %1867 = vst.msk [vmem:[#allocation3] sm:$0xff] %vm661_vm1, %v1866_v33 }
 0x800   : > { %v3249_v34 = vld [vmem:[#allocation3] sm:$0xff] }
 0x801   : > { %v1870_v35 = vpack.c.bf16 %v3249_v34, %v3249_v34 }
 0x803   : > { %2563 = vmatmul.mubr.msk.bf16.vlgmr.msra.gmra.mrb[24].mxu0 %vm661_vm1, %v1870_v35 }
 0x804   : > { %2587 = vmatpush3.bf16.msra.mxu0 (!%p2443_p1), %v2721_v37  ;;  %2590 = vmatprep.mubr.msk.bf16.mxu0 (!%p2443_p1), %vm2834_vm8, %v2833_v13 }
 0x805   : > { %2588 = vmatprep.subr.bf16.mxu0 (!%p2443_p1), %v2833_v13 }
 0x808   : > { %2589 = vmatpush3.bf16.msra.mxu0 (!%p2443_p1), %v2722_v11 }
 0x8d6   : > { %v1932_v45 = vpop.f32.mrb[24].mxu0 }
 0x8d7   : > { %v1933_v47 = vadd.f32 %v2430_v25, %v1932_v45  ;;  %v2564_v48 = vpop.f32.mrb[25].mxu0 }
 0x8d8   : > { %v1935_v49 = vpop.f32.mrb[26].mxu0 }
 0x8d9   : > { %v1938_v51 = vmul.f32 0.70710677, %v1933_v47  ;;  %v2565_v27 = vpop.f32.mrb[27].mxu0  ;;  %v1962_v3 = vmul.f32 0.5, %v1933_v47  ;;  %v2445_v47 = vld [vmem:[%s3412_s20] ss:$0 sm:$0xff] (!%p2443_p1) }
 0x8db   : > { %v1939_v42 = vand.u32 2147483647, %v1938_v51  ;;  %vm1959_vm7 = vcmp.lt.f32.partialorder %v1938_v51, 0.0 }
 0x8dd   : > { %v1940_v44 = vmul.f32 0.3275911, %v1939_v42  ;;  %v1953_v53 = vsub.f32 0.0, %v1939_v42 }
 0x8df   : > { %v1941_v26 = vadd.f32 1.0, %v1940_v44  ;;  %v1954_v5 = vmul.f32 %v1953_v53, %v1939_v42 }
 0x8e1   : > { %2715 = vrcp.f32 %v1941_v26  ;;  %v1955_v56 = vmul.f32 1.442695, %v1954_v5 }
 0x8e3   : > { %2717 = vpow2.f32 %v1955_v56 }
 0x8eb   : > { %v2716_v54 = vpop.eup %2715 }
 0x8ec   : > { %v1944_v55 = vmul.f32 1.0614054, %v2716_v54 }
 0x8ed   : > { %v2718_v63 = vpop.eup %2717 }
 0x8ee   : > { %v1945_v36 = vadd.f32 -1.4531521, %v1944_v55 }
 0x8f0   : > { %v1946_v57 = vmul.f32 %v2716_v54, %v1945_v36 }
 0x8f2   : > { %v1947_v58 = vadd.f32 1.4214138, %v1946_v57 }
 0x8f4   : > { %v1948_v59 = vmul.f32 %v2716_v54, %v1947_v58 }
 0x8f6   : > { %v1949_v46 = vadd.f32 -0.28449672, %v1948_v59 }
 0x8f8   : > { %v1950_v60 = vmul.f32 %v2716_v54, %v1949_v46 }
 0x8fa   : > { %v1951_v61 = vadd.f32 0.2548296, %v1950_v60 }
 0x8fc   : > { %v1952_v62 = vmul.f32 %v2716_v54, %v1951_v61 }
 0x8fe   : > { %v1957_v50 = vmul.f32 %v2718_v63, %v1952_v62 }
 0x900   : > { %v1958_v0 = vsub.f32 1.0, %v1957_v50 }
 0x902   : > { %v1960_v1 = vsub.f32 0.0, %v1958_v0 }
 0x904   : > { %v1961_v2 = vsel %vm1959_vm7, %v1960_v1, %v1958_v0 }
 0x905   : > { %v1963_v4 = vadd.f32 1.0, %v1961_v2 }
 0x907   : > { %v1964_v6 = vmul.f32 %v1963_v4, %v1962_v3 }
 0x909   : > { %v1965_v7 = vpack.c.bf16 %v1964_v6, %v1964_v6 }
 0x90b   : > { %2583 = vmatmul.mubr.bf16.vlgmr.msra.gmra.mrb[16].mxu1 %v1965_v7 }
 0x9de   : > { %v2065_v52 = vpop.f32.mrb[16].mxu1 }
 0x9df   : > { %v2071_v9 = vadd.f32 %v2065_v52, %v1966_v8  ;;  %v2584_v10 = vpop.f32.mrb[17].mxu1 }
 0x9e0   : > { %v2068_v12 = vpop.f32.mrb[18].mxu1 }
 0x9e1   : > { %2072 = vst.msk [vmem:[#allocation4] sm:$0xff] %vm661_vm1, %v2071_v9  ;;  %v2585_v14 = vpop.f32.mrb[19].mxu1 }
 0x9e8   : > { %v2078_v15 = vld [vmem:[#allocation4] sm:$0xff] }
 0x9e9   : > { %v2079_v17 = vadd.f32 %v2078_v15, %v3249_v34 }
 0x9eb   : > { %v2087_v18 = vadd.f32 %v2442_v16, %v2079_v17 }
 0x9ed   : > { %v2088_v19 = vmul.f32 %v2087_v18, %v2087_v18 }
 0x9ef   : > { %v2089_v20 = vsel %vm661_vm1, %v2088_v19, 0.0 }
 0x9f0   : > { %2090 = vadd.xlane.f32.xlu0 %v2089_v20 }
 0xa7d   : > { %v2091_v22 = vpop.xlane.xlu0 %2090 }
 0xa7e   : > { %v2093_v23 = vmul.f32 0.03125, %v2091_v22 }
 0xa80   : > { %v2094_v24 = vadd.f32 1e-06, %v2093_v23 }
 0xa82   : > { %2719 = vrsqrt.f32 %v2094_v24 }
 0xa8b   : > { %2106 = sbr.rel (%p2443_p1) target bundleno = 3086 (0xc0e), region = 88 }
 0xa8c   : > { %v2720_v31 = vpop.eup %2719 }
 0xa8d   : > { %v2096_v32 = vmul.f32 %v2720_v31, %v2087_v18 }
 0xa8f   : > { %v2101_v33 = vmul.f32 %v2100_v30, %v2096_v32 }
 0xa91   : > { %2102 = vst.msk [vmem:[#allocation2] sm:$0xff] %vm661_vm1, %v2101_v33  ;;  %v2108_v34 = vmul.f32 (!%p2443_p1), %v2101_v33, %v2101_v33 }
 0xa93   : > { %v2109_v35 = vsel %vm661_vm1, %v2108_v34, 0.0 }
 0xa94   : > { %2110 = vadd.xlane.f32.xlu0 %v2109_v35 }
 0xb21   : > { %v2111_v38 = vpop.xlane.xlu0 %2110 }
 0xb22   : > { %v2112_v39 = vmul.f32 0.03125, %v2111_v38 }
 0xb24   : > { %v2113_v40 = vadd.f32 1e-06, %v2112_v39 }
 0xb26   : > { %2723 = vrsqrt.f32 %v2113_v40 }
 0xb30   : > { %v2724_v41 = vpop.eup %2723 }
 0xb31   : > { %v2115_v21 = vmul.f32 %v2724_v41, %v2101_v33 }
 0xb33   : > { %v2122_v25 = vmul.f32 %v2444_v43, %v2115_v21 }
 0xb35   : > { %v2123_v45 = vpack.c.bf16 %v2122_v25, %v2122_v25 }
 0xb37   : > { %2591 = vmatmul.mubr.msk.bf16.vlgmr.msra.gmra.mrb[0].mxu0 %vm661_vm1, %v2123_v45 }
 0xc0a   : > { %v2184_v48 = vpop.f32.mrb[0].mxu0 }
 0xc0b   : > { %v2185_v49 = vadd.f32 %v2445_v47, %v2184_v48  ;;  %v2592_v51 = vpop.f32.mrb[1].mxu0 }
 0xc0c   : > { %v2187_v27 = vpop.f32.mrb[2].mxu0 }
 0xc0d   : > { %2190 = vst [vmem:[%s594_s22] sm:$0xff] %v2185_v49  ;;  %v2593_v42 = vpop.f32.mrb[3].mxu0 }
 0xc0e PF: > { %s3413_s23 = sld [smem:[#allocation11_spill]]  ;;  %s3416_s26 = sld [smem:[#allocation26_spill]] }
 0xc0f   : > { %s3414_s24 = sld [smem:[#allocation9_spill]]  ;;  %s2205_s27 = sshll.u32 %s594_s22, 4  ;;  %s2206_s27 = int_to_ptr.vmem [resolvable:$true] %s2205_s27 }
 0xc10   : > { %s2725_s19 = scalar_lea.vmem %s2206_s27, 128  ;;  %s2835_s10 = smov [#allocation5]  }
 0xc11   : > { %p2726_p2 = scmp.ne.s32.totalorder %s2206_s27, %s2725_s19  ;;  %s2729_s21 = sshll.u32 %s2835_s10, 4  ;;  %s2730_s21 = int_to_ptr.vmem [resolvable:$false] %s2729_s21 }
 0xc12   : > { %s2731_s18 = scalar_lea.vmem %s2730_s21, 256  ;;  %p2732_p6 = scmp.lt.s32.totalorder %s2206_s27, %s2730_s21 }
 0xc13   : > { %p2727_p4 = pnand %p2726_p2, %p2955_p3  ;;  %p2733_p7 = scmp.lt.s32.totalorder %s2731_s18, %s2725_s19 }
 0xc14   : > { %s2450_s14 = sshll.u32 %s3413_s23, 7  ;;  %s3417_s0 = smov %s3416_s26 }
 0xc15   : > { %s3306_s29 = scalar_lea.hbm %s3416_s26, %s2450_s14  ;;  %s3418_s1 = sand.u32 1, %s3414_s24  }
 0xc16   : > { %s2192_s4 = scalar_lea.sflag [#allocation6], %s3418_s1  ;;  %p2728_p5 = pneg %p2727_p4 }
 0xc17   : > { %p2734_p8 = por %p2733_p7, %p2732_p6 }
 0xc19   : > { %p2735_p10 = pnand %p2734_p8, %p2728_p5 }
 0xc1b   : > { %2738 = shalt.err (!%p2735_p10)
}
 0xc1c   : > { %s2739_s17 = scalar_lea.hbm %s3306_s29, 128  ;;  %s2743_s2 = scalar_lea.hbm %s3417_s0, 256 }
 0xc1d   : > { %p2740_p11 = scmp.ne.s32.totalorder %s3306_s29, %s2739_s17  ;;  %p2744_p0 = scmp.lt.u32.totalorder %s3306_s29, %s3417_s0 }
 0xc1e   : > { %p2745_p1 = scmp.lt.u32.totalorder %s2743_s2, %s2739_s17  ;;  %p2747_p4 = scmp.lt.u32.totalorder %s2739_s17, %s3306_s29 }
 0xc1f   : > { %p2741_p12 = pnand %p2740_p11, %p2955_p3 }
 0xc20   : > { %p2746_p2 = por %p2745_p1, %p2744_p0 }
 0xc21   : > { %p2742_p13 = pneg %p2741_p12 }
 0xc22   : > { %p2748_p5 = por %p2747_p4, %p2746_p2 }
 0xc24   : > { %p2749_p6 = pnand %p2748_p5, %p2742_p13 }
 0xc26   : > { %2752 = shalt.err (!%p2749_p6)
}
 0xc27   : > { %2594 = dma.vmem_to_hbm [thread:$0]  (%p2955_p3), %s2206_s27, 128, %s3306_s29, %s2192_s4  }
 0xc28 PF: > { %s3419_s30 = sld [smem:[#allocation14_spill]]  ;;  %s3420_s20 = sld [smem:[#allocation8_spill]] }
 0xc2e   : > { %p2600_p7 = scmp.ge.s32.totalorder %s3419_s30, 2  ;;  %s2217_s24 = sand.u32 1, %s3420_s20  }
 0xc2f   : > { %s2218_s14 = scalar_lea.sflag [#allocation6], %s2217_s24 }
 0xc30   : > { %p2597_p8 = pnand %p2600_p7, %p2965_p9 }
 0xc32   : > { %2786 = dma.done.wait (!%p2597_p8), %s2218_s14, 128  }
 0xc33   : > { %2788 = vsyncadd (!%p2597_p8), %s2218_s14, 4294967168  ;;  %s26_s15 = sadd.s32 1, %s3419_s30   ;;  %s3422_s25 = sld [smem:[#allocation9_spill]] }
 0xc34   : > { %p23_p10 = scmp.ge.s32.totalorder %s26_s15, 6   ;;  %s3423_s26 = sld [smem:[#allocation10_spill]] }
 0xc35   : > { %s3424_s27 = sld [smem:[#allocation19_spill]]  ;;  %s3425_s28 = sld [smem:[#allocation12_spill]] }
 0xc36   : > { %s3426_s29 = sld [smem:[#allocation13_spill]]  ;;  %s3427_s30 = sld [smem:[#allocation15_spill]] }
 0xc37   : > { %s3428_s14 = sld [smem:[#allocation17_spill]]  ;;  %25 = sbr.rel (!%p23_p10) target bundleno = 13 (0xd), region = 150 }
 0xc3e   :  { %2223 = vsyncpa [#allocation6], 1 }
 0xc3f   :  { %2225 = vsyncpa [#allocation6 + $0x1], 1 }

// kernel: tpu_custom_call.1
= control target key start
LH: loop header
LB: loop body
LE: loop exit
PB: predicated region body
PF: predicated region fallthrough
CT: control target
= control target key end

     0   :  { %s4451_s0 = inlined_call_operand.vmem [shape: f32[16,32], index: 0, kind: input, shape index: {}]   ;;  %s4452_s1 = inlined_call_operand.vmem [shape: f32[2,4,32], index: 1, kind: input, shape index: {}]   ;;  %s4453_s2 = inlined_call_operand.vmem [shape: bf16[2,32,96], index: 2, kind: input, shape index: {}]   ;;  %s4454_s3 = inlined_call_operand.vmem [shape: f32[2,1,96], index: 3, kind: input, shape index: {}]   ;;  %s4455_s4 = inlined_call_operand.vmem [shape: bf16[2,32,32], index: 4, kind: input, shape index: {}]   ;;  %s4456_s5 = inlined_call_operand.vmem [shape: f32[2,1,32], index: 5, kind: input, shape index: {}]   ;;  %s4457_s6 = inlined_call_operand.vmem [shape: bf16[2,32,128], index: 6, kind: input, shape index: {}]   ;;  %s4458_s7 = inlined_call_operand.vmem [shape: f32[2,1,128], index: 7, kind: input, shape index: {}]   ;;  %s4459_s8 = inlined_call_operand.vmem [shape: bf16[2,128,32], index: 8, kind: input, shape index: {}]   ;;  %s4460_s9 = inlined_call_operand.vmem [shape: f32[2,1,32], index: 9, kind: input, shape index: {}]   ;;  %s4461_s10 = inlined_call_operand.vmem [shape: f32[1,32], index: 10, kind: input, shape index: {}]   ;;  %s4462_s11 = inlined_call_operand.vmem [shape: bf16[32,128], index: 11, kind: input, shape index: {}]   ;;  %s4463_s12 = inlined_call_operand.vmem [shape: f32[1,128], index: 12, kind: input, shape index: {}]   ;;  %s4464_s13 = inlined_call_operand.hbm [shape: f32[16,128], index: 13, kind: output, shape index: {}]  }
   0x1   :  { %4479 = sst [smem:[#allocation20_spill]] %s4451_s0 }
   0x2   :  { %4480 = sst [smem:[#allocation21_spill]] %s4452_s1 }
   0x3   :  { %4481 = sst [smem:[#allocation22_spill]] %s4453_s2 }
   0x4   :  { %4482 = sst [smem:[#allocation23_spill]] %s4455_s4 }
   0x5   :  { %4483 = sst [smem:[#allocation24_spill]] %s4461_s10 }
   0x6   :  { %4484 = sst [smem:[#allocation25_spill]] %s4463_s12 }
   0x7   :  { %4485 = sst [smem:[#allocation26_spill]] %s4464_s13 }
   0x8   :  { %18 = vsyncpa [#allocation6], 0 }
   0x9   :  { %20 = vsyncpa [#allocation6 + $0x1], 0  ;;  %s3615_s25 = smov 0   ;;  %s3617_s26 = smov 0  }
   0xa   :  { %s3619_s27 = smov 0   ;;  %s3621_s28 = smov 0  }
   0xb   :  { %s3623_s29 = smov 0   ;;  %s3625_s30 = smov 0  }
   0xc   :  { %s3627_s14 = smov 0   ;;  %s3629_s15 = smov 0  }
   0xd LB: > { %4486 = sst [smem:[#allocation8_spill]] %s3499_s25  ;;  %s3103_s16 = sadd.s32 4294967295, %s3527_s15   ;;  %s3527_s15 = sphi %s3629_s15, %s26_s15   ;;  %s3523_s14 = sphi %s3627_s14, %s4530_s14   ;;  %s3519_s30 = sphi %s3625_s30, %s4529_s30   ;;  %s3515_s29 = sphi %s3623_s29, %s4528_s29   ;;  %s3511_s28 = sphi %s3621_s28, %s4527_s28   ;;  %s3507_s27 = sphi %s3619_s27, %s4526_s27   ;;  %s3503_s26 = sphi %s3617_s26, %s4525_s26   ;;  %s3499_s25 = sphi %s3615_s25, %s4524_s25  }
   0xe   : > { %4487 = sst [smem:[#allocation9_spill]] %s3503_s26  ;;  %s3104_s17 = sadd.s32 4294967294, %s3527_s15  }
   0xf   : > { %4488 = sst [smem:[#allocation10_spill]] %s3507_s27  ;;  %s41_s18 = sadd.s32 1, %s3519_s30 }
  0x10   : > { %4489 = sst [smem:[#allocation11_spill]] %s3515_s29  ;;  %p43_p0 = scmp.ge.s32.totalorder %s41_s18, 2 }
  0x11   : > { %4490 = sst [smem:[#allocation12_spill]] %s3519_s30  ;;  %s45_s19 = sadd.s32 1, %s3523_s14 }
  0x12   : > { %4491 = sst [smem:[#allocation13_spill]] %s3523_s14  ;;  %p391_p1 = scmp.ne.s32.totalorder %s3507_s27, %s3503_s26 }
  0x13   : > { %4492 = sst [smem:[#allocation14_spill]] %s3527_s15  ;;  %p392_p2 = scmp.eq.s32.totalorder %s3103_s16, 3 }
  0x14   : > { %s4532_s18 = smov (%p43_p0, %s41_s18), 0  ;;  %s4534_s19 = smov (!%p43_p0, %s45_s19), %s3523_s14 }
  0x15   : > { %4493 = sst [smem:[#allocation15_spill]] %s4532_s18  ;;  %p3664_p3 = por %p392_p2, %p391_p1 }
  0x16   : > { %p397_p4 = scmp.ne.s32.totalorder %s3503_s26, %s3499_s25  ;;  %p47_p5 = scmp.ge.s32.totalorder %s4534_s19, 2 }
  0x17   : > { %s4494_s20 = scalar_select %p3664_p3, 1, 0 }
  0x18   : > { %p398_p6 = scmp.eq.s32.totalorder %s3104_s17, 3  ;;  %p3107_p7 = scmp.ge.s32.totalorder %s3527_s15, 1 }
  0x19   : > { %4495 = sst [smem:[#allocation16_spill]] %s4494_s20  ;;  %p506_p8 = scmp.lt.s32.totalorder %s3527_s15, 5 }
  0x1a   : > { %s4536_s19 = smov (%p47_p5, %s4534_s19), 0  ;;  %p3674_p9 = por %p398_p6, %p397_p4 }
  0x1b   : > { %4496 = sst [smem:[#allocation17_spill]] %s4536_s19  ;;  %p507_p10 = pnand %p3107_p7, %p506_p8 }
  0x1c   : > { %s4497_s21 = scalar_select %p3674_p9, 1, 0 }
  0x1d   : > { %s378_s22 = ssub.s32 %s3523_s14, %s4536_s19  ;;  %s381_s23 = sadd.s32 1, %s3507_s27 }
  0x1e   : > { %4498 = sst [smem:[#allocation18_spill]] %s4497_s21  ;;  %p379_p11 = scmp.eq.s32.totalorder %s378_s22, 0 }
  0x1f   : > { %510 = sbr.rel (%p507_p10) target bundleno = 3096 (0xc18), region = 72  ;;  %s4468_s16 = sand.u32 (!%p507_p10), 1, %s3503_s26  }
  0x20   : > { %s3682_s24 = scalar_select %p379_p11, %s3507_s27, %s381_s23  }
  0x21   : > { %p595_p12 = scmp.lt.s32.totalorder (!%p507_p10), %s3515_s29, 1  ;;  %s3688_s17 = sshll.u32 (!%p507_p10), %s4468_s16, 3 }
  0x22   : > { %4499 = sst [smem:[#allocation19_spill]] %s3682_s24  ;;  %p599_p13 = scmp.lt.s32.totalorder (!%p507_p10), %s3511_s28, 1 }
  0x23   : > { %s4500_s0 = sld [smem:[#allocation20_spill]] (!%p507_p10)  ;;  %s4501_s1 = sld [smem:[#allocation21_spill]] (!%p507_p10) }
  0x24   : > { %s4502_s2 = sld [smem:[#allocation22_spill]] (!%p507_p10)  ;;  %s4503_s4 = sld [smem:[#allocation23_spill]] (!%p507_p10) }
  0x25   : > { %p3119_p0 = scmp.ne.s32.totalorder (!%p507_p10), %s3511_s28, 0 }
  0x26   : > { %s596_s18 = scalar_select %p595_p12, %s3515_s29, 1 }
  0x27   : > { %s3693_s19 = scalar_select %p599_p13, %s3511_s28, 1 }
  0x28   : > { %s3109_s22 = sshll.u32 %s596_s18, 3  ;;  %vm656_vm0 = vcmask (!%p3119_p0), 261120  }
  0x29   : > { %s598_s30 = scalar_lea.vmem %s4500_s0, %s3109_s22  ;;  %s3110_s24 = sshll.u32 %s3693_s19, 2 }
  0x2a   : > { %s3702_s21 = scalar_lea.vmem %s4501_s1, %s3110_s24  ;;  %s3159_s25 = sshll.u32 %s3693_s19, 4  ;;  %v655_v0 = vld [vmem:[%s598_s30] sm:$0xff] (!%p3119_p0) }
  0x2b   : > { %s607_s20 = scalar_lea.vmem %s4502_s2, %s3159_s25  ;;  %s3715_s14 = scalar_lea.vmem %s4503_s4, %s3159_s25  ;;  %657 = vst.msk [vmem:[#allocation2] sm:$0xff] (!%p3119_p0), %vm656_vm0, %v655_v0 }
  0x2c   : > { %s618_s27 = scalar_lea.vmem %s4456_s5, %s3693_s19  ;;  %s3724_s0 = scalar_lea.vmem %s4457_s6, %s3159_s25 }
  0x2d   : > { %s632_s1 = scalar_lea.vmem %s4458_s7, %s3693_s19  ;;  %s3162_s26 = sshll.u32 %s3693_s19, 6 }
  0x2e   : > { %s645_s10 = scalar_lea.vmem %s4460_s9, %s3693_s19  ;;  %s3738_s4 = scalar_lea.vmem %s4459_s8, %s3162_s26 }
  0x2f   : > { %s594_s22 = scalar_lea.vmem [#allocation5], %s3688_s17  ;;  %654 = sbr.rel (%p3119_p0) target bundleno = 54 (0x36), region = 80 }
  0x36 PF: > { %v658_v1 = vld [vmem:[#allocation2] sm:$0xff]  ;;  %vm661_vm1 = vcmask 261120   ;;  %v3529_v5 = vmov 0.0   ;;  %vm3530_vm2 = vmmov 0   ;;  %v3387_v6 = vld [vmem:[%s607_s20 + $0x8] sm:$0xff]   ;;  %v670_v9 = vlaneseq  ;;  %s4504_s25 = scalar_lea.vmem %s4454_s3, %s3693_s19  ;;  %s3531_s30 = smov 112  }
  0x37   : > { %v660_v2 = vmul.f32 %v658_v1, %v658_v1  ;;  %v3386_v4 = vld [vmem:[%s607_s20] sm:$0xff]   ;;  %3200 = vmatprep.subr.bf16.mxu0 %v3529_v5  ;;  %2582 = vst.msk [vmem:[#allocation4] sm:$0xff] %vm661_vm1, %v3529_v5  ;;  %3204 = vmatprep.mubr.msk.bf16.mxu0 %vm3530_vm2, %v3529_v5  ;;  %s3532_s20 = smov 120   ;;  %s3533_s23 = smov 104   ;;  %v3535_v28 = vmov 1983009808  }
  0x38   : > { %3201 = vmatpush3.bf16.msra.mxu0 %v3386_v4  ;;  %3220 = vmatprep.subr.bf16.mxu1 %v3529_v5  ;;  %v3753_v11 = vshrl.u32 %v670_v9, 7  ;;  %v659_v13 = vld [vmem:[%s3702_s21] sm:$0xf]  ;;  %s3534_s24 = smov 96   ;;  %v755_v29 = vunpack.c.l.s4 %v3535_v28  ;;  %v3536_v31 = vmov 1934713408  }
  0x39   : > { %v662_v3 = vsel %vm661_vm1, %v660_v2, 0.0  ;;  %3202 = vmatprep.subr.bf16.mxu0 %v3529_v5  ;;  %3222 = vmatprep.mubr.msk.bf16.mxu1 %vm3530_vm2, %v3529_v5  ;;  %v3120_v19 = vld [vmem:[%s4504_s25] ss:$0 sm:$0xff]  ;;  %v787_v32 = vunpack.c.l.s4 %v3536_v31  ;;  %vm1229_vm3 = vcmask 1041409   ;;  %vm1232_vm4 = vcmask 1042434   ;;  %s3537_s16 = smov 64  }
  0x3a   : > { %663 = vadd.xlane.f32.xlu0 %v662_v3  ;;  %v3756_v12 = vsub.s32 0, %v3753_v11  ;;  %v756_v30 = vunpack.c.0.s8 %v755_v29  ;;  %vm1235_vm5 = vcmask 1043459   ;;  %vm1238_vm6 = vcmask 1044484   ;;  %s3540_s13 = smov 8   ;;  %s3541_s15 = smov 24  }
  0x3b   : > { %v788_v36 = vunpack.c.0.s8 %v787_v32  ;;  %vm1241_vm7 = vcmask 1045509   ;;  %vm1244_vm8 = vcmask 1046534   ;;  %vm1247_vm9 = vcmask 1047559   ;;  %p3149_p1 = scmp.ne.s32.totalorder %s3511_s28, 1 }
  0x3c   : > { %3203 = vmatpush3.bf16.msra.mxu0 %v3387_v6  ;;  %v673_v14 = vrot.slane %v659_v13, %v3756_v12  ;;  %v3790_v34 = vsub.s32 %v756_v30, %v3753_v11  ;;  %vm1281_vm10 = vcmask 64512   ;;  %vm1766_vm11 = vcmask 1043456   ;;  %s4513_s12 = sld [smem:[#allocation24_spill]] (!%p3149_p1) }
  0x3d   : > { %3208 = vmatprep.subr.bf16.mxu0 %v3529_v5  ;;  %v3797_v39 = vsub.s32 %v788_v36, %v3753_v11  ;;  %vm2369_vm12 = vcmask 1040384   ;;  %vm2378_vm13 = vcmask 1041408   ;;  %vm2387_vm14 = vcmask 1042432  }
  0x3e   : > { %vm2477_vm15 = vcmask 130048   ;;  %vm2479_vm0 = vcmask 195584  }
  0xc7   : > { %v664_v7 = vpop.xlane.xlu0 %663 }
  0xc8   : > { %v666_v8 = vmul.f32 0.03125, %v664_v7 }
  0xca   : > { %v667_v10 = vadd.f32 1e-06, %v666_v8 }
  0xcc   : > { %3400 = vrsqrt.f32 %v667_v10 }
  0xd6   : > { %v3401_v15 = vpop.eup %3400 }
  0xd7   : > { %v669_v16 = vmul.f32 %v3401_v15, %v658_v1 }
  0xd9   : > { %v3760_v17 = vmul.f32 %v673_v14, %v669_v16 }
  0xdb   : > { %v675_v18 = vpack.c.bf16 %v3760_v17, %v3760_v17 }
  0xdd   : > { %3205 = vmatmul.mubr.msk.bf16.vlgmr.msra.gmra.mrb[0].mxu0 %vm661_vm1, %v675_v18 }
  0xde   : > { %3210 = vmatprep.mubr.msk.bf16.mxu0 %vm3530_vm2, %v3529_v5 }
 0x1b0   : > { %v736_v20 = vpop.f32.mrb[0].mxu0 }
 0x1b1   : > { %v3772_v21 = vadd.f32 %v3120_v19, %v736_v20  ;;  %v3206_v22 = vpop.f32.mrb[1].mxu0 }
 0x1b2   : > { %v739_v23 = vpop.f32.mrb[2].mxu0 }
 0x1b3   : > { %746 = vrot.lane.b32.xlu1 %v3772_v21, %s3531_s30  ;;  %743 = vrot.lane.b32.xlu0 %v3772_v21, %s3532_s20  ;;  %v3207_v24 = vpop.f32.mrb[3].mxu0  ;;  %s4514_s20 = sld [smem:[#allocation25_spill]] (!%p3149_p1) }
 0x1b7   : > { %749 = vrot.lane.b32.xlu1 %v3772_v21, %s3533_s23 }
 0x1bb   : > { %820 = vrot.lane.b32.xlu1 %v3772_v21, %s3534_s24 }
 0x225   : > { %v3778_v25 = vpop.permute.xlu0 %743  ;;  %v3781_v26 = vpop.permute.xlu1 %746 }
 0x226   : > { %822 = vrot.lane.b32.xlu1 %v3778_v25, %s3534_s24  ;;  %v752_v35 = vcombine.low %v3772_v21, %v3781_v26  ;;  %v753_v43 = vcombine.high %v3772_v21, %v3781_v26 }
 0x228   : > { %v760_v38 = vrot.slane %v752_v35, %v3790_v34  ;;  %v767_v47 = vrot.slane %v753_v43, %v3790_v34 }
 0x229   : > { %v3784_v27 = vpop.permute.xlu1 %749 }
 0x22a   : > { %824 = vrot.lane.b32.xlu1 %v3781_v26, %s3534_s24  ;;  %v768_v33 = vcombine.low %v3778_v25, %v3784_v27  ;;  %v769_v42 = vcombine.high %v3778_v25, %v3784_v27 }
 0x22c   : > { %v776_v37 = vrot.slane %v768_v33, %v3790_v34  ;;  %v783_v46 = vrot.slane %v769_v42, %v3790_v34 }
 0x22e   : > { %826 = vrot.lane.b32.xlu1 %v3784_v27, %s3534_s24  ;;  %v784_v40 = vcombine.low %v760_v38, %v776_v37  ;;  %v785_v44 = vcombine.high %v760_v38, %v776_v37  ;;  %v800_v51 = vcombine.low %v767_v47, %v783_v46  ;;  %v801_v52 = vcombine.high %v767_v47, %v783_v46 }
 0x230   : > { %v3800_v41 = vrot.slane %v784_v40, %v3797_v39  ;;  %v3813_v48 = vrot.slane %v785_v44, %v3797_v39  ;;  %v3823_v56 = vrot.slane %v800_v51, %v3797_v39  ;;  %v3832_v61 = vrot.slane %v801_v52, %v3797_v39 }
 0x232   : > { %v3808_v45 = vcombine.high %v3800_v41, %v3529_v5  ;;  %v3820_v53 = vcombine.high %v3813_v48, %v3529_v5  ;;  %v1006_v57 = vrot.slane %v3813_v48, 2  ;;  %v1150_v58 = vpack.c.bf16 %v3813_v48, %v3813_v48 }
 0x233   : > { %v1004_v59 = vrot.slane %v3800_v41, 2  ;;  %v1148_v60 = vpack.c.bf16 %v3800_v41, %v3800_v41  ;;  %v3839_v2 = vcombine.high %v3823_v56, %v3529_v5  ;;  %v3843_v8 = vcombine.high %v3832_v61, %v3529_v5 }
 0x234   : > { %v1149_v49 = vpack.c.bf16 %v3808_v45, %v3808_v45  ;;  %v1005_v50 = vrot.slane %v3808_v45, 2  ;;  %v1151_v62 = vpack.c.bf16 %v3820_v53, %v3820_v53  ;;  %v1007_v0 = vrot.slane %v3820_v53, 2 }
 0x235   : > { %v1222_v3 = vunpack.c.l.b16 %v1150_v58  ;;  %v1166_v4 = vpack.c.bf16 %v1006_v57, %v1006_v57  ;;  %v1164_v6 = vpack.c.bf16 %v1004_v59, %v1004_v59  ;;  %v1220_v7 = vunpack.c.l.b16 %v1148_v60 }
 0x236   : > { %v1221_v54 = vunpack.c.l.b16 %v1149_v49  ;;  %v1165_v55 = vpack.c.bf16 %v1005_v50, %v1005_v50  ;;  %v1152_v9 = vpack.c.bf16 %v3823_v56, %v3823_v56  ;;  %v1008_v10 = vrot.slane %v3823_v56, 2 }
 0x237   : > { %v1223_v13 = vunpack.c.l.b16 %v1151_v62  ;;  %v1167_v15 = vpack.c.bf16 %v1007_v0, %v1007_v0  ;;  %v988_v18 = vrot.slane %v3800_v41, 1  ;;  %v1231_v19 = vrot.slane %v1222_v3, 6 }
 0x238   : > { %v1228_v63 = vrot.slane %v1221_v54, 7  ;;  %v1445_v1 = vunpack.c.l.b16 %v1165_v55  ;;  %v1153_v20 = vpack.c.bf16 %v3839_v2, %v3839_v2  ;;  %v1446_v22 = vunpack.c.l.b16 %v1166_v4 }
 0x239   : > { %v990_v23 = vrot.slane %v3813_v48, 1  ;;  %v1444_v24 = vunpack.c.l.b16 %v1164_v6  ;;  %v1009_v28 = vrot.slane %v3839_v2, 2  ;;  %v989_v29 = vrot.slane %v3808_v45, 1 }
 0x23a   : > { %v1230_v14 = vsel %vm1229_vm3, %v1228_v63, %v1220_v7  ;;  %v1452_v16 = vrot.slane %v1445_v1, 7  ;;  %v1020_v30 = vrot.slane %v3800_v41, 3  ;;  %v1224_v31 = vunpack.c.l.b16 %v1152_v9  ;;  %v3873_v9 = vpop.permute.xlu1 %820 }
 0x23b   : > { %v1233_v32 = vsel %vm1232_vm4, %v1231_v19, %v1230_v14  ;;  %v1168_v33 = vpack.c.bf16 %v1008_v10, %v1008_v10  ;;  %v1022_v35 = vrot.slane %v3813_v48, 3  ;;  %v1234_v36 = vrot.slane %v1223_v13, 5 }
 0x23c   : > { %v1447_v37 = vunpack.c.l.b16 %v1167_v15  ;;  %v1453_v38 = vsel %vm1229_vm3, %v1452_v16, %v1444_v24  ;;  %v1154_v40 = vpack.c.bf16 %v3832_v61, %v3832_v61  ;;  %v1225_v42 = vunpack.c.l.b16 %v1153_v20 }
 0x23d   : > { %v1010_v43 = vrot.slane %v3832_v61, 2  ;;  %v1454_v44 = vrot.slane %v1446_v22, 6  ;;  %v1156_v46 = vpack.c.bf16 %v988_v18, %v988_v18  ;;  %v1236_v41 = vsel %vm1235_vm5, %v1234_v36, %v1233_v32 }
 0x23e   : > { %v1169_v47 = vpack.c.bf16 %v1009_v28, %v1009_v28  ;;  %v1157_v49 = vpack.c.bf16 %v989_v29, %v989_v29  ;;  %v1158_v50 = vpack.c.bf16 %v990_v23, %v990_v23  ;;  %v1237_v51 = vrot.slane %v1224_v31, 4 }
 0x23f   : > { %v1448_v48 = vunpack.c.l.b16 %v1168_v33  ;;  %v1455_v52 = vsel %vm1232_vm4, %v1454_v44, %v1453_v38  ;;  %v1174_v54 = vpack.c.bf16 %v1022_v35, %v1022_v35  ;;  %v1155_v55 = vpack.c.bf16 %v3843_v8, %v3843_v8 }
 0x240   : > { %v1011_v57 = vrot.slane %v3843_v8, 2  ;;  %v1456_v58 = vrot.slane %v1447_v37, 5  ;;  %v1226_v59 = vunpack.c.l.b16 %v1154_v40  ;;  %v1239_v60 = vsel %vm1238_vm6, %v1237_v51, %v1236_v41 }
 0x241   : > { %v1240_v62 = vrot.slane %v1225_v42, 3  ;;  %v1170_v63 = vpack.c.bf16 %v1010_v43, %v1010_v43  ;;  %v1449_v0 = vunpack.c.l.b16 %v1169_v47  ;;  %v991_v3 = vrot.slane %v3820_v53, 1 }
 0x242   : > { %v1457_v1 = vsel %vm1235_vm5, %v1456_v58, %v1455_v52  ;;  %v1337_v4 = vunpack.c.l.b16 %v1157_v49  ;;  %v992_v6 = vrot.slane %v3823_v56, 1  ;;  %v3871_v7 = vpack.c.bf16 %v1020_v30, %v1020_v30 }
 0x243   : > { %v1458_v10 = vrot.slane %v1448_v48, 4  ;;  %v1336_v13 = vunpack.c.l.b16 %v1156_v46  ;;  %v1227_v14 = vunpack.c.l.b16 %v1155_v55  ;;  %v1242_v15 = vsel %vm1241_vm7, %v1240_v62, %v1239_v60 }
 0x244   : > { %v1171_v16 = vpack.c.bf16 %v1011_v57, %v1011_v57  ;;  %v1338_v18 = vunpack.c.l.b16 %v1158_v50  ;;  %v1243_v19 = vrot.slane %v1226_v59, 2  ;;  %v1450_v20 = vunpack.c.l.b16 %v1170_v63 }
 0x245   : > { %v1459_v22 = vsel %vm1238_vm6, %v1458_v10, %v1457_v1  ;;  %v1554_v23 = vunpack.c.l.b16 %v1174_v54  ;;  %v1460_v24 = vrot.slane %v1449_v0, 3  ;;  %v1159_v28 = vpack.c.bf16 %v991_v3, %v991_v3 }
 0x246   : > { %v1344_v29 = vrot.slane %v1337_v4, 7  ;;  %v1245_v31 = vsel %vm1244_vm8, %v1243_v19, %v1242_v15  ;;  %v993_v32 = vrot.slane %v3839_v2, 1  ;;  %v994_v33 = vrot.slane %v3832_v61, 1 }
 0x247   : > { %v1021_v35 = vrot.slane %v3808_v45, 3  ;;  %v1246_v36 = vrot.slane %v1227_v14, 1  ;;  %v1451_v37 = vunpack.c.l.b16 %v1171_v16  ;;  %v1461_v38 = vsel %vm1241_vm7, %v1460_v24, %v1459_v22 }
 0x248   : > { %v995_v40 = vrot.slane %v3843_v8, 1  ;;  %v1024_v42 = vrot.slane %v3823_v56, 3  ;;  %v1462_v43 = vrot.slane %v1450_v20, 2  ;;  %v1160_v44 = vpack.c.bf16 %v992_v6, %v992_v6 }
 0x249   : > { %v1346_v46 = vrot.slane %v1338_v18, 6  ;;  %v3885_v41 = vsel %vm1247_vm9, %v1246_v36, %v1245_v31  ;;  %v1339_v47 = vunpack.c.l.b16 %v1159_v28  ;;  %v1345_v49 = vsel %vm1229_vm3, %v1344_v29, %v1336_v13 }
 0x24a   : > { %v1463_v45 = vsel %vm1244_vm8, %v1462_v43, %v1461_v38  ;;  %v1161_v51 = vpack.c.bf16 %v993_v32, %v993_v32  ;;  %v1162_v48 = vpack.c.bf16 %v994_v33, %v994_v33  ;;  %v1173_v52 = vpack.c.bf16 %v1021_v35, %v1021_v35 }
 0x24b   : > { %v1552_v54 = vunpack.c.l.b16 %v3871_v7  ;;  %v3890_v55 = vrot.slane %v1554_v23, 6  ;;  %v1464_v56 = vrot.slane %v1451_v37, 1  ;;  %v3892_v57 = vpack.c.bf16 %v995_v40, %v995_v40 }
 0x24c   : > { %v1249_v58 = vpack.c.b16 %v3885_v41, %v3885_v41  ;;  %v1340_v59 = vunpack.c.l.b16 %v1160_v44  ;;  %v1347_v60 = vsel %vm1232_vm4, %v1346_v46, %v1345_v49  ;;  %v1023_v62 = vrot.slane %v3820_v53, 3 }
 0x24d   : > { %v3901_v1 = vsel %vm1247_vm9, %v1464_v56, %v1463_v45  ;;  %v1348_v3 = vrot.slane %v1339_v47, 5  ;;  %v1341_v6 = vunpack.c.l.b16 %v1161_v51  ;;  %v1342_v7 = vunpack.c.l.b16 %v1162_v48 }
 0x24e   : > { %v1025_v10 = vrot.slane %v3839_v2, 3  ;;  %v1553_v13 = vunpack.c.l.b16 %v1173_v52  ;;  %v1026_v19 = vrot.slane %v3832_v61, 3  ;;  %v3909_v20 = vpack.c.bf16 %v1023_v62, %v1023_v62 }
 0x24f   : > { %v1349_v53 = vsel %vm1235_vm5, %v1348_v3, %v1347_v60  ;;  %v3916_v29 = vpack.c.bf16 %v1024_v42, %v1024_v42  ;;  %v1352_v36 = vrot.slane %v1341_v6, 3  ;;  %v3920_v37 = vrot.slane %v1342_v7, 2 }
 0x250   : > { %v1560_v31 = vrot.slane %v1553_v13, 7  ;;  %v3923_v40 = vpack.c.bf16 %v1026_v19, %v1026_v19 }
 0x252   : > { %v3946_v56 = vsel %vm1229_vm3, %v1560_v31, %v1552_v54 }
 0x298   : > { %v823_v30 = vpop.permute.xlu1 %822 }
 0x29c   : > { %v825_v50 = vpop.permute.xlu1 %824 }
 0x29d   : > { %v832_v63 = vcombine.low %v3873_v9, %v825_v50  ;;  %v833_v0 = vcombine.high %v3873_v9, %v825_v50  ;;  %v1350_v9 = vrot.slane %v1340_v59, 4 }
 0x29f   : > { %v840_v22 = vrot.slane %v832_v63, %v3790_v34  ;;  %v847_v23 = vrot.slane %v833_v0, %v3790_v34  ;;  %v1351_v28 = vsel %vm1238_vm6, %v1350_v9, %v1349_v53 }
 0x2a0   : > { %v827_v4 = vpop.permute.xlu1 %826  ;;  %v3935_v49 = vsel %vm1241_vm7, %v1352_v36, %v1351_v28 }
 0x2a1   : > { %v848_v14 = vcombine.low %v823_v30, %v827_v4  ;;  %v849_v15 = vcombine.high %v823_v30, %v827_v4  ;;  %v3918_v30 = vpack.c.bf16 %v1025_v10, %v1025_v10 }
 0x2a3   : > { %v856_v2 = vrot.slane %v848_v14, %v3790_v34  ;;  %v863_v24 = vrot.slane %v849_v15, %v3790_v34 }
 0x2a5   : > { %v864_v32 = vcombine.low %v840_v22, %v856_v2  ;;  %v865_v33 = vcombine.high %v840_v22, %v856_v2  ;;  %v880_v61 = vcombine.low %v847_v23, %v863_v24  ;;  %v881_v35 = vcombine.high %v847_v23, %v863_v24 }
 0x2a7   : > { %v872_v43 = vrot.slane %v864_v32, %v3797_v39  ;;  %v879_v44 = vrot.slane %v865_v33, %v3797_v39  ;;  %v3928_v42 = vrot.slane %v880_v61, %v3797_v39  ;;  %v3932_v47 = vrot.slane %v881_v35, %v3797_v39 }
 0x2a9   : > { %v3940_v51 = vcombine.high %v872_v43, %v3529_v5  ;;  %v3943_v48 = vcombine.high %v879_v44, %v3529_v5  ;;  %v1044_v52 = vrot.slane %v872_v43, 1  ;;  %v1046_v59 = vrot.slane %v879_v44, 1 }
 0x2aa   : > { %v1060_v60 = vrot.slane %v872_v43, 2  ;;  %v1076_v62 = vrot.slane %v872_v43, 3  ;;  %v1078_v63 = vrot.slane %v879_v44, 3  ;;  %v3950_v0 = vcombine.high %v3928_v42, %v3529_v5 }
 0x2ab   : > { %v1180_v3 = vpack.c.bf16 %v872_v43, %v872_v43  ;;  %v1182_v4 = vpack.c.bf16 %v879_v44, %v879_v44  ;;  %v3952_v6 = vpack.c.bf16 %v1044_v52, %v1044_v52  ;;  %v3954_v7 = vpack.c.bf16 %v1046_v59, %v1046_v59 }
 0x2ac   : > { %v3956_v10 = vpack.c.bf16 %v1060_v60, %v1060_v60  ;;  %v3958_v13 = vpack.c.bf16 %v1078_v63, %v1078_v63  ;;  %v3962_v54 = vcombine.high %v3932_v47, %v3529_v5  ;;  %v3964_v14 = vpack.c.bf16 %v1076_v62, %v1076_v62 }
 0x2ad   : > { %v1258_v15 = vunpack.c.l.b16 %v1180_v3  ;;  %v1260_v53 = vunpack.c.l.b16 %v1182_v4  ;;  %v1181_v9 = vpack.c.bf16 %v3940_v51, %v3940_v51  ;;  %v1369_v22 = vunpack.c.l.b16 %v3954_v7 }
 0x2ae   : > { %v1183_v2 = vpack.c.bf16 %v3943_v48, %v3943_v48  ;;  %v1184_v28 = vpack.c.bf16 %v3928_v42, %v3928_v42  ;;  %v1185_v31 = vpack.c.bf16 %v3950_v0, %v3950_v0  ;;  %v1186_v32 = vpack.c.bf16 %v3932_v47, %v3932_v47 }
 0x2af   : > { %v1268_v24 = vrot.slane %v1260_v53, 6  ;;  %v1187_v33 = vpack.c.bf16 %v3962_v54, %v3962_v54  ;;  %v1259_v61 = vunpack.c.l.b16 %v1181_v9  ;;  %v1061_v36 = vrot.slane %v3940_v51, 2 }
 0x2b0   : > { %v1261_v35 = vunpack.c.l.b16 %v1183_v2  ;;  %v1262_v43 = vunpack.c.l.b16 %v1184_v28  ;;  %v1263_v52 = vunpack.c.l.b16 %v1185_v31  ;;  %v1264_v59 = vunpack.c.l.b16 %v1186_v32 }
 0x2b1   : > { %v1062_v60 = vrot.slane %v879_v44, 2  ;;  %v1265_v62 = vunpack.c.l.b16 %v1187_v33  ;;  %v1266_v63 = vrot.slane %v1259_v61, 7  ;;  %v1063_v4 = vrot.slane %v3943_v48, 2 }
 0x2b2   : > { %v1270_v3 = vrot.slane %v1261_v35, 5  ;;  %v1272_v53 = vrot.slane %v1262_v43, 4  ;;  %v1274_v45 = vrot.slane %v1263_v52, 3  ;;  %v1276_v38 = vrot.slane %v1264_v59, 2 }
 0x2b3   : > { %v1064_v16 = vrot.slane %v3928_v42, 2  ;;  %v1267_v9 = vsel %vm1229_vm3, %v1266_v63, %v1258_v15  ;;  %v1278_v2 = vrot.slane %v1265_v62, 1  ;;  %v1065_v50 = vrot.slane %v3950_v0, 2 }
 0x2b4   : > { %v1066_v28 = vrot.slane %v3932_v47, 2  ;;  %v1269_v44 = vsel %vm1232_vm4, %v1268_v24, %v1267_v9  ;;  %v1067_v31 = vrot.slane %v3962_v54, 2  ;;  %v1197_v32 = vpack.c.bf16 %v1061_v36, %v1061_v36 }
 0x2b5   : > { %v1198_v33 = vpack.c.bf16 %v1062_v60, %v1062_v60  ;;  %v1271_v61 = vsel %vm1235_vm5, %v1270_v3, %v1269_v44  ;;  %v1199_v35 = vpack.c.bf16 %v1063_v4, %v1063_v4  ;;  %v1200_v43 = vpack.c.bf16 %v1064_v16, %v1064_v16 }
 0x2b6   : > { %v1201_v52 = vpack.c.bf16 %v1065_v50, %v1065_v50  ;;  %v1273_v59 = vsel %vm1238_vm6, %v1272_v53, %v1271_v61  ;;  %v1202_v18 = vpack.c.bf16 %v1066_v28, %v1066_v28  ;;  %v1203_v15 = vpack.c.bf16 %v1067_v31, %v1067_v31 }
 0x2b7   : > { %v1475_v62 = vunpack.c.l.b16 %v3956_v10  ;;  %v1275_v63 = vsel %vm1241_vm7, %v1274_v45, %v1273_v59  ;;  %v1476_v23 = vunpack.c.l.b16 %v1197_v32  ;;  %v1477_v46 = vunpack.c.l.b16 %v1198_v33 }
 0x2b8   : > { %v1478_v24 = vunpack.c.l.b16 %v1199_v35  ;;  %v1277_v9 = vsel %vm1244_vm8, %v1276_v38, %v1275_v63  ;;  %v1479_v36 = vunpack.c.l.b16 %v1200_v43  ;;  %v1480_v60 = vunpack.c.l.b16 %v1201_v52 }
 0x2b9   : > { %v1481_v19 = vunpack.c.l.b16 %v1202_v18  ;;  %v1279_v3 = vsel %vm1247_vm9, %v1278_v2, %v1277_v9  ;;  %v1482_v16 = vunpack.c.l.b16 %v1203_v15  ;;  %v1483_v50 = vrot.slane %v1476_v23, 7 }
 0x2ba   : > { %v1485_v4 = vrot.slane %v1477_v46, 6  ;;  %v1280_v53 = vpack.c.b16 %v1279_v3, %v1279_v3  ;;  %v1487_v28 = vrot.slane %v1478_v24, 5  ;;  %v1489_v44 = vrot.slane %v1479_v36, 4 }
 0x2bb   : > { %v1491_v31 = vrot.slane %v1480_v60, 3  ;;  %v1484_v10 = vsel %vm1229_vm3, %v1483_v50, %v1475_v62  ;;  %v1493_v45 = vrot.slane %v1481_v19, 2  ;;  %v1495_v32 = vrot.slane %v1482_v16, 1 }
 0x2bc   : > { %v1045_v33 = vrot.slane %v3940_v51, 1  ;;  %v1286_v38 = vsel %vm1281_vm10, %v1280_v53, 0  ;;  %v1486_v61 = vsel %vm1232_vm4, %v1485_v4, %v1484_v10  ;;  %v1047_v18 = vrot.slane %v3943_v48, 1 }
 0x2bd   : > { %v1048_v2 = vrot.slane %v3928_v42, 1  ;;  %3209 = vmatpush3.bf16.xpose.msra.mxu0 %v1286_v38  ;;  %v1488_v46 = vsel %vm1235_vm5, %v1487_v28, %v1486_v61  ;;  %v1049_v23 = vrot.slane %v3950_v0, 1  ;;  %v1050_v35 = vrot.slane %v3932_v47, 1 }
 0x2be   : > { %v1051_v19 = vrot.slane %v3962_v54, 1  ;;  %v1490_v43 = vsel %vm1238_vm6, %v1489_v44, %v1488_v46  ;;  %3214 = vmatprep.subr.bf16.mxu0 %v3529_v5  ;;  %v1189_v52 = vpack.c.bf16 %v1045_v33, %v1045_v33  ;;  %v1191_v59 = vpack.c.bf16 %v1047_v18, %v1047_v18 }
 0x2bf   : > { %v1192_v15 = vpack.c.bf16 %v1048_v2, %v1048_v2  ;;  %v1492_v62 = vsel %vm1241_vm7, %v1491_v31, %v1490_v43  ;;  %v1193_v63 = vpack.c.bf16 %v1049_v23, %v1049_v23  ;;  %v1194_v24 = vpack.c.bf16 %v1050_v35, %v1050_v35 }
 0x2c0   : > { %v1195_v9 = vpack.c.bf16 %v1051_v19, %v1051_v19  ;;  %v1494_v36 = vsel %vm1244_vm8, %v1493_v45, %v1492_v62  ;;  %v1368_v60 = vunpack.c.l.b16 %v1189_v52  ;;  %v1370_v3 = vunpack.c.l.b16 %v1191_v59 }
 0x2c1   : > { %v1371_v16 = vunpack.c.l.b16 %v1192_v15  ;;  %v1496_v50 = vsel %vm1247_vm9, %v1495_v32, %v1494_v36  ;;  %v1372_v4 = vunpack.c.l.b16 %v1193_v63  ;;  %v1373_v53 = vunpack.c.l.b16 %v1194_v24 }
 0x2c2   : > { %v1374_v28 = vunpack.c.l.b16 %v1195_v9  ;;  %v1497_v44 = vpack.c.b16 %v1496_v50, %v1496_v50  ;;  %v1375_v10 = vrot.slane %v1368_v60, 7  ;;  %v1377_v33 = vrot.slane %v1369_v22, 6 }
 0x2c3   : > { %v1379_v38 = vrot.slane %v1370_v3, 5  ;;  %v1381_v31 = vrot.slane %v1371_v16, 4  ;;  %v1383_v61 = vrot.slane %v1372_v4, 3  ;;  %v1385_v18 = vrot.slane %v1373_v53, 2 }
 0x2c4   : > { %v1387_v2 = vrot.slane %v1374_v28, 1  ;;  %v1502_v45 = vsel %vm1281_vm10, %v1497_v44, 0  ;;  %3211 = vmatmul.mubr.msk.bf16.vlgmr.msra.gmra.mrb[4].mxu0 %vm1281_vm10, %v1249_v58  ;;  %v4505_v32 = vunpack.c.l.b16 %v3952_v6  ;;  %v1077_v23 = vrot.slane %v3940_v51, 3 }
 0x2c5   : > { %v1079_v7 = vrot.slane %v3943_v48, 3  ;;  %3221 = vmatpush3.bf16.xpose.msra.mxu1 %v1502_v45  ;;  %3216 = vmatprep.mubr.msk.bf16.mxu0 %vm3530_vm2, %v3529_v5  ;;  %v1080_v35 = vrot.slane %v3928_v42, 3  ;;  %v1081_v41 = vrot.slane %v3950_v0, 3  ;;  %v1082_v58 = vrot.slane %v3932_v47, 3 }
 0x2c6   : > { %v1376_v46 = vsel %vm1229_vm3, %v1375_v10, %v4505_v32  ;;  %v1083_v19 = vrot.slane %v3962_v54, 3  ;;  %v1205_v43 = vpack.c.bf16 %v1077_v23, %v1077_v23  ;;  %3232 = vmatprep.subr.bf16.mxu1 %v3529_v5  ;;  %v1563_v54 = vsel %vm1232_vm4, %v3890_v55, %v3946_v56 }
 0x2c7   : > { %v1378_v22 = vsel %vm1232_vm4, %v1377_v33, %v1376_v46  ;;  %v1207_v51 = vpack.c.bf16 %v1079_v7, %v1079_v7  ;;  %v1208_v52 = vpack.c.bf16 %v1080_v35, %v1080_v35  ;;  %v1209_v59 = vpack.c.bf16 %v1081_v41, %v1081_v41 }
 0x2c8   : > { %v1380_v6 = vsel %vm1235_vm5, %v1379_v38, %v1378_v22  ;;  %v1210_v15 = vpack.c.bf16 %v1082_v58, %v1082_v58  ;;  %v1211_v42 = vpack.c.bf16 %v1083_v19, %v1083_v19  ;;  %v1584_v63 = vunpack.c.l.b16 %v1205_v43 }
 0x2c9   : > { %v1382_v48 = vsel %vm1238_vm6, %v1381_v31, %v1380_v6  ;;  %v1586_v0 = vunpack.c.l.b16 %v1207_v51  ;;  %v1587_v24 = vunpack.c.l.b16 %v1208_v52  ;;  %v4506_v9 = vunpack.c.l.b16 %v3909_v20 }
 0x2ca   : > { %v1384_v62 = vsel %vm1241_vm7, %v1383_v61, %v1382_v48  ;;  %v1583_v60 = vunpack.c.l.b16 %v3964_v14  ;;  %v1588_v16 = vunpack.c.l.b16 %v1209_v59  ;;  %v1591_v50 = vrot.slane %v1584_v63, 7 }
 0x2cb   : > { %v1386_v47 = vsel %vm1244_vm8, %v1385_v18, %v1384_v62  ;;  %v1564_v36 = vrot.slane %v4506_v9, 5  ;;  %v1355_v53 = vsel %vm1244_vm8, %v3920_v37, %v3935_v49  ;;  %v1589_v28 = vunpack.c.l.b16 %v1210_v15 }
 0x2cc   : > { %v1388_v3 = vsel %vm1247_vm9, %v1387_v2, %v1386_v47  ;;  %v4507_v44 = vunpack.c.l.b16 %v3958_v13  ;;  %v4508_v55 = vpack.c.b16 %v3901_v1, %v3901_v1  ;;  %v1590_v20 = vunpack.c.l.b16 %v1211_v42 }
 0x2cd   : > { %v1389_v4 = vpack.c.b16 %v1388_v3, %v1388_v3  ;;  %v1592_v56 = vsel %vm1229_vm3, %v1591_v50, %v1583_v60  ;;  %v1595_v14 = vrot.slane %v1586_v0, 5  ;;  %v1565_v33 = vsel %vm1235_vm5, %v1564_v36, %v1563_v54 }
 0x2ce   : > { %v1593_v10 = vrot.slane %v4507_v44, 6  ;;  %3223 = vmatmul.mubr.msk.bf16.vlgmr.msra.gmra.mrb[0].mxu1 %vm1281_vm10, %v4508_v55  ;;  %v1597_v37 = vrot.slane %v1587_v24, 4  ;;  %v4509_v49 = vunpack.c.l.b16 %v3916_v29  ;;  %v4510_v1 = vunpack.c.l.b16 %v3892_v57 }
 0x2cf   : > { %v1394_v38 = vsel %vm1281_vm10, %v1389_v4, 0  ;;  %3234 = vmatprep.mubr.msk.bf16.mxu1 %vm3530_vm2, %v3529_v5  ;;  %v1599_v2 = vrot.slane %v1588_v16, 3  ;;  %v4511_v45 = vrot.slane %v3843_v8, 3  ;;  %v1601_v29 = vrot.slane %v1589_v28, 2 }
 0x2d0   : > { %v1594_v31 = vsel %vm1232_vm4, %v1593_v10, %v1592_v56  ;;  %v1566_v13 = vrot.slane %v4509_v49, 4  ;;  %3215 = vmatpush3.bf16.xpose.msra.mxu0 %v1394_v38  ;;  %v1356_v61 = vrot.slane %v4510_v1, 1  ;;  %v1558_v23 = vunpack.c.l.b16 %v3923_v40 }
 0x2d1   : > { %v1596_v18 = vsel %vm1235_vm5, %v1595_v14, %v1594_v31  ;;  %v1179_v32 = vpack.c.bf16 %v4511_v45, %v4511_v45  ;;  %3226 = vmatprep.subr.bf16.mxu0 %v3529_v5  ;;  %v1603_v35 = vrot.slane %v1590_v20, 1  ;;  %v4512_v41 = vunpack.c.l.b16 %v3918_v30 }
 0x2d2   : > { %v1598_v46 = vsel %vm1238_vm6, %v1597_v37, %v1596_v18  ;;  %v1567_v7 = vsel %vm1238_vm6, %v1566_v13, %v1565_v33  ;;  %v1357_v22 = vsel %vm1247_vm9, %v1356_v61, %v1355_v53  ;;  %v1570_v40 = vrot.slane %v1558_v23, 2 }
 0x2d3   : > { %v1600_v57 = vsel %vm1241_vm7, %v1599_v2, %v1598_v46  ;;  %v1568_v58 = vrot.slane %v4512_v41, 3  ;;  %v1559_v19 = vunpack.c.l.b16 %v1179_v32  ;;  %v1358_v51 = vpack.c.b16 %v1357_v22, %v1357_v22 }
 0x2d4   : > { %v1602_v8 = vsel %vm1244_vm8, %v1601_v29, %v1600_v57 }
 0x2d5   : > { %v1604_v6 = vsel %vm1247_vm9, %v1603_v35, %v1602_v8  ;;  %v1569_v43 = vsel %vm1241_vm7, %v1568_v58, %v1567_v7  ;;  %v1572_v30 = vrot.slane %v1559_v19, 1 }
 0x2d6   : > { %v1605_v48 = vpack.c.b16 %v1604_v6, %v1604_v6  ;;  %v1571_v59 = vsel %vm1244_vm8, %v1570_v40, %v1569_v43 }
 0x2d7   : > { %3217 = vmatmul.mubr.msk.bf16.vlgmr.msra.gmra.mrb[8].mxu0 %vm1281_vm10, %v1358_v51  ;;  %v1573_v15 = vsel %vm1247_vm9, %v1572_v30, %v1571_v59 }
 0x2d8   : > { %v1610_v52 = vsel %vm1281_vm10, %v1605_v48, 0  ;;  %3228 = vmatprep.mubr.msk.bf16.mxu0 %vm3530_vm2, %v3529_v5  ;;  %v1574_v62 = vpack.c.b16 %v1573_v15, %v1573_v15 }
 0x2d9   : > { %3227 = vmatpush3.bf16.xpose.msra.mxu0 %v1610_v52 }
 0x2da   : > { %3238 = vmatprep.subr.bf16.mxu0 %v3529_v5 }
 0x2e0   : > { %3229 = vmatmul.mubr.msk.bf16.vlgmr.msra.gmra.mrb[12].mxu0 %vm1281_vm10, %v1574_v62 }
 0x2e1   : > { %3240 = vmatprep.mubr.msk.bf16.mxu0 %vm3530_vm2, %v3529_v5 }
 0x397   : > { %v1322_v42 = vpop.f32.mrb[4].mxu0 }
 0x398   : > { %v3212_v63 = vpop.f32.mrb[5].mxu0  ;;  %v1652_v0 = vsel %vm1281_vm10, %v1322_v42, -inf }
 0x399   : > { %1653 = vmax.xlane.f32.xlu1 %v1652_v0  ;;  %v1325_v47 = vpop.f32.mrb[6].mxu0 }
 0x39a   : > { %v3213_v24 = vpop.f32.mrb[7].mxu0 }
 0x3a1   : > { %v1538_v54 = vpop.f32.mrb[0].mxu1 }
 0x3a2   : > { %v3224_v9 = vpop.f32.mrb[1].mxu1  ;;  %v1658_v28 = vsel %vm1281_vm10, %v1538_v54, -inf }
 0x3a3   : > { %v1541_v36 = vpop.f32.mrb[2].mxu1 }
 0x3a4   : > { %v3225_v60 = vpop.f32.mrb[3].mxu1 }
 0x3aa   : > { %v1430_v3 = vpop.f32.mrb[8].mxu0 }
 0x3ab   : > { %v3218_v16 = vpop.f32.mrb[9].mxu0  ;;  %v1655_v50 = vsel %vm1281_vm10, %v1430_v3, -inf }
 0x3ac   : > { %1656 = vmax.xlane.f32.xlu0 %v1655_v50  ;;  %v1433_v4 = vpop.f32.mrb[10].mxu0 }
 0x3ad   : > { %v3219_v53 = vpop.f32.mrb[11].mxu0 }
 0x3b0   : > { %1659 = vmax.xlane.f32.xlu0 %v1658_v28 }
 0x3b3   : > { %v1646_v44 = vpop.f32.mrb[12].mxu0 }
 0x3b4   : > { %v3230_v10 = vpop.f32.mrb[13].mxu0  ;;  %v1661_v55 = vsel %vm1281_vm10, %v1646_v44, -inf }
 0x3b5   : > { %1662 = vmax.xlane.f32.xlu1 %v1661_v55  ;;  %v1649_v20 = vpop.f32.mrb[14].mxu0 }
 0x3b6   : > { %v3231_v56 = vpop.f32.mrb[15].mxu0 }
 0x3c6   : > { %902 = vrot.lane.b32.xlu1 %v3778_v25, %s3537_s16  ;;  %900 = vrot.lane.b32.xlu0 %v3772_v21, %s3537_s16 }
 0x3ca   : > { %904 = vrot.lane.b32.xlu1 %v3781_v26, %s3537_s16  ;;  %906 = vrot.lane.b32.xlu0 %v3784_v27, %s3537_s16 }
 0x426   : > { %v1654_v14 = vpop.xlane.xlu1 %1653 }
 0x427   : > { %v1664_v33 = vsub.f32 %v1322_v42, %v1654_v14 }
 0x429   : > { %v1668_v38 = vmul.f32 1.442695, %v1664_v33 }
 0x42b   : > { %3402 = vpow2.f32 %v1668_v38 }
 0x435   : > { %v4093_v31 = vpop.eup %3402 }
 0x436   : > { %v1676_v37 = vsel %vm1281_vm10, %v4093_v31, 0.0 }
 0x437   : > { %1677 = vadd.xlane.f32.xlu1 %v1676_v37 }
 0x439   : > { %v1657_v49 = vpop.xlane.xlu0 %1656 }
 0x43a   : > { %v1665_v13 = vsub.f32 %v1430_v3, %v1657_v49 }
 0x43c   : > { %v1670_v1 = vmul.f32 1.442695, %v1665_v13 }
 0x43d   : > { %v1660_v25 = vpop.xlane.xlu0 %1659 }
 0x43e   : > { %3404 = vpow2.f32 %v1670_v1  ;;  %v1666_v21 = vsub.f32 %v1538_v54, %v1660_v25 }
 0x440   : > { %v1672_v61 = vmul.f32 1.442695, %v1666_v21 }
 0x441   : > { %v901_v26 = vpop.permute.xlu0 %900 }
 0x442   : > { %v1663_v18 = vpop.xlane.xlu1 %1662  ;;  %3406 = vpow2.f32 %v1672_v61 }
 0x443   : > { %v1667_v27 = vsub.f32 %v1646_v44, %v1663_v18 }
 0x445   : > { %v1674_v2 = vmul.f32 1.442695, %v1667_v27  ;;  %v907_v45 = vpop.permute.xlu0 %906 }
 0x446   : > { %v903_v32 = vpop.permute.xlu1 %902 }
 0x447   : > { %3408 = vpow2.f32 %v1674_v2  ;;  %v928_v29 = vcombine.low %v903_v32, %v907_v45  ;;  %v929_v23 = vcombine.high %v903_v32, %v907_v45 }
 0x448   : > { %v4097_v46 = vpop.eup %3404 }
 0x449   : > { %v1679_v22 = vsel %vm1281_vm10, %v4097_v46, 0.0  ;;  %v936_v58 = vrot.slane %v928_v29, %v3790_v34  ;;  %v943_v8 = vrot.slane %v929_v23, %v3790_v34 }
 0x44a   : > { %v905_v7 = vpop.permute.xlu1 %904  ;;  %1680 = vadd.xlane.f32.xlu0 %v1679_v22 }
 0x44b   : > { %v912_v57 = vcombine.low %v901_v26, %v905_v7  ;;  %v913_v35 = vcombine.high %v901_v26, %v905_v7 }
 0x44c   : > { %v4101_v41 = vpop.eup %3406 }
 0x44d   : > { %v920_v6 = vrot.slane %v912_v57, %v3790_v34  ;;  %v927_v19 = vrot.slane %v913_v35, %v3790_v34  ;;  %v1682_v43 = vsel %vm1281_vm10, %v4101_v41, 0.0 }
 0x44e   : > { %1683 = vadd.xlane.f32.xlu0 %v1682_v43 }
 0x44f   : > { %v944_v51 = vcombine.low %v920_v6, %v936_v58  ;;  %v945_v48 = vcombine.high %v920_v6, %v936_v58  ;;  %v960_v40 = vcombine.low %v927_v19, %v943_v8  ;;  %v961_v52 = vcombine.high %v927_v19, %v943_v8 }
 0x451   : > { %v4109_v59 = vpop.eup %3408  ;;  %v952_v30 = vrot.slane %v944_v51, %v3797_v39  ;;  %v959_v15 = vrot.slane %v945_v48, %v3797_v39  ;;  %v4114_v62 = vrot.slane %v960_v40, %v3797_v39  ;;  %v4119_v63 = vrot.slane %v961_v52, %v3797_v39 }
 0x452   : > { %v1685_v42 = vsel %vm1281_vm10, %v4109_v59, 0.0 }
 0x453   : > { %v4122_v0 = vcombine.high %v952_v30, %v3529_v5  ;;  %v4125_v47 = vcombine.high %v959_v15, %v3529_v5  ;;  %v1100_v24 = vrot.slane %v952_v30, 1  ;;  %1686 = vadd.xlane.f32.xlu1 %v1685_v42  ;;  %v1102_v54 = vrot.slane %v959_v15, 1 }
 0x454   : > { %v1116_v9 = vrot.slane %v952_v30, 2  ;;  %v1118_v36 = vrot.slane %v959_v15, 2  ;;  %v1132_v60 = vrot.slane %v952_v30, 3  ;;  %v1134_v3 = vrot.slane %v959_v15, 3 }
 0x455   : > { %v1700_v16 = vpack.c.bf16 %v952_v30, %v952_v30  ;;  %v1702_v50 = vpack.c.bf16 %v959_v15, %v959_v15  ;;  %v4127_v4 = vpack.c.bf16 %v1100_v24, %v1100_v24  ;;  %v4131_v53 = vcombine.high %v4114_v62, %v3529_v5 }
 0x456   : > { %v1710_v28 = vpack.c.bf16 %v1102_v54, %v1102_v54  ;;  %v4133_v44 = vpack.c.bf16 %v1116_v9, %v1116_v9  ;;  %v4135_v10 = vpack.c.bf16 %v1118_v36, %v1118_v36  ;;  %v4137_v55 = vpack.c.bf16 %v1132_v60, %v1132_v60 }
 0x457   : > { %v4139_v20 = vpack.c.bf16 %v1134_v3, %v1134_v3  ;;  %v1740_v56 = vunpack.c.l.b16 %v1700_v16  ;;  %v1742_v14 = vunpack.c.l.b16 %v1702_v50  ;;  %v1818_v33 = vunpack.c.l.b16 %v4127_v4 }
 0x458   : > { %v1820_v38 = vunpack.c.l.b16 %v1710_v28  ;;  %v1895_v37 = vunpack.c.l.b16 %v4133_v44  ;;  %v1897_v49 = vunpack.c.l.b16 %v4135_v10  ;;  %v4147_v25 = vcombine.high %v4119_v63, %v3529_v5 }
 0x459   : > { %v1750_v13 = vrot.slane %v1742_v14, 6  ;;  %v1974_v1 = vunpack.c.l.b16 %v4139_v20  ;;  %v1701_v21 = vpack.c.bf16 %v4122_v0, %v4122_v0  ;;  %v1703_v61 = vpack.c.bf16 %v4125_v47, %v4125_v47 }
 0x45a   : > { %v1704_v26 = vpack.c.bf16 %v4114_v62, %v4114_v62  ;;  %v1705_v18 = vpack.c.bf16 %v4131_v53, %v4131_v53  ;;  %v1706_v27 = vpack.c.bf16 %v4119_v63, %v4119_v63  ;;  %v1707_v2 = vpack.c.bf16 %v4147_v25, %v4147_v25 }
 0x45b   : > { %v1741_v45 = vunpack.c.l.b16 %v1701_v21  ;;  %v1101_v32 = vrot.slane %v4122_v0, 1  ;;  %v1103_v29 = vrot.slane %v4125_v47, 1  ;;  %v1743_v23 = vunpack.c.l.b16 %v1703_v61 }
 0x45c   : > { %v1744_v7 = vunpack.c.l.b16 %v1704_v26  ;;  %v1745_v22 = vunpack.c.l.b16 %v1705_v18  ;;  %v1746_v57 = vunpack.c.l.b16 %v1706_v27  ;;  %v1747_v35 = vunpack.c.l.b16 %v1707_v2 }
 0x45d   : > { %v1748_v58 = vrot.slane %v1741_v45, 7  ;;  %v1104_v8 = vrot.slane %v4114_v62, 1  ;;  %v1105_v6 = vrot.slane %v4131_v53, 1  ;;  %v1752_v19 = vrot.slane %v1743_v23, 5 }
 0x45e   : > { %v1754_v43 = vrot.slane %v1744_v7, 4  ;;  %v1756_v51 = vrot.slane %v1745_v22, 3  ;;  %v1758_v48 = vrot.slane %v1746_v57, 2  ;;  %v1760_v52 = vrot.slane %v1747_v35, 1 }
 0x45f   : > { %v1749_v40 = vsel %vm1229_vm3, %v1748_v58, %v1740_v56  ;;  %v1106_v30 = vrot.slane %v4119_v63, 1  ;;  %v1107_v15 = vrot.slane %v4147_v25, 1  ;;  %v1709_v24 = vpack.c.bf16 %v1101_v32, %v1101_v32 }
 0x460   : > { %v1751_v42 = vsel %vm1232_vm4, %v1750_v13, %v1749_v40  ;;  %v1711_v54 = vpack.c.bf16 %v1103_v29, %v1103_v29  ;;  %v1712_v9 = vpack.c.bf16 %v1104_v8, %v1104_v8  ;;  %v1713_v60 = vpack.c.bf16 %v1105_v6, %v1105_v6 }
 0x461   : > { %v1753_v36 = vsel %vm1235_vm5, %v1752_v19, %v1751_v42  ;;  %v1714_v3 = vpack.c.bf16 %v1106_v30, %v1106_v30  ;;  %v1715_v16 = vpack.c.bf16 %v1107_v15, %v1107_v15  ;;  %v1819_v4 = vunpack.c.l.b16 %v1709_v24 }
 0x462   : > { %v1755_v50 = vsel %vm1238_vm6, %v1754_v43, %v1753_v36  ;;  %v1821_v28 = vunpack.c.l.b16 %v1711_v54  ;;  %v1822_v56 = vunpack.c.l.b16 %v1712_v9  ;;  %v1823_v21 = vunpack.c.l.b16 %v1713_v60 }
 0x463   : > { %v1757_v14 = vsel %vm1241_vm7, %v1756_v51, %v1755_v50  ;;  %v1824_v61 = vunpack.c.l.b16 %v1714_v3  ;;  %v1825_v26 = vunpack.c.l.b16 %v1715_v16  ;;  %v1826_v18 = vrot.slane %v1819_v4, 7 }
 0x464   : > { %v1759_v13 = vsel %vm1244_vm8, %v1758_v48, %v1757_v14  ;;  %v1828_v27 = vrot.slane %v1820_v38, 6  ;;  %v1830_v2 = vrot.slane %v1821_v28, 5  ;;  %v1832_v32 = vrot.slane %v1822_v56, 4 }
 0x465   : > { %v1761_v45 = vsel %vm1247_vm9, %v1760_v52, %v1759_v13  ;;  %v1834_v29 = vrot.slane %v1823_v21, 3  ;;  %v1836_v23 = vrot.slane %v1824_v61, 2  ;;  %v1827_v22 = vsel %vm1229_vm3, %v1826_v18, %v1818_v33 }
 0x466   : > { %v1762_v7 = vpack.c.b16 %v1761_v45, %v1761_v45  ;;  %v1838_v57 = vrot.slane %v1825_v26, 1  ;;  %v1117_v35 = vrot.slane %v4122_v0, 2  ;;  %v1829_v58 = vsel %vm1232_vm4, %v1828_v27, %v1827_v22 }
 0x467   : > { %v1119_v8 = vrot.slane %v4125_v47, 2  ;;  %v1120_v6 = vrot.slane %v4114_v62, 2  ;;  %v1121_v38 = vrot.slane %v4131_v53, 2  ;;  %v1831_v43 = vsel %vm1235_vm5, %v1830_v2, %v1829_v58 }
 0x468   : > { %v1768_v19 = vsel %vm1766_vm11, %v1762_v7, 0  ;;  %v1122_v51 = vrot.slane %v4119_v63, 2  ;;  %v1123_v48 = vrot.slane %v4147_v25, 2  ;;  %v1833_v33 = vsel %vm1238_vm6, %v1832_v32, %v1831_v43 }
 0x469   : > { %3233 = vmatpush3.bf16.msra.mxu1 %v1768_v19  ;;  %v1717_v40 = vpack.c.bf16 %v1117_v35, %v1117_v35  ;;  %v1719_v52 = vpack.c.bf16 %v1119_v8, %v1119_v8  ;;  %v1720_v30 = vpack.c.bf16 %v1120_v6, %v1120_v6  ;;  %v1835_v15 = vsel %vm1241_vm7, %v1834_v29, %v1833_v33 }
 0x46a   : > { %3244 = vmatprep.subr.bf16.mxu1 %v3529_v5  ;;  %v1721_v42 = vpack.c.bf16 %v1121_v38, %v1121_v38  ;;  %v1722_v24 = vpack.c.bf16 %v1122_v51, %v1122_v51  ;;  %v1723_v54 = vpack.c.bf16 %v1123_v48, %v1123_v48  ;;  %v1837_v9 = vsel %vm1244_vm8, %v1836_v23, %v1835_v15 }
 0x46b   : > { %v1896_v36 = vunpack.c.l.b16 %v1717_v40  ;;  %v1898_v60 = vunpack.c.l.b16 %v1719_v52  ;;  %v1899_v3 = vunpack.c.l.b16 %v1720_v30  ;;  %v1839_v16 = vsel %vm1247_vm9, %v1838_v57, %v1837_v9 }
 0x46c   : > { %v1900_v50 = vunpack.c.l.b16 %v1721_v42  ;;  %v1901_v4 = vunpack.c.l.b16 %v1722_v24  ;;  %v1902_v28 = vunpack.c.l.b16 %v1723_v54  ;;  %v1840_v56 = vpack.c.b16 %v1839_v16, %v1839_v16 }
 0x46d   : > { %v1903_v14 = vrot.slane %v1896_v36, 7  ;;  %v1905_v21 = vrot.slane %v1897_v49, 6  ;;  %v1907_v61 = vrot.slane %v1898_v60, 5  ;;  %v1909_v26 = vrot.slane %v1899_v3, 4 }
 0x46e   : > { %v1911_v13 = vrot.slane %v1900_v50, 3  ;;  %v1913_v18 = vrot.slane %v1901_v4, 2  ;;  %v1915_v27 = vrot.slane %v1902_v28, 1  ;;  %v1845_v2 = vsel %vm1766_vm11, %v1840_v56, 0 }
 0x46f   : > { %v1904_v45 = vsel %vm1229_vm3, %v1903_v14, %v1895_v37  ;;  %v1133_v32 = vrot.slane %v4122_v0, 3  ;;  %v1135_v29 = vrot.slane %v4125_v47, 3  ;;  %3239 = vmatpush3.bf16.msra.mxu0 %v1845_v2  ;;  %v1136_v10 = vrot.slane %v4114_v62, 3 }
 0x470   : > { %v1906_v23 = vsel %vm1232_vm4, %v1905_v21, %v1904_v45  ;;  %v1137_v49 = vrot.slane %v4131_v53, 3  ;;  %v1138_v7 = vrot.slane %v4119_v63, 3  ;;  %3250 = vmatprep.subr.bf16.mxu0 %v3529_v5  ;;  %v1139_v44 = vrot.slane %v4147_v25, 3 }
 0x471   : > { %v1908_v22 = vsel %vm1235_vm5, %v1907_v61, %v1906_v23  ;;  %v1725_v37 = vpack.c.bf16 %v1133_v32, %v1133_v32  ;;  %v1727_v57 = vpack.c.bf16 %v1135_v29, %v1135_v29  ;;  %v1728_v47 = vpack.c.bf16 %v1136_v10, %v1136_v10 }
 0x472   : > { %v1910_v0 = vsel %vm1238_vm6, %v1909_v26, %v1908_v22  ;;  %v1729_v35 = vpack.c.bf16 %v1137_v49, %v1137_v49  ;;  %v1730_v58 = vpack.c.bf16 %v1138_v7, %v1138_v7  ;;  %v1731_v62 = vpack.c.bf16 %v1139_v44, %v1139_v44 }
 0x473   : > { %v1912_v8 = vsel %vm1241_vm7, %v1911_v13, %v1910_v0  ;;  %v1973_v6 = vunpack.c.l.b16 %v1725_v37  ;;  %v1975_v53 = vunpack.c.l.b16 %v1727_v57  ;;  %v1976_v38 = vunpack.c.l.b16 %v1728_v47 }
 0x474   : > { %v1914_v63 = vsel %vm1244_vm8, %v1913_v18, %v1912_v8  ;;  %v1972_v19 = vunpack.c.l.b16 %v4137_v55  ;;  %v1977_v25 = vunpack.c.l.b16 %v1729_v35  ;;  %v1978_v33 = vunpack.c.l.b16 %v1730_v58 }
 0x475   : > { %v1916_v43 = vsel %vm1247_vm9, %v1915_v27, %v1914_v63  ;;  %v1980_v51 = vrot.slane %v1973_v6, 7  ;;  %v1982_v40 = vrot.slane %v1974_v1, 6  ;;  %v1979_v52 = vunpack.c.l.b16 %v1731_v62 }
 0x476   : > { %v1917_v48 = vpack.c.b16 %v1916_v43, %v1916_v43  ;;  %v1984_v15 = vrot.slane %v1975_v53, 5  ;;  %v1986_v54 = vrot.slane %v1976_v38, 4  ;;  %v1988_v9 = vrot.slane %v1977_v25, 3 }
 0x477   : > { %v1981_v30 = vsel %vm1229_vm3, %v1980_v51, %v1972_v19  ;;  %v1990_v60 = vrot.slane %v1978_v33, 2  ;;  %v1992_v16 = vrot.slane %v1979_v52, 1  ;;  %vm3543_vm3 = vmmov (!%p3149_p1), 0  }
 0x478   : > { %v1922_v42 = vsel %vm1766_vm11, %v1917_v48, 0  ;;  %v1983_v24 = vsel %vm1232_vm4, %v1982_v40, %v1981_v30 }
 0x479   : > { %v1985_v55 = vsel %vm1235_vm5, %v1984_v15, %v1983_v24 }
 0x47a   : > { %v1987_v36 = vsel %vm1238_vm6, %v1986_v54, %v1985_v55 }
 0x47b   : > { %v1989_v3 = vsel %vm1241_vm7, %v1988_v9, %v1987_v36 }
 0x47c   : > { %v1991_v20 = vsel %vm1244_vm8, %v1990_v60, %v1989_v3 }
 0x47d   : > { %v1993_v1 = vsel %vm1247_vm9, %v1992_v16, %v1991_v20 }
 0x47e   : > { %v1994_v50 = vpack.c.b16 %v1993_v1, %v1993_v1 }
 0x480   : > { %v1999_v4 = vsel %vm1766_vm11, %v1994_v50, 0 }
 0x4c4   : > { %v1678_v28 = vpop.xlane.xlu1 %1677 }
 0x4c5   : > { %3410 = vrcp.f32 %v1678_v28 }
 0x4cf   : > { %v3411_v56 = vpop.eup %3410 }
 0x4d0   : > { %v1692_v14 = vmul.f32 %v3411_v56, %v4093_v31 }
 0x4d2   : > { %v1696_v21 = vpack.c.bf16 %v1692_v14, %v1692_v14 }
 0x4d4   : > { %3235 = vmatmul.mubr.msk.bf16.vlgmr.msra.gmra.mrb[4].mxu1 %vm1281_vm10, %v1696_v21 }
 0x4d5   : > { %3245 = vmatpush3.bf16.msra.mxu1 %v1922_v42  ;;  %3246 = vmatprep.mubr.msk.bf16.mxu1 %vm3530_vm2, %v3529_v5 }
 0x4d6   : > { %3256 = vmatprep.subr.bf16.mxu1 %v3529_v5 }
 0x4d7   : > { %v1681_v61 = vpop.xlane.xlu0 %1680 }
 0x4d8   : > { %3412 = vrcp.f32 %v1681_v61 }
 0x4db   : > { %v1684_v26 = vpop.xlane.xlu0 %1683 }
 0x4dc   : > { %3414 = vrcp.f32 %v1684_v26 }
 0x4e0   : > { %v1687_v13 = vpop.xlane.xlu1 %1686 }
 0x4e1   : > { %3416 = vrcp.f32 %v1687_v13 }
 0x4e2   : > { %v3413_v18 = vpop.eup %3412 }
 0x4e3   : > { %v1693_v27 = vmul.f32 %v3413_v18, %v4097_v46 }
 0x4e5   : > { %v1697_v2 = vpack.c.bf16 %v1693_v27, %v1693_v27 }
 0x4e6   : > { %v3415_v31 = vpop.eup %3414 }
 0x4e7   : > { %v1694_v45 = vmul.f32 %v3415_v31, %v4101_v41  ;;  %3241 = vmatmul.mubr.msk.bf16.vlgmr.msra.gmra.mrb[16].mxu0 %vm1281_vm10, %v1697_v2  ;;  %v3538_v41 = vmov 1966171168  }
 0x4e8   : > { %3251 = vmatpush3.bf16.msra.mxu0 %v1999_v4  ;;  %3252 = vmatprep.mubr.msk.bf16.mxu0 %vm3530_vm2, %v3529_v5  ;;  %v2044_v10 = vunpack.c.l.s4 %v3538_v41 }
 0x4e9   : > { %v1698_v32 = vpack.c.bf16 %v1694_v45, %v1694_v45  ;;  %3264 = vmatprep.subr.bf16.mxu0 %v3529_v5 }
 0x4ea   : > { %v2045_v7 = vunpack.c.0.s8 %v2044_v10 }
 0x4eb   : > { %v3417_v29 = vpop.eup %3416  ;;  %3247 = vmatmul.mubr.msk.bf16.vlgmr.msra.gmra.mrb[8].mxu1 %vm1281_vm10, %v1698_v32 }
 0x4ec   : > { %v1695_v23 = vmul.f32 %v3417_v29, %v4109_v59  ;;  %3260 = vmatprep.mubr.msk.bf16.mxu1 %vm3530_vm2, %v3529_v5  ;;  %v4239_v59 = vsub.s32 %v2045_v7, %v3753_v11 }
 0x4ee   : > { %v1699_v46 = vpack.c.bf16 %v1695_v23, %v1695_v23 }
 0x4f0   : > { %3253 = vmatmul.mubr.msk.bf16.vlgmr.msra.gmra.mrb[20].mxu0 %vm1281_vm10, %v1699_v46 }
 0x4f1   : > { %3268 = vmatprep.mubr.msk.bf16.mxu0 %vm3530_vm2, %v3529_v5 }
 0x5a7   : > { %v1804_v49 = vpop.f32.mrb[4].mxu1 }
 0x5a8   : > { %v3236_v22 = vpop.f32.mrb[5].mxu1  ;;  %v2042_v57 = vcombine.high %v1804_v49, %v1804_v49  ;;  %v2049_v0 = vrot.slane %v1804_v49, %v4239_v59 }
 0x5a9   : > { %v1807_v44 = vpop.f32.mrb[6].mxu1 }
 0x5aa   : > { %v3237_v37 = vpop.f32.mrb[7].mxu1  ;;  %v2056_v47 = vrot.slane %v2042_v57, %v4239_v59  ;;  %v2057_v35 = vcombine.high %v2049_v0, %v2049_v0  ;;  %v2065_v8 = vrot.slane %v2049_v0, %v4239_v59 }
 0x5ac   : > { %v2058_v58 = vcombine.high %v2056_v47, %v2056_v47  ;;  %v2072_v62 = vrot.slane %v2056_v47, %v4239_v59  ;;  %v2079_v6 = vrot.slane %v2057_v35, %v4239_v59  ;;  %v2087_v52 = vcombine.high %v2065_v8, %v2065_v8 }
 0x5ae   : > { %v2086_v43 = vrot.slane %v2058_v58, %v4239_v59  ;;  %v2088_v30 = vcombine.high %v2072_v62, %v2072_v62  ;;  %v2089_v15 = vcombine.high %v2079_v6, %v2079_v6 }
 0x5b0   : > { %v2090_v60 = vcombine.high %v2086_v43, %v2086_v43 }
 0x5ba   : > { %v1881_v53 = vpop.f32.mrb[16].mxu0 }
 0x5bb   : > { %v2100_v63 = vcombine.high %v1881_v53, %v1881_v53  ;;  %v2107_v38 = vrot.slane %v1881_v53, %v4239_v59  ;;  %v3242_v19 = vpop.f32.mrb[17].mxu0 }
 0x5bc   : > { %v1884_v25 = vpop.f32.mrb[18].mxu0 }
 0x5bd   : > { %v2114_v51 = vrot.slane %v2100_v63, %v4239_v59  ;;  %v2115_v48 = vcombine.high %v2107_v38, %v2107_v38  ;;  %v2123_v33 = vrot.slane %v2107_v38, %v4239_v59  ;;  %v3243_v40 = vpop.f32.mrb[19].mxu0 }
 0x5be   : > { %v1958_v42 = vpop.f32.mrb[8].mxu1 }
 0x5bf   : > { %v2116_v24 = vcombine.high %v2114_v51, %v2114_v51  ;;  %v2130_v54 = vrot.slane %v2114_v51, %v4239_v59  ;;  %v2137_v55 = vrot.slane %v2115_v48, %v4239_v59  ;;  %v2145_v9 = vcombine.high %v2123_v33, %v2123_v33  ;;  %v3248_v36 = vpop.f32.mrb[9].mxu1 }
 0x5c0   : > { %v2252_v3 = vrot.slane %v2123_v33, %v3756_v12  ;;  %v2150_v16 = vcombine.high %v1958_v42, %v1958_v42  ;;  %v2157_v20 = vrot.slane %v1958_v42, %v4239_v59  ;;  %v1961_v1 = vpop.f32.mrb[10].mxu1 }
 0x5c1   : > { %v2144_v50 = vrot.slane %v2116_v24, %v4239_v59  ;;  %v2146_v4 = vcombine.high %v2130_v54, %v2130_v54  ;;  %v2147_v28 = vcombine.high %v2137_v55, %v2137_v55  ;;  %v2256_v56 = vrot.slane %v2137_v55, %v3756_v12  ;;  %v3249_v14 = vpop.f32.mrb[11].mxu1 }
 0x5c2   : > { %v2260_v21 = vrot.slane %v2145_v9, %v3756_v12  ;;  %v2268_v61 = vrot.slane %v2130_v54, %v3756_v12  ;;  %v2370_v26 = vsel %vm2369_vm12, %v2065_v8, %v2252_v3  ;;  %v2164_v13 = vrot.slane %v2150_v16, %v4239_v59 }
 0x5c3   : > { %v2035_v18 = vpop.f32.mrb[20].mxu0  ;;  %v2148_v27 = vcombine.high %v2144_v50, %v2144_v50  ;;  %v2264_v2 = vrot.slane %v2147_v28, %v3756_v12  ;;  %v2272_v31 = vrot.slane %v2144_v50, %v3756_v12  ;;  %v2276_v45 = vrot.slane %v2146_v4, %v3756_v12 }
 0x5c4   : > { %v3254_v32 = vpop.f32.mrb[21].mxu0  ;;  %v2371_v29 = vsel %vm2369_vm12, %v2079_v6, %v2256_v56  ;;  %v2372_v23 = vsel %vm2369_vm12, %v2087_v52, %v2260_v21  ;;  %v2374_v46 = vsel %vm2369_vm12, %v2072_v62, %v2268_v61  ;;  %v2165_v41 = vcombine.high %v2157_v20, %v2157_v20 }
 0x5c5   : > { %v2038_v10 = vpop.f32.mrb[22].mxu0  ;;  %v2280_v49 = vrot.slane %v2148_v27, %v3756_v12  ;;  %v2373_v7 = vsel %vm2369_vm12, %v2089_v15, %v2264_v2  ;;  %v2375_v22 = vsel %vm2369_vm12, %v2086_v43, %v2272_v31  ;;  %v2376_v44 = vsel %vm2369_vm12, %v2088_v30, %v2276_v45 }
 0x5c6   : > { %v3255_v37 = vpop.f32.mrb[23].mxu0  ;;  %v2166_v57 = vcombine.high %v2164_v13, %v2164_v13  ;;  %v2173_v0 = vrot.slane %v2157_v20, %v4239_v59  ;;  %v2180_v47 = vrot.slane %v2164_v13, %v4239_v59  ;;  %v2187_v35 = vrot.slane %v2165_v41, %v4239_v59  ;;  %v3388_v41 = vld [vmem:[%s3715_s14] sm:$0xff]  }
 0x5c7   : > { %v2377_v58 = vsel %vm2369_vm12, %v2090_v60, %v2280_v49  ;;  %v2200_v8 = vcombine.high %v2035_v18, %v2035_v18  ;;  %v2207_v62 = vrot.slane %v2035_v18, %v4239_v59  ;;  %3257 = vmatpush3.bf16.msra.mxu1 %v3388_v41 }
 0x5c8   : > { %v2194_v6 = vrot.slane %v2166_v57, %v4239_v59  ;;  %v2195_v53 = vcombine.high %v2173_v0, %v2173_v0  ;;  %v2196_v63 = vcombine.high %v2180_v47, %v2180_v47  ;;  %v2197_v38 = vcombine.high %v2187_v35, %v2187_v35  ;;  %3258 = vmatprep.subr.bf16.mxu1 %v3529_v5 }
 0x5c9   : > { %v2292_v19 = vrot.slane %v2173_v0, %v3756_v12  ;;  %v2296_v43 = vrot.slane %v2187_v35, %v3756_v12  ;;  %v2308_v25 = vrot.slane %v2180_v47, %v3756_v12  ;;  %v2214_v51 = vrot.slane %v2200_v8, %v4239_v59  ;;  %v3389_v8 = vld [vmem:[%s3715_s14 + $0x8] sm:$0xff]   ;;  %s3539_s14 = smov 16  }
 0x5ca   : > { %v2198_v48 = vcombine.high %v2194_v6, %v2194_v6  ;;  %v2300_v33 = vrot.slane %v2195_v53, %v3756_v12  ;;  %v2304_v40 = vrot.slane %v2197_v38, %v3756_v12  ;;  %v2312_v52 = vrot.slane %v2194_v6, %v3756_v12 }
 0x5cb   : > { %v2316_v30 = vrot.slane %v2196_v63, %v3756_v12  ;;  %v2379_v15 = vsel %vm2378_vm13, %v2370_v26, %v2292_v19  ;;  %v2380_v42 = vsel %vm2378_vm13, %v2371_v29, %v2296_v43  ;;  %v2383_v24 = vsel %vm2378_vm13, %v2374_v46, %v2308_v25  ;;  %3259 = vmatpush3.bf16.msra.mxu1 %v3389_v8  ;;  %v3399_v8 = vld [vmem:[%s3738_s4 + $0x38] sm:$0xff]  }
 0x5cc   : > { %v2320_v54 = vrot.slane %v2198_v48, %v3756_v12  ;;  %v2381_v55 = vsel %vm2378_vm13, %v2372_v23, %v2300_v33  ;;  %v2382_v9 = vsel %vm2378_vm13, %v2373_v7, %v2304_v40  ;;  %v2384_v36 = vsel %vm2378_vm13, %v2375_v22, %v2312_v52  ;;  %3272 = vmatprep.subr.bf16.mxu1 %v3529_v5 }
 0x5cd   : > { %v2385_v60 = vsel %vm2378_vm13, %v2376_v44, %v2316_v30  ;;  %v2215_v3 = vcombine.high %v2207_v62, %v2207_v62  ;;  %v2216_v16 = vcombine.high %v2214_v51, %v2214_v51  ;;  %v2223_v20 = vrot.slane %v2207_v62, %v4239_v59 }
 0x5ce   : > { %v2230_v1 = vrot.slane %v2214_v51, %v4239_v59  ;;  %v2386_v50 = vsel %vm2378_vm13, %v2377_v58, %v2320_v54  ;;  %v3132_v54 = vld [vmem:[%s618_s27] ss:$0 sm:$0xff] }
 0x5cf   : > { %v2237_v4 = vrot.slane %v2215_v3, %v4239_v59  ;;  %v2244_v28 = vrot.slane %v2216_v16, %v4239_v59  ;;  %v2245_v56 = vcombine.high %v2223_v20, %v2223_v20  ;;  %v2332_v14 = vrot.slane %v2223_v20, %v3756_v12 }
 0x5d0   : > { %v2246_v21 = vcombine.high %v2230_v1, %v2230_v1  ;;  %v2348_v61 = vrot.slane %v2230_v1, %v3756_v12 }
 0x5d1   : > { %v2247_v26 = vcombine.high %v2237_v4, %v2237_v4  ;;  %v2248_v13 = vcombine.high %v2244_v28, %v2244_v28  ;;  %v2336_v18 = vrot.slane %v2237_v4, %v3756_v12  ;;  %v2340_v27 = vrot.slane %v2245_v56, %v3756_v12 }
 0x5d2   : > { %v2352_v2 = vrot.slane %v2244_v28, %v3756_v12  ;;  %v2356_v31 = vrot.slane %v2246_v21, %v3756_v12  ;;  %v2388_v45 = vsel %vm2387_vm14, %v2379_v15, %v2332_v14  ;;  %v2392_v59 = vsel %vm2387_vm14, %v2383_v24, %v2348_v61  ;;  %v3390_v61 = vld [vmem:[%s3724_s0] sm:$0xff]  }
 0x5d3   : > { %v2344_v32 = vrot.slane %v2247_v26, %v3756_v12  ;;  %v2360_v29 = vrot.slane %v2248_v13, %v3756_v12  ;;  %v2389_v23 = vsel %vm2387_vm14, %v2380_v42, %v2336_v18  ;;  %v2390_v46 = vsel %vm2387_vm14, %v2381_v55, %v2340_v27  ;;  %v3428_v55 = vld [vmem:[%s3702_s21] sm:$0xf]  ;;  %3265 = vmatpush3.bf16.msra.mxu0 %v3390_v61  ;;  %v3391_v26 = vld [vmem:[%s3724_s0 + $0x8] sm:$0xff]  }
 0x5d4   : > { %v2396_v10 = vcombine.low %v2388_v45, %v2390_v46  ;;  %v2393_v49 = vsel %vm2387_vm14, %v2384_v36, %v2352_v2  ;;  %v2394_v7 = vsel %vm2387_vm14, %v2385_v60, %v2356_v31  ;;  %v2557_v36 = vsub.s32 1, %v3753_v11  ;;  %3266 = vmatprep.subr.bf16.mxu0 %v3529_v5 }
 0x5d5   : > { %v2391_v22 = vsel %vm2387_vm14, %v2382_v9, %v2344_v32  ;;  %v2395_v44 = vsel %vm2387_vm14, %v2386_v50, %v2360_v29  ;;  %v2412_v37 = vcombine.low %v2392_v59, %v2394_v7  ;;  %v2554_v9 = vmul.f32 %v3428_v55, %v3428_v55 }
 0x5d6   : > { %v2404_v57 = vcombine.low %v2389_v23, %v2391_v22  ;;  %v2420_v0 = vcombine.low %v2393_v49, %v2395_v44  ;;  %v2403_v12 = vrot.slane %v2396_v10, %v3790_v34  ;;  %v2573_v29 = vrot.slane %v3428_v55, 1 }
 0x5d7   : > { %v2419_v35 = vrot.slane %v2412_v37, %v3790_v34  ;;  %v2558_v4 = vrot.slane %v2554_v9, %v2557_v36  ;;  %3267 = vmatpush3.bf16.msra.mxu0 %v3391_v26  ;;  %v3392_v37 = vld [vmem:[%s3738_s4] sm:$0xff]  }
 0x5d8   : > { %v2411_v47 = vrot.slane %v2404_v57, %v3790_v34  ;;  %v2427_v58 = vrot.slane %v2420_v0, %v3790_v34  ;;  %v2575_v23 = vmul.f32 %v3428_v55, %v2573_v29  ;;  %v3393_v57 = vld [vmem:[%s3738_s4 + $0x8] sm:$0xff]   ;;  %v3394_v0 = vld [vmem:[%s3738_s4 + $0x10] sm:$0xff]  }
 0x5da   : > { %v2429_v62 = vcombine.high %v2403_v12, %v2411_v47  ;;  %v2445_v6 = vcombine.high %v2419_v35, %v2427_v58  ;;  %v2428_v53 = vcombine.low %v2403_v12, %v2411_v47  ;;  %v2444_v63 = vcombine.low %v2419_v35, %v2427_v58  ;;  %v3395_v12 = vld [vmem:[%s3738_s4 + $0x18] sm:$0xff]   ;;  %v3396_v47 = vld [vmem:[%s3738_s4 + $0x20] sm:$0xff]   ;;  %v3397_v35 = vld [vmem:[%s3738_s4 + $0x28] sm:$0xff]  }
 0x5db   : > { %v2579_v41 = vrot.slane %v2575_v23, %v2557_v36  ;;  %v3398_v58 = vld [vmem:[%s3738_s4 + $0x30] sm:$0xff]   ;;  %v2813_v23 = vsub.s32 3, %v3753_v11  ;;  %v3430_v11 = vld [vmem:[%s4462_s11 + $0x8] sm:$0xff] (!%p3149_p1)  }
 0x5dc   : > { %v2443_v38 = vrot.slane %v2429_v62, %v3797_v39  ;;  %v2459_v19 = vrot.slane %v2445_v6, %v3797_v39  ;;  %v2436_v43 = vrot.slane %v2428_v53, %v3797_v39  ;;  %v2452_v25 = vrot.slane %v2444_v63, %v3797_v39  ;;  %v3136_v62 = vld [vmem:[%s632_s1] ss:$0 sm:$0xff] }
 0x5de   : > { %v2462_v51 = vcombine.low %v2443_v38, %v2459_v19  ;;  %v2461_v48 = vcombine.high %v2436_v43, %v2452_v25  ;;  %v2463_v33 = vcombine.high %v2443_v38, %v2459_v19  ;;  %v2460_v34 = vcombine.low %v2436_v43, %v2452_v25 }
 0x5e0   : > { %2469 = vrot.lane.b32.xlu1 %v2462_v51, %s3539_s14  ;;  %2465 = vrot.lane.b32.xlu0 %v2461_v48, %s3540_s13 }
 0x5e4   : > { %2473 = vrot.lane.b32.xlu1 %v2463_v33, %s3541_s15 }
 0x652   : > { %v2470_v40 = vpop.permute.xlu1 %2469  ;;  %v2466_v52 = vpop.permute.xlu0 %2465 }
 0x653   : > { %v2476_v30 = vsel %vm1281_vm10, %v2460_v34, %v2466_v52 }
 0x654   : > { %v2478_v39 = vsel %vm2477_vm15, %v2476_v30, %v2470_v40 }
 0x656   : > { %v2474_v15 = vpop.permute.xlu1 %2473 }
 0x657   : > { %v2480_v42 = vsel %vm2479_vm0, %v2478_v39, %v2474_v15 }
 0x658   : > { %v2481_v24 = vpack.c.bf16 %v2480_v42, %v2480_v42 }
 0x65a   : > { %3261 = vmatmul.mubr.msk.bf16.vlgmr.msra.gmra.mrb[12].mxu1 %vm661_vm1, %v2481_v24 }
 0x65b   : > { %3288 = vmatprep.mubr.msk.bf16.mxu1 %vm3530_vm2, %v3529_v5  ;;  %3273 = vmatpush3.bf16.msra.mxu1 %v3392_v37  ;;  %v3429_v37 = vld [vmem:[%s4462_s11] sm:$0xff] (!%p3149_p1)  }
 0x65c   : > { %3274 = vmatprep.subr.bf16.mxu1 %v3529_v5 }
 0x65f   : > { %3275 = vmatpush3.bf16.msra.mxu1 %v3393_v57  ;;  %v3542_v57 = vmov (!%p3149_p1), 0.0  }
 0x660   : > { %3276 = vmatprep.subr.bf16.mxu1 %v3529_v5  ;;  %3292 = vmatprep.subr.bf16.mxu0 (!%p3149_p1), %v3542_v57 }
 0x663   : > { %3277 = vmatpush3.bf16.msra.mxu1 %v3394_v0 }
 0x664   : > { %3278 = vmatprep.subr.bf16.mxu1 %v3529_v5 }
 0x667   : > { %3279 = vmatpush3.bf16.msra.mxu1 %v3395_v12 }
 0x668   : > { %3280 = vmatprep.subr.bf16.mxu1 %v3529_v5 }
 0x66b   : > { %3281 = vmatpush3.bf16.msra.mxu1 %v3396_v47 }
 0x66c   : > { %3282 = vmatprep.subr.bf16.mxu1 %v3529_v5 }
 0x66f   : > { %3283 = vmatpush3.bf16.msra.mxu1 %v3397_v35 }
 0x670   : > { %3284 = vmatprep.subr.bf16.mxu1 %v3529_v5 }
 0x673   : > { %3285 = vmatpush3.bf16.msra.mxu1 %v3398_v58  ;;  %v3150_v58 = vld [vmem:[%s4513_s12] ss:$0 sm:$0xff] (!%p3149_p1) }
 0x674   : > { %3286 = vmatprep.subr.bf16.mxu1 %v3529_v5 }
 0x677   : > { %3287 = vmatpush3.bf16.msra.mxu1 %v3399_v8 }
 0x72d   : > { %v2542_v60 = vpop.f32.mrb[12].mxu1 }
 0x72e   : > { %v2543_v3 = vadd.f32 %v3132_v54, %v2542_v60  ;;  %v3262_v16 = vpop.f32.mrb[13].mxu1 }
 0x72f   : > { %v2545_v20 = vpop.f32.mrb[14].mxu1 }
 0x730   : > { %v2548_v1 = vadd.f32 %v2543_v3, %v3760_v17  ;;  %v3263_v50 = vpop.f32.mrb[15].mxu1 }
 0x732   : > { %v2549_v28 = vmul.f32 %v2548_v1, %v2548_v1 }
 0x734   : > { %v2550_v56 = vsel %vm661_vm1, %v2549_v28, 0.0  ;;  %v2559_v14 = vmul.f32 %v2558_v4, %v2549_v28 }
 0x735   : > { %2551 = vadd.xlane.f32.xlu0 %v2550_v56  ;;  %v2680_v56 = vld [vmem:[#allocation4] sm:$0xff] }
 0x736   : > { %v2560_v21 = vsel %vm661_vm1, %v2559_v14, 0.0 }
 0x737   : > { %2561 = vadd.xlane.f32.xlu1 %v2560_v21 }
 0x7c2   : > { %v2552_v13 = vpop.xlane.xlu0 %2551 }
 0x7c3   : > { %v2553_v18 = vmul.f32 0.03125, %v2552_v13 }
 0x7c4   : > { %v2562_v17 = vpop.xlane.xlu1 %2561 }
 0x7c5   : > { %v2564_v27 = vadd.f32 1e-06, %v2553_v18  ;;  %v2563_v31 = vmul.f32 0.03125, %v2562_v17 }
 0x7c7   : > { %3418 = vrsqrt.f32 %v2564_v27  ;;  %v3148_v27 = vld [vmem:[%s645_s10] ss:$0 sm:$0xff] }
 0x7d1   : > { %v3419_v2 = vpop.eup %3418 }
 0x7d2   : > { %v2566_v45 = vmul.f32 %v3419_v2, %v3419_v2 }
 0x7d4   : > { %v2567_v59 = vmul.f32 %v2566_v45, %v2563_v31 }
 0x7d6   : > { %v2568_v32 = vadd.f32 1e-06, %v2567_v59 }
 0x7d8   : > { %3420 = vrsqrt.f32 %v2568_v32 }
 0x7e2   : > { %v3421_v46 = vpop.eup %3420 }
 0x7e3   : > { %v2570_v10 = vmul.f32 %v3421_v46, %v3419_v2  ;;  %v2790_v46 = vld [vmem:[%s3702_s21] sm:$0xf] }
 0x7e5   : > { %v2571_v49 = vmul.f32 %v2570_v10, %v2548_v1 }
 0x7e7   : > { %v2580_v7 = vmul.f32 %v2579_v41, %v2571_v49  ;;  %v2814_v41 = vrot.slane %v2790_v46, %v2813_v23 }
 0x7e9   : > { %2581 = vst.msk [vmem:[#allocation3] sm:$0xff] %vm661_vm1, %v2580_v7 }
 0x7f0   : > { %v4343_v22 = vld [vmem:[#allocation3] sm:$0xff] }
 0x7f1   : > { %v2584_v44 = vpack.c.bf16 %v4343_v22, %v4343_v22 }
 0x7f3   : > { %3269 = vmatmul.mubr.msk.bf16.vlgmr.msra.gmra.mrb[24].mxu0 %vm661_vm1, %v2584_v44 }
 0x7f4   : > { %3293 = vmatpush3.bf16.msra.mxu0 (!%p3149_p1), %v3429_v37  ;;  %3296 = vmatprep.mubr.msk.bf16.mxu0 (!%p3149_p1), %vm3543_vm3, %v3542_v57 }
 0x7f5   : > { %3294 = vmatprep.subr.bf16.mxu0 (!%p3149_p1), %v3542_v57 }
 0x7f8   : > { %3295 = vmatpush3.bf16.msra.mxu0 (!%p3149_p1), %v3430_v11 }
 0x8c6   : > { %v2646_v6 = vpop.f32.mrb[24].mxu0 }
 0x8c7   : > { %v2647_v53 = vadd.f32 %v3136_v62, %v2646_v6  ;;  %v3270_v63 = vpop.f32.mrb[25].mxu0 }
 0x8c8   : > { %v2649_v38 = vpop.f32.mrb[26].mxu0 }
 0x8c9   : > { %v2652_v19 = vmul.f32 0.70710677, %v2647_v53  ;;  %v3271_v43 = vpop.f32.mrb[27].mxu0  ;;  %v2676_v1 = vmul.f32 0.5, %v2647_v53  ;;  %v3151_v53 = vld [vmem:[%s4514_s20] ss:$0 sm:$0xff] (!%p3149_p1) }
 0x8cb   : > { %v2653_v25 = vand.u32 2147483647, %v2652_v19  ;;  %vm2673_vm2 = vcmp.lt.f32.partialorder %v2652_v19, 0.0 }
 0x8cd   : > { %v2654_v51 = vmul.f32 0.3275911, %v2653_v25  ;;  %v2667_v33 = vsub.f32 0.0, %v2653_v25 }
 0x8cf   : > { %v2655_v48 = vadd.f32 1.0, %v2654_v51  ;;  %v2668_v40 = vmul.f32 %v2667_v33, %v2653_v25 }
 0x8d1   : > { %3422 = vrcp.f32 %v2655_v48  ;;  %v2669_v30 = vmul.f32 1.442695, %v2668_v40 }
 0x8d3   : > { %3424 = vpow2.f32 %v2669_v30 }
 0x8db   : > { %v3423_v34 = vpop.eup %3422 }
 0x8dc   : > { %v2658_v5 = vmul.f32 1.0614054, %v3423_v34 }
 0x8dd   : > { %v3425_v36 = vpop.eup %3424 }
 0x8de   : > { %v2659_v52 = vadd.f32 -1.4531521, %v2658_v5 }
 0x8e0   : > { %v2660_v15 = vmul.f32 %v3423_v34, %v2659_v52 }
 0x8e2   : > { %v2661_v39 = vadd.f32 1.4214138, %v2660_v15 }
 0x8e4   : > { %v2662_v42 = vmul.f32 %v3423_v34, %v2661_v39 }
 0x8e6   : > { %v2663_v24 = vadd.f32 -0.28449672, %v2662_v42 }
 0x8e8   : > { %v2664_v54 = vmul.f32 %v3423_v34, %v2663_v24 }
 0x8ea   : > { %v2665_v55 = vadd.f32 0.2548296, %v2664_v54 }
 0x8ec   : > { %v2666_v9 = vmul.f32 %v3423_v34, %v2665_v55 }
 0x8ee   : > { %v2671_v60 = vmul.f32 %v3425_v36, %v2666_v9 }
 0x8f0   : > { %v2672_v3 = vsub.f32 1.0, %v2671_v60 }
 0x8f2   : > { %v2674_v16 = vsub.f32 0.0, %v2672_v3 }
 0x8f4   : > { %v2675_v20 = vsel %vm2673_vm2, %v2674_v16, %v2672_v3 }
 0x8f5   : > { %v2677_v50 = vadd.f32 1.0, %v2675_v20 }
 0x8f7   : > { %v2678_v4 = vmul.f32 %v2677_v50, %v2676_v1 }
 0x8f9   : > { %v2679_v28 = vpack.c.bf16 %v2678_v4, %v2678_v4 }
 0x8fb   : > { %3289 = vmatmul.mubr.bf16.vlgmr.msra.gmra.mrb[16].mxu1 %v2679_v28 }
 0x9ce   : > { %v2779_v14 = vpop.f32.mrb[16].mxu1 }
 0x9cf   : > { %v2785_v21 = vadd.f32 %v2779_v14, %v2680_v56  ;;  %v3290_v61 = vpop.f32.mrb[17].mxu1 }
 0x9d0   : > { %v2782_v26 = vpop.f32.mrb[18].mxu1 }
 0x9d1   : > { %2786 = vst.msk [vmem:[#allocation4] sm:$0xff] %vm661_vm1, %v2785_v21  ;;  %v3291_v13 = vpop.f32.mrb[19].mxu1 }
 0x9d8   : > { %v2792_v18 = vld [vmem:[#allocation4] sm:$0xff] }
 0x9d9   : > { %v2793_v17 = vadd.f32 %v2792_v18, %v4343_v22 }
 0x9db   : > { %v2801_v2 = vadd.f32 %v3148_v27, %v2793_v17 }
 0x9dd   : > { %v2802_v31 = vmul.f32 %v2801_v2, %v2801_v2 }
 0x9df   : > { %v2803_v45 = vsel %vm661_vm1, %v2802_v31, 0.0 }
 0x9e0   : > { %2804 = vadd.xlane.f32.xlu0 %v2803_v45 }
 0xa6d   : > { %v2805_v59 = vpop.xlane.xlu0 %2804 }
 0xa6e   : > { %v2807_v32 = vmul.f32 0.03125, %v2805_v59 }
 0xa70   : > { %v2808_v29 = vadd.f32 1e-06, %v2807_v32 }
 0xa72   : > { %3426 = vrsqrt.f32 %v2808_v29 }
 0xa7b   : > { %2820 = sbr.rel (%p3149_p1) target bundleno = 3070 (0xbfe), region = 88 }
 0xa7c   : > { %v3427_v10 = vpop.eup %3426 }
 0xa7d   : > { %v2810_v49 = vmul.f32 %v3427_v10, %v2801_v2 }
 0xa7f   : > { %v2815_v7 = vmul.f32 %v2814_v41, %v2810_v49 }
 0xa81   : > { %2816 = vst.msk [vmem:[#allocation2] sm:$0xff] %vm661_vm1, %v2815_v7  ;;  %v2822_v22 = vmul.f32 (!%p3149_p1), %v2815_v7, %v2815_v7 }
 0xa83   : > { %v2823_v44 = vsel %vm661_vm1, %v2822_v22, 0.0 }
 0xa84   : > { %2824 = vadd.xlane.f32.xlu0 %v2823_v44 }
 0xb11   : > { %v2825_v0 = vpop.xlane.xlu0 %2824 }
 0xb12   : > { %v2826_v12 = vmul.f32 0.03125, %v2825_v0 }
 0xb14   : > { %v2827_v47 = vadd.f32 1e-06, %v2826_v12 }
 0xb16   : > { %3431 = vrsqrt.f32 %v2827_v47 }
 0xb20   : > { %v3432_v35 = vpop.eup %3431 }
 0xb21   : > { %v2829_v8 = vmul.f32 %v3432_v35, %v2815_v7 }
 0xb23   : > { %v2836_v62 = vmul.f32 %v3150_v58, %v2829_v8 }
 0xb25   : > { %v2837_v6 = vpack.c.bf16 %v2836_v62, %v2836_v62 }
 0xb27   : > { %3297 = vmatmul.mubr.msk.bf16.vlgmr.msra.gmra.mrb[0].mxu0 %vm661_vm1, %v2837_v6 }
 0xbfa   : > { %v2898_v63 = vpop.f32.mrb[0].mxu0 }
 0xbfb   : > { %v2899_v38 = vadd.f32 %v3151_v53, %v2898_v63  ;;  %v3298_v19 = vpop.f32.mrb[1].mxu0 }
 0xbfc   : > { %v2901_v43 = vpop.f32.mrb[2].mxu0 }
 0xbfd   : > { %2904 = vst [vmem:[%s594_s22] sm:$0xff] %v2899_v38  ;;  %v3299_v25 = vpop.f32.mrb[3].mxu0 }
 0xbfe PF: > { %s4515_s23 = sld [smem:[#allocation11_spill]]  ;;  %s4518_s26 = sld [smem:[#allocation26_spill]] }
 0xbff   : > { %s4516_s24 = sld [smem:[#allocation9_spill]]  ;;  %s2919_s27 = sshll.u32 %s594_s22, 4  ;;  %s2920_s27 = int_to_ptr.vmem [resolvable:$true] %s2919_s27 }
 0xc00   : > { %s3433_s19 = scalar_lea.vmem %s2920_s27, 128  ;;  %s3544_s10 = smov [#allocation5]  }
 0xc01   : > { %p3434_p2 = scmp.ne.s32.totalorder %s2920_s27, %s3433_s19  ;;  %s3437_s21 = sshll.u32 %s3544_s10, 4  ;;  %s3438_s21 = int_to_ptr.vmem [resolvable:$false] %s3437_s21 }
 0xc02   : > { %s3439_s18 = scalar_lea.vmem %s3438_s21, 256  ;;  %p3440_p6 = scmp.lt.s32.totalorder %s2920_s27, %s3438_s21 }
 0xc03   : > { %p3435_p4 = pnand %p3434_p2, %p3664_p3  ;;  %p3441_p7 = scmp.lt.s32.totalorder %s3439_s18, %s3433_s19 }
 0xc04   : > { %s3156_s14 = sshll.u32 %s4515_s23, 7  ;;  %s4519_s0 = smov %s4518_s26 }
 0xc05   : > { %s4400_s29 = scalar_lea.hbm %s4518_s26, %s3156_s14  ;;  %s4520_s1 = sand.u32 1, %s4516_s24  }
 0xc06   : > { %s2906_s4 = scalar_lea.sflag [#allocation6], %s4520_s1  ;;  %p3436_p5 = pneg %p3435_p4 }
 0xc07   : > { %p3442_p8 = por %p3441_p7, %p3440_p6 }
 0xc09   : > { %p3443_p10 = pnand %p3442_p8, %p3436_p5 }
 0xc0b   : > { %3446 = shalt.err (!%p3443_p10)
}
 0xc0c   : > { %s3447_s17 = scalar_lea.hbm %s4400_s29, 128  ;;  %s3451_s2 = scalar_lea.hbm %s4519_s0, 256 }
 0xc0d   : > { %p3448_p11 = scmp.ne.s32.totalorder %s4400_s29, %s3447_s17  ;;  %p3452_p0 = scmp.lt.u32.totalorder %s4400_s29, %s4519_s0 }
 0xc0e   : > { %p3453_p1 = scmp.lt.u32.totalorder %s3451_s2, %s3447_s17  ;;  %p3455_p4 = scmp.lt.u32.totalorder %s3447_s17, %s4400_s29 }
 0xc0f   : > { %p3449_p12 = pnand %p3448_p11, %p3664_p3 }
 0xc10   : > { %p3454_p2 = por %p3453_p1, %p3452_p0 }
 0xc11   : > { %p3450_p13 = pneg %p3449_p12 }
 0xc12   : > { %p3456_p5 = por %p3455_p4, %p3454_p2 }
 0xc14   : > { %p3457_p6 = pnand %p3456_p5, %p3450_p13 }
 0xc16   : > { %3460 = shalt.err (!%p3457_p6)
}
 0xc17   : > { %3300 = dma.vmem_to_hbm [thread:$0]  (%p3664_p3), %s2920_s27, 128, %s4400_s29, %s2906_s4  }
 0xc18 PF: > { %s4521_s30 = sld [smem:[#allocation14_spill]]  ;;  %s4522_s20 = sld [smem:[#allocation8_spill]] }
 0xc1e   : > { %p3306_p7 = scmp.ge.s32.totalorder %s4521_s30, 2  ;;  %s2931_s24 = sand.u32 1, %s4522_s20  }
 0xc1f   : > { %s2932_s14 = scalar_lea.sflag [#allocation6], %s2931_s24 }
 0xc20   : > { %p3303_p8 = pnand %p3306_p7, %p3674_p9 }
 0xc22   : > { %3494 = dma.done.wait (!%p3303_p8), %s2932_s14, 128  }
 0xc23   : > { %3496 = vsyncadd (!%p3303_p8), %s2932_s14, 4294967168  ;;  %s26_s15 = sadd.s32 1, %s4521_s30   ;;  %s4524_s25 = sld [smem:[#allocation9_spill]] }
 0xc24   : > { %p23_p10 = scmp.ge.s32.totalorder %s26_s15, 6   ;;  %s4525_s26 = sld [smem:[#allocation10_spill]] }
 0xc25   : > { %s4526_s27 = sld [smem:[#allocation19_spill]]  ;;  %s4527_s28 = sld [smem:[#allocation12_spill]] }
 0xc26   : > { %s4528_s29 = sld [smem:[#allocation13_spill]]  ;;  %s4529_s30 = sld [smem:[#allocation15_spill]] }
 0xc27   : > { %s4530_s14 = sld [smem:[#allocation17_spill]]  ;;  %25 = sbr.rel (!%p23_p10) target bundleno = 13 (0xd), region = 150 }
 0xc2e   :  { %2937 = vsyncpa [#allocation6], 1 }
 0xc2f   :  { %2939 = vsyncpa [#allocation6 + $0x1], 1 }

</bundles_post_ra>
